<compile_context>
chip_gen: v7x
topology: tpu7x:2x2x1
jax: 0.10.0
libtpu: 0.0.40
codegen_flags: <defaults>
</compile_context>

<pallas_src>
import functools

import jax
import jax.numpy as jnp
from jax.experimental import pallas as pl
from jax.experimental.pallas import tpu as pltpu


_VMEM_LIMIT = 32 * 1024 * 1024   # safe on v7x (64 MiB core) and below


def _compute_dtype():
    """bf16 MXU operands on a real TPU backend; f32 elsewhere (CPU interpret
    does not support BF16 x BF16 = F32 dots)."""
    try:
        return jnp.bfloat16 if jax.default_backend() == "tpu" else jnp.float32
    except Exception:  # pragma: no cover
        return jnp.float32


def _cparams(sem):
    return pltpu.CompilerParams(dimension_semantics=sem,
                                vmem_limit_bytes=_VMEM_LIMIT)


# ----------------------------------------------------------------------------
# Kernel 1: fused 1x1 embedding conv (2048->256) + theta/phi/g projections
#           + per-batch S_b = phi_b^T @ g_b reduction (f32 VMEM accumulator).
#   Grid (B, ceil(N/tm)); row axis is the S reduction ("arbitrary").
#   Only emb and theta (1/N folded) are written to HBM; phi/g stay in VMEM.
# ----------------------------------------------------------------------------
def _emb_proj_s_kernel(x_ref, we_ref, be_ref, wp_ref, bp_ref,
                       emb_ref, th_ref, s_ref, acc_ref, *, ci, n_rows, tm):
    i = pl.program_id(1)

    @pl.when(i == 0)
    def _():
        acc_ref[...] = jnp.zeros_like(acc_ref)

    cdt = we_ref.dtype   # compute dtype (bf16 on TPU, f32 on interpret/CPU)

    emb = jnp.dot(x_ref[...], we_ref[...],
                  preferred_element_type=jnp.float32) + be_ref[...]
    emb_ref[...] = emb.astype(emb_ref.dtype)

    tpg = jnp.dot(emb.astype(cdt), wp_ref[...],
                  preferred_element_type=jnp.float32) + bp_ref[...]
    th_ref[...] = tpg[:, :ci].astype(th_ref.dtype)          # theta (1/N folded)

    if n_rows % tm != 0:
        # cdiv grid: mask rows of the padded tail tile out of the S reduction.
        row = i * tm + jax.lax.broadcasted_iota(jnp.int32, (tm, 1), 0)
        valid = row < n_rows
        phi = jnp.where(valid, tpg[:, ci:2 * ci], 0.0)
        g = jnp.where(valid, tpg[:, 2 * ci:3 * ci], 0.0)
    else:
        phi = tpg[:, ci:2 * ci]
        g = tpg[:, 2 * ci:3 * ci]

    acc_ref[...] += jax.lax.dot_general(
        phi.astype(cdt), g.astype(cdt),
        (((0,), (0,)), ((), ())), preferred_element_type=jnp.float32)

    @pl.when(i == pl.num_programs(1) - 1)
    def _():
        s_ref[...] = acc_ref[...]


def emb_proj_s(x3, we, be, w_tpg, b_tpg, ci, *, tm_target=1024):
    B, N, Cin = x3.shape
    Ce = we.shape[1]
    tm = min(N, tm_target)
    kern = functools.partial(_emb_proj_s_kernel, ci=ci, n_rows=N, tm=tm)
    return pl.pallas_call(
        kern,
        out_shape=(jax.ShapeDtypeStruct((B, N, Ce), x3.dtype),       # emb
                   jax.ShapeDtypeStruct((B, N, ci), x3.dtype),       # theta/N
                   jax.ShapeDtypeStruct((B, ci, ci), jnp.float32)),  # S = phi^T g
        grid_spec=pltpu.PrefetchScalarGridSpec(
            num_scalar_prefetch=0,
            grid=(B, pl.cdiv(N, tm)),
            in_specs=[
                pl.BlockSpec((None, tm, Cin), lambda b, i: (b, i, 0)),
                pl.BlockSpec((Cin, Ce), lambda b, i: (0, 0)),
                pl.BlockSpec((1, Ce), lambda b, i: (0, 0)),
                pl.BlockSpec((Ce, 3 * ci), lambda b, i: (0, 0)),
                pl.BlockSpec((1, 3 * ci), lambda b, i: (0, 0)),
            ],
            out_specs=(pl.BlockSpec((None, tm, Ce), lambda b, i: (b, i, 0)),
                       pl.BlockSpec((None, tm, ci), lambda b, i: (b, i, 0)),
                       pl.BlockSpec((None, ci, ci), lambda b, i: (b, 0, 0))),
            scratch_shapes=[pltpu.VMEM((ci, ci), jnp.float32)],
        ),
        compiler_params=_cparams(("parallel", "arbitrary")),
    )(x3, we, be, w_tpg, b_tpg)


# ----------------------------------------------------------------------------
# Kernel 2: y = theta_scaled @ S ; W_z (BN folded) ; residual ; classifier
#           (split last_w -> no HBM concat) ; log_softmax over classes.
#   Output written TRANSPOSED and lane-dense as (B, nc, N) blocks, so the
#   result is already in NCHW order (no wrapper transpose, no z round-trip).
# ----------------------------------------------------------------------------
def _attn_cls_kernel(th_ref, emb_ref, s_ref, wz_ref, bz_ref,
                     w1t_ref, w2t_ref, bl_ref, o_ref):
    cdt = wz_ref.dtype
    y = jnp.dot(th_ref[...], s_ref[...].astype(cdt),
                preferred_element_type=jnp.float32)                     # (tq, Ci)
    wy = jnp.dot(y.astype(cdt), wz_ref[...],
                 preferred_element_type=jnp.float32) + bz_ref[...]      # (tq, Ce)
    z = wy + emb_ref[...]                                               # residual

    dn = (((1,), (1,)), ((), ()))       # contract over the Ce axis
    lt = jax.lax.dot_general(w1t_ref[...], emb_ref[...].astype(cdt), dn,
                             preferred_element_type=jnp.float32)
    lt = lt + jax.lax.dot_general(w2t_ref[...], z.astype(cdt), dn,
                                  preferred_element_type=jnp.float32)
    lt = lt + bl_ref[...]                                               # (nc, tq)

    m = jnp.max(lt, axis=0, keepdims=True)
    s = lt - m
    lse = jnp.log(jnp.sum(jnp.exp(s), axis=0, keepdims=True))
    o_ref[...] = (s - lse).astype(o_ref.dtype)


def attn_classifier(th3, emb3, s3, wz, bz, w1t, w2t, bl, *, tq_target=512):
    B, N, Ci = th3.shape
    Ce = emb3.shape[-1]
    nc = w1t.shape[0]
    tq = min(N, tq_target)
    return pl.pallas_call(
        _attn_cls_kernel,
        out_shape=jax.ShapeDtypeStruct((B, nc, N), jnp.float32),
        grid_spec=pltpu.PrefetchScalarGridSpec(
            num_scalar_prefetch=0,
            grid=(B, pl.cdiv(N, tq)),
            in_specs=[
                pl.BlockSpec((None, tq, Ci), lambda b, i: (b, i, 0)),   # theta/N
                pl.BlockSpec((None, tq, Ce), lambda b, i: (b, i, 0)),   # emb
                pl.BlockSpec((None, Ci, Ci), lambda b, i: (b, 0, 0)),   # S_b
                pl.BlockSpec((Ci, Ce), lambda b, i: (0, 0)),            # W_z (BN folded)
                pl.BlockSpec((1, Ce), lambda b, i: (0, 0)),             # b_z (BN folded)
                pl.BlockSpec((nc, Ce), lambda b, i: (0, 0)),            # last_w emb half^T
                pl.BlockSpec((nc, Ce), lambda b, i: (0, 0)),            # last_w z half^T
                pl.BlockSpec((nc, 1), lambda b, i: (0, 0)),             # last_b
            ],
            out_specs=pl.BlockSpec((None, nc, tq), lambda b, i: (b, 0, i)),
        ),
        compiler_params=_cparams(("parallel", "parallel")),
    )(th3, emb3, s3, wz, bz, w1t, w2t, bl)


# ----------------------------------------------------------------------------
# Full forward (downsample=False, segSize=None)
# ----------------------------------------------------------------------------
def non_local2d_forward(x_nchw, params):
    B, Cin, H, W = x_nchw.shape
    N = H * W
    Ce = params["emb_w"].shape[1]
    Ci = params["theta_w"].shape[1]
    cdt = _compute_dtype()

    # NCHW -> (B, N, Cin); the cast is fused into the transpose copy.
    x3 = jnp.transpose(x_nchw, (0, 2, 3, 1)).reshape(B, N, Cin).astype(cdt)

    # ---- fold constants into the (tiny) weights; pre-cast matmul operands.
    inv_n = 1.0 / N                                          # 'dot' normalization
    w_tpg = jnp.concatenate([params["theta_w"] * inv_n, params["phi_w"],
                             params["g_w"]], axis=1).astype(cdt)
    b_tpg = jnp.concatenate([params["theta_b"] * inv_n, params["phi_b"],
                             params["g_b"]], axis=0).reshape(1, 3 * Ci)
    wz_fold = (params["wz_w"] * params["bn_scale"][None, :]).astype(cdt)
    bz_fold = (params["wz_b"] * params["bn_scale"] + params["bn_shift"]).reshape(1, Ce)
    we = params["emb_w"].astype(cdt)
    be = params["emb_b"].reshape(1, Ce)
    w1t = params["last_w"][:Ce].T.astype(cdt)                # (nc, Ce) for emb half
    w2t = params["last_w"][Ce:].T.astype(cdt)                # (nc, Ce) for z half
    b_last = params["last_b"].reshape(-1, 1)

    # ---- kernels
    emb3, th3, s3 = emb_proj_s(x3, we, be, w_tpg, b_tpg, Ci)       # bf16/bf16/f32
    pred = attn_classifier(th3, emb3, s3, wz_fold, bz_fold,
                           w1t, w2t, b_last)                       # (B, nc, N)
    nc = pred.shape[1]
    return pred.reshape(B, nc, H, W)                               # already NCHW


# ----------------------------------------------------------------------------
# Pure-JAX f32 reference (PyTorch math, original association) for validation
# ----------------------------------------------------------------------------
def reference_forward(x_nchw, p):
    hp = jax.lax.Precision.HIGHEST
    B, Cin, H, W = x_nchw.shape
    N = H * W
    x2 = jnp.transpose(x_nchw, (0, 2, 3, 1)).reshape(B * N, Cin)
    emb = jnp.dot(x2, p["emb_w"], precision=hp) + p["emb_b"]
    C = emb.shape[1]
    emb3 = emb.reshape(B, N, C)
    theta = jnp.einsum("bnc,cd->bnd", emb3, p["theta_w"], precision=hp) + p["theta_b"]
    phi = jnp.einsum("bnc,cd->bnd", emb3, p["phi_w"], precision=hp) + p["phi_b"]
    g = jnp.einsum("bnc,cd->bnd", emb3, p["g_w"], precision=hp) + p["g_b"]
    f = jnp.einsum("bnd,bmd->bnm", theta, phi, precision=hp) / N
    y = jnp.einsum("bnm,bmd->bnd", f, g, precision=hp)
    wy = jnp.einsum("bnd,dc->bnc", y, p["wz_w"], precision=hp) + p["wz_b"]
    wy = wy * p["bn_scale"] + p["bn_shift"]
    z3 = wy + emb3
    cat = jnp.concatenate([emb3, z3], axis=-1).reshape(B * N, 2 * C)
    logits = jnp.dot(cat, p["last_w"], precision=hp) + p["last_b"]
    logp = jax.nn.log_softmax(logits, axis=-1)
    return logp.reshape(B, H, W, -1).transpose(0, 3, 1, 2)


# ----------------------------------------------------------------------------
# Deterministic parameter init (shapes from Non_local2d.__init__ / NLBlockND).
# Conv weights are stored as (Cin, Cout) matmul matrices.
# ----------------------------------------------------------------------------
def init_params(key, in_ch=2048, emb_ch=256, inter_ch=128, num_class=8):
    ks = jax.random.split(key, 16)
    n = lambda k, s, sc: jax.random.normal(k, s, jnp.float32) * sc
    eps = 1e-5
    gamma = n(ks[12], (emb_ch,), 0.1) + 1.0
    beta = n(ks[13], (emb_ch,), 0.1)
    mean = n(ks[14], (emb_ch,), 0.1)
    var = jnp.abs(n(ks[15], (emb_ch,), 0.1)) + 1.0
    scale = gamma / jnp.sqrt(var + eps)
    shift = beta - mean * scale
    return {
        "emb_w": n(ks[0], (in_ch, emb_ch), 0.02), "emb_b": n(ks[1], (emb_ch,), 0.02),
        "theta_w": n(ks[2], (emb_ch, inter_ch), 0.05), "theta_b": n(ks[3], (inter_ch,), 0.02),
        "phi_w": n(ks[4], (emb_ch, inter_ch), 0.05), "phi_b": n(ks[5], (inter_ch,), 0.02),
        "g_w": n(ks[6], (emb_ch, inter_ch), 0.05), "g_b": n(ks[7], (inter_ch,), 0.02),
        "wz_w": n(ks[8], (inter_ch, emb_ch), 0.05), "wz_b": n(ks[9], (emb_ch,), 0.02),
        "bn_scale": scale, "bn_shift": shift,
        "last_w": n(ks[10], (2 * emb_ch, num_class), 0.05),
        "last_b": n(ks[11], (num_class,), 0.02),
    }


if __name__ == "__main__":
    key = jax.random.PRNGKey(0)
    kx, kp = jax.random.split(key)

    B, Cin, H, W = 2, 2048, 8, 8          # small spatial; channels fixed by the module
    num_class = 8
    x = jax.random.normal(kx, (B, Cin, H, W), jnp.float32)
    params = init_params(kp, in_ch=Cin, emb_ch=256, inter_ch=128, num_class=num_class)

    out = jax.jit(non_local2d_forward)(x, params)
    out = jax.block_until_ready(out)

    ref = reference_forward(x, params)
    assert out.shape == (B, num_class, H, W)
    assert bool(jnp.all(jnp.isfinite(out)))
    # bf16 storage + bf16 MXU operands (f32 accumulation) on TPU -> loose tol;
    # f32 compute path (CPU / interpret) -> tight tol.
    tol = 1e-1 if _compute_dtype() == jnp.bfloat16 else 5e-3
    err = float(jnp.max(jnp.abs(out - ref)))
    assert bool(jnp.allclose(out, ref, rtol=tol, atol=tol)), f"max abs diff {err}"
    print("KERNEL_OK")
</pallas_src>

<mosaic_0001>
module attributes {stable_mosaic.version = 11 : i64} {
  func.func @_attn_cls_kernel(%arg0: i32, %arg1: i32, %arg2: memref<1x64x128xf32, #tpu.memory_space<vmem>>, %arg3: memref<1x64x256xf32, #tpu.memory_space<vmem>>, %arg4: memref<1x128x128xf32, #tpu.memory_space<vmem>>, %arg5: memref<128x256xf32, #tpu.memory_space<vmem>>, %arg6: memref<1x256xf32, #tpu.memory_space<vmem>>, %arg7: memref<8x256xf32, #tpu.memory_space<vmem>>, %arg8: memref<8x256xf32, #tpu.memory_space<vmem>>, %arg9: memref<8x1xf32, #tpu.memory_space<vmem>>, %arg10: memref<1x8x64xf32, #tpu.memory_space<vmem>>) attributes {dimension_semantics = [#tpu.dimension_semantics<parallel>, #tpu.dimension_semantics<parallel>], iteration_bounds = array<i64: 2, 1>, scalar_prefetch = 0 : i64, scratch_operands = 0 : i64, tpu.core_type = #tpu.core_type<tc>, window_params = [{transform_indices = @transform_0, window_bounds = array<i64: 1, 64, 128>}, {transform_indices = @transform_1, window_bounds = array<i64: 1, 64, 256>}, {transform_indices = @transform_2, window_bounds = array<i64: 1, 128, 128>}, {pipeline_mode = #tpu.pipeline_mode<synchronous>, transform_indices = @transform_3, window_bounds = array<i64: 128, 256>}, {pipeline_mode = #tpu.pipeline_mode<synchronous>, transform_indices = @transform_4, window_bounds = array<i64: 1, 256>}, {pipeline_mode = #tpu.pipeline_mode<synchronous>, transform_indices = @transform_5, window_bounds = array<i64: 8, 256>}, {pipeline_mode = #tpu.pipeline_mode<synchronous>, transform_indices = @transform_6, window_bounds = array<i64: 8, 256>}, {pipeline_mode = #tpu.pipeline_mode<synchronous>, transform_indices = @transform_7, window_bounds = array<i64: 8, 1>}, {transform_indices = @transform_8, window_bounds = array<i64: 1, 8, 64>}]} {
    %c0 = arith.constant 0 : index
    %c0_0 = arith.constant 0 : index
    %c0_1 = arith.constant 0 : index
    %0 = vector.load %arg2[%c0, %c0_0, %c0_1] : memref<1x64x128xf32, #tpu.memory_space<vmem>>, vector<1x64x128xf32>
    %1 = vector.shape_cast %0 : vector<1x64x128xf32> to vector<64x128xf32>
    %c0_2 = arith.constant 0 : index
    %c0_3 = arith.constant 0 : index
    %c0_4 = arith.constant 0 : index
    %2 = vector.load %arg4[%c0_2, %c0_3, %c0_4] : memref<1x128x128xf32, #tpu.memory_space<vmem>>, vector<1x128x128xf32>
    %3 = vector.shape_cast %2 : vector<1x128x128xf32> to vector<128x128xf32>
    %cst = arith.constant dense<0.000000e+00> : vector<64x128xf32>
    %4 = tpu.matmul %1, %3, %cst {dimension_numbers = #tpu.dot_dimension_numbers<[1], [0], [0], [1], [0, 0, 1, 1], [], []>} : vector<64x128xf32>, vector<128x128xf32>, vector<64x128xf32> -> vector<64x128xf32>
    %c0_5 = arith.constant 0 : index
    %c0_6 = arith.constant 0 : index
    %5 = vector.load %arg5[%c0_5, %c0_6] : memref<128x256xf32, #tpu.memory_space<vmem>>, vector<128x256xf32>
    %cst_7 = arith.constant dense<0.000000e+00> : vector<64x256xf32>
    %6 = tpu.matmul %4, %5, %cst_7 {dimension_numbers = #tpu.dot_dimension_numbers<[1], [0], [0], [1], [0, 0, 1, 1], [], []>} : vector<64x128xf32>, vector<128x256xf32>, vector<64x256xf32> -> vector<64x256xf32>
    %c0_8 = arith.constant 0 : index
    %c0_9 = arith.constant 0 : index
    %7 = vector.load %arg6[%c0_8, %c0_9] : memref<1x256xf32, #tpu.memory_space<vmem>>, vector<1x256xf32>
    %8 = vector.broadcast %7 : vector<1x256xf32> to vector<64x256xf32>
    %9 = arith.addf %6, %8 : vector<64x256xf32>
    %c0_10 = arith.constant 0 : index
    %c0_11 = arith.constant 0 : index
    %c0_12 = arith.constant 0 : index
    %10 = vector.load %arg3[%c0_10, %c0_11, %c0_12] : memref<1x64x256xf32, #tpu.memory_space<vmem>>, vector<1x64x256xf32>
    %11 = vector.shape_cast %10 : vector<1x64x256xf32> to vector<64x256xf32>
    %12 = arith.addf %9, %11 : vector<64x256xf32>
    %c0_13 = arith.constant 0 : index
    %c0_14 = arith.constant 0 : index
    %13 = vector.load %arg7[%c0_13, %c0_14] : memref<8x256xf32, #tpu.memory_space<vmem>>, vector<8x256xf32>
    %c0_15 = arith.constant 0 : index
    %c0_16 = arith.constant 0 : index
    %c0_17 = arith.constant 0 : index
    %14 = vector.load %arg3[%c0_15, %c0_16, %c0_17] : memref<1x64x256xf32, #tpu.memory_space<vmem>>, vector<1x64x256xf32>
    %15 = vector.shape_cast %14 : vector<1x64x256xf32> to vector<64x256xf32>
    %cst_18 = arith.constant dense<0.000000e+00> : vector<8x64xf32>
    %16 = tpu.matmul %13, %15, %cst_18 {dimension_numbers = #tpu.dot_dimension_numbers<[1], [1], [0], [0], [0, 0, 1, 0], [], []>} : vector<8x256xf32>, vector<64x256xf32>, vector<8x64xf32> -> vector<8x64xf32>
    %c0_19 = arith.constant 0 : index
    %c0_20 = arith.constant 0 : index
    %17 = vector.load %arg8[%c0_19, %c0_20] : memref<8x256xf32, #tpu.memory_space<vmem>>, vector<8x256xf32>
    %cst_21 = arith.constant dense<0.000000e+00> : vector<8x64xf32>
    %18 = tpu.matmul %17, %12, %cst_21 {dimension_numbers = #tpu.dot_dimension_numbers<[1], [1], [0], [0], [0, 0, 1, 0], [], []>} : vector<8x256xf32>, vector<64x256xf32>, vector<8x64xf32> -> vector<8x64xf32>
    %19 = arith.addf %16, %18 : vector<8x64xf32>
    %c0_22 = arith.constant 0 : index
    %c0_23 = arith.constant 0 : index
    %20 = vector.load %arg9[%c0_22, %c0_23] : memref<8x1xf32, #tpu.memory_space<vmem>>, vector<8x1xf32>
    %21 = vector.broadcast %20 : vector<8x1xf32> to vector<8x64xf32>
    %22 = arith.addf %19, %21 : vector<8x64xf32>
    %cst_24 = arith.constant dense<0xFF800000> : vector<64xf32>
    %23 = vector.multi_reduction <maximumf>, %22, %cst_24 [0] : vector<8x64xf32> to vector<64xf32>
    %24 = vector.shape_cast %23 : vector<64xf32> to vector<1x64xf32>
    %25 = vector.broadcast %24 : vector<1x64xf32> to vector<8x64xf32>
    %26 = arith.subf %22, %25 : vector<8x64xf32>
    %27 = math.exp %26 : vector<8x64xf32>
    %cst_25 = arith.constant dense<0.000000e+00> : vector<64xf32>
    %28 = vector.multi_reduction <add>, %27, %cst_25 [0] : vector<8x64xf32> to vector<64xf32>
    %29 = vector.shape_cast %28 : vector<64xf32> to vector<1x64xf32>
    %30 = math.log %29 : vector<1x64xf32>
    %31 = vector.broadcast %30 : vector<1x64xf32> to vector<8x64xf32>
    %32 = arith.subf %26, %31 : vector<8x64xf32>
    %c0_26 = arith.constant 0 : index
    %c0_27 = arith.constant 0 : index
    %c0_28 = arith.constant 0 : index
    %33 = vector.load %arg10[%c0_26, %c0_27, %c0_28] : memref<1x8x64xf32, #tpu.memory_space<vmem>>, vector<1x8x64xf32>
    %34 = vector.shape_cast %33 : vector<1x8x64xf32> to vector<8x64xf32>
    %35 = vector.shape_cast %32 : vector<8x64xf32> to vector<1x8x64xf32>
    tpu.vector_store %arg10[%c0_26, %c0_27, %c0_28], %35 {strides = array<i32>} : memref<1x8x64xf32, #tpu.memory_space<vmem>>, vector<1x8x64xf32>,
    return
  }
  func.func @transform_0(%arg0: i32, %arg1: i32) -> (i32, i32, i32) {
    %c0_i32 = arith.constant 0 : i32
    %c0_i32_0 = arith.constant 0 : i32
    return %arg0, %arg1, %c0_i32 : i32, i32, i32
  }
  func.func @transform_1(%arg0: i32, %arg1: i32) -> (i32, i32, i32) {
    %c0_i32 = arith.constant 0 : i32
    %c0_i32_0 = arith.constant 0 : i32
    return %arg0, %arg1, %c0_i32 : i32, i32, i32
  }
  func.func @transform_2(%arg0: i32, %arg1: i32) -> (i32, i32, i32) {
    %c0_i32 = arith.constant 0 : i32
    %c0_i32_0 = arith.constant 0 : i32
    %c0_i32_1 = arith.constant 0 : i32
    return %arg0, %c0_i32, %c0_i32_0 : i32, i32, i32
  }
  func.func @transform_3(%arg0: i32, %arg1: i32) -> (i32, i32) {
    %c0_i32 = arith.constant 0 : i32
    %c0_i32_0 = arith.constant 0 : i32
    %c0_i32_1 = arith.constant 0 : i32
    return %c0_i32, %c0_i32_0 : i32, i32
  }
  func.func @transform_4(%arg0: i32, %arg1: i32) -> (i32, i32) {
    %c0_i32 = arith.constant 0 : i32
    %c0_i32_0 = arith.constant 0 : i32
    %c0_i32_1 = arith.constant 0 : i32
    return %c0_i32, %c0_i32_0 : i32, i32
  }
  func.func @transform_5(%arg0: i32, %arg1: i32) -> (i32, i32) {
    %c0_i32 = arith.constant 0 : i32
    %c0_i32_0 = arith.constant 0 : i32
    %c0_i32_1 = arith.constant 0 : i32
    return %c0_i32, %c0_i32_0 : i32, i32
  }
  func.func @transform_6(%arg0: i32, %arg1: i32) -> (i32, i32) {
    %c0_i32 = arith.constant 0 : i32
    %c0_i32_0 = arith.constant 0 : i32
    %c0_i32_1 = arith.constant 0 : i32
    return %c0_i32, %c0_i32_0 : i32, i32
  }
  func.func @transform_7(%arg0: i32, %arg1: i32) -> (i32, i32) {
    %c0_i32 = arith.constant 0 : i32
    %c0_i32_0 = arith.constant 0 : i32
    %c0_i32_1 = arith.constant 0 : i32
    return %c0_i32, %c0_i32_0 : i32, i32
  }
  func.func @transform_8(%arg0: i32, %arg1: i32) -> (i32, i32, i32) {
    %c0_i32 = arith.constant 0 : i32
    %c0_i32_0 = arith.constant 0 : i32
    return %arg0, %c0_i32, %arg1 : i32, i32, i32
  }
}

module attributes {stable_mosaic.version = 11 : i64} {
  func.func @_emb_proj_s_kernel(%arg0: i32, %arg1: i32, %arg2: memref<1x64x2048xf32, #tpu.memory_space<vmem>>, %arg3: memref<2048x256xf32, #tpu.memory_space<vmem>>, %arg4: memref<1x256xf32, #tpu.memory_space<vmem>>, %arg5: memref<256x384xf32, #tpu.memory_space<vmem>>, %arg6: memref<1x384xf32, #tpu.memory_space<vmem>>, %arg7: memref<1x64x256xf32, #tpu.memory_space<vmem>>, %arg8: memref<1x64x128xf32, #tpu.memory_space<vmem>>, %arg9: memref<1x128x128xf32, #tpu.memory_space<vmem>>, %arg10: memref<128x128xf32, #tpu.memory_space<vmem>>) attributes {dimension_semantics = [#tpu.dimension_semantics<parallel>, #tpu.dimension_semantics<arbitrary>], iteration_bounds = array<i64: 2, 1>, scalar_prefetch = 0 : i64, scratch_operands = 1 : i64, tpu.core_type = #tpu.core_type<tc>, window_params = [{transform_indices = @transform_0, window_bounds = array<i64: 1, 64, 2048>}, {pipeline_mode = #tpu.pipeline_mode<synchronous>, transform_indices = @transform_1, window_bounds = array<i64: 2048, 256>}, {pipeline_mode = #tpu.pipeline_mode<synchronous>, transform_indices = @transform_2, window_bounds = array<i64: 1, 256>}, {pipeline_mode = #tpu.pipeline_mode<synchronous>, transform_indices = @transform_3, window_bounds = array<i64: 256, 384>}, {pipeline_mode = #tpu.pipeline_mode<synchronous>, transform_indices = @transform_4, window_bounds = array<i64: 1, 384>}, {transform_indices = @transform_5, window_bounds = array<i64: 1, 64, 256>}, {transform_indices = @transform_6, window_bounds = array<i64: 1, 64, 128>}, {transform_indices = @transform_7, window_bounds = array<i64: 1, 128, 128>}]} {
    %c0_i32 = arith.constant 0 : i32
    %0 = arith.cmpi eq, %arg1, %c0_i32 : i32
    %1 = arith.extui %0 : i1 to i32
    %c0_i32_0 = arith.constant 0 : i32
    %2 = arith.cmpi ne, %1, %c0_i32_0 : i32
    scf.if %2 {
      %cst_25 = arith.constant 0.000000e+00 : f32
      %31 = vector.broadcast %cst_25 : f32 to vector<128x128xf32>
      %c0_26 = arith.constant 0 : index
      %c0_27 = arith.constant 0 : index
      %32 = vector.load %arg10[%c0_26, %c0_27] : memref<128x128xf32, #tpu.memory_space<vmem>>, vector<128x128xf32>
      tpu.vector_store %arg10[%c0_26, %c0_27], %31 {strides = array<i32>} : memref<128x128xf32, #tpu.memory_space<vmem>>, vector<128x128xf32>,
    } else {
    }
    %c0 = arith.constant 0 : index
    %c0_1 = arith.constant 0 : index
    %c0_2 = arith.constant 0 : index
    %3 = vector.load %arg2[%c0, %c0_1, %c0_2] : memref<1x64x2048xf32, #tpu.memory_space<vmem>>, vector<1x64x2048xf32>
    %4 = vector.shape_cast %3 : vector<1x64x2048xf32> to vector<64x2048xf32>
    %c0_3 = arith.constant 0 : index
    %c0_4 = arith.constant 0 : index
    %5 = vector.load %arg3[%c0_3, %c0_4] : memref<2048x256xf32, #tpu.memory_space<vmem>>, vector<2048x256xf32>
    %cst = arith.constant dense<0.000000e+00> : vector<64x256xf32>
    %6 = tpu.matmul %4, %5, %cst {dimension_numbers = #tpu.dot_dimension_numbers<[1], [0], [0], [1], [0, 0, 1, 1], [], []>} : vector<64x2048xf32>, vector<2048x256xf32>, vector<64x256xf32> -> vector<64x256xf32>
    %c0_5 = arith.constant 0 : index
    %c0_6 = arith.constant 0 : index
    %7 = vector.load %arg4[%c0_5, %c0_6] : memref<1x256xf32, #tpu.memory_space<vmem>>, vector<1x256xf32>
    %8 = vector.broadcast %7 : vector<1x256xf32> to vector<64x256xf32>
    %9 = arith.addf %6, %8 : vector<64x256xf32>
    %c0_7 = arith.constant 0 : index
    %c0_8 = arith.constant 0 : index
    %c0_9 = arith.constant 0 : index
    %10 = vector.load %arg7[%c0_7, %c0_8, %c0_9] : memref<1x64x256xf32, #tpu.memory_space<vmem>>, vector<1x64x256xf32>
    %11 = vector.shape_cast %10 : vector<1x64x256xf32> to vector<64x256xf32>
    %12 = vector.shape_cast %9 : vector<64x256xf32> to vector<1x64x256xf32>
    tpu.vector_store %arg7[%c0_7, %c0_8, %c0_9], %12 {strides = array<i32>} : memref<1x64x256xf32, #tpu.memory_space<vmem>>, vector<1x64x256xf32>,
    %c0_10 = arith.constant 0 : index
    %c0_11 = arith.constant 0 : index
    %13 = vector.load %arg5[%c0_10, %c0_11] : memref<256x384xf32, #tpu.memory_space<vmem>>, vector<256x384xf32>
    %cst_12 = arith.constant dense<0.000000e+00> : vector<64x384xf32>
    %14 = tpu.matmul %9, %13, %cst_12 {dimension_numbers = #tpu.dot_dimension_numbers<[1], [0], [0], [1], [0, 0, 1, 1], [], []>} : vector<64x256xf32>, vector<256x384xf32>, vector<64x384xf32> -> vector<64x384xf32>
    %c0_13 = arith.constant 0 : index
    %c0_14 = arith.constant 0 : index
    %15 = vector.load %arg6[%c0_13, %c0_14] : memref<1x384xf32, #tpu.memory_space<vmem>>, vector<1x384xf32>
    %16 = vector.broadcast %15 : vector<1x384xf32> to vector<64x384xf32>
    %17 = arith.addf %14, %16 : vector<64x384xf32>
    %18 = vector.extract_strided_slice %17 {offsets = [0, 0], sizes = [64, 128], strides = [1, 1]} : vector<64x384xf32> to vector<64x128xf32>
    %c0_15 = arith.constant 0 : index
    %c0_16 = arith.constant 0 : index
    %c0_17 = arith.constant 0 : index
    %19 = vector.load %arg8[%c0_15, %c0_16, %c0_17] : memref<1x64x128xf32, #tpu.memory_space<vmem>>, vector<1x64x128xf32>
    %20 = vector.shape_cast %19 : vector<1x64x128xf32> to vector<64x128xf32>
    %21 = vector.shape_cast %18 : vector<64x128xf32> to vector<1x64x128xf32>
    tpu.vector_store %arg8[%c0_15, %c0_16, %c0_17], %21 {strides = array<i32>} : memref<1x64x128xf32, #tpu.memory_space<vmem>>, vector<1x64x128xf32>,
    %22 = vector.extract_strided_slice %17 {offsets = [0, 128], sizes = [64, 128], strides = [1, 1]} : vector<64x384xf32> to vector<64x128xf32>
    %23 = vector.extract_strided_slice %17 {offsets = [0, 256], sizes = [64, 128], strides = [1, 1]} : vector<64x384xf32> to vector<64x128xf32>
    %c0_18 = arith.constant 0 : index
    %c0_19 = arith.constant 0 : index
    %24 = vector.load %arg10[%c0_18, %c0_19] : memref<128x128xf32, #tpu.memory_space<vmem>>, vector<128x128xf32>
    %cst_20 = arith.constant dense<0.000000e+00> : vector<128x128xf32>
    %25 = tpu.matmul %22, %23, %cst_20 {dimension_numbers = #tpu.dot_dimension_numbers<[0], [0], [1], [1], [0, 1, 1, 1], [], []>} : vector<64x128xf32>, vector<64x128xf32>, vector<128x128xf32> -> vector<128x128xf32>
    %26 = arith.addf %24, %25 : vector<128x128xf32>
    %c0_21 = arith.constant 0 : index
    %c0_22 = arith.constant 0 : index
    %27 = vector.load %arg10[%c0_21, %c0_22] : memref<128x128xf32, #tpu.memory_space<vmem>>, vector<128x128xf32>
    tpu.vector_store %arg10[%c0_21, %c0_22], %26 {strides = array<i32>} : memref<128x128xf32, #tpu.memory_space<vmem>>, vector<128x128xf32>,
    %c0_i32_23 = arith.constant 0 : i32
    %28 = arith.cmpi eq, %arg1, %c0_i32_23 : i32
    %29 = arith.extui %28 : i1 to i32
    %c0_i32_24 = arith.constant 0 : i32
    %30 = arith.cmpi ne, %29, %c0_i32_24 : i32
    scf.if %30 {
      %c0_25 = arith.constant 0 : index
      %c0_26 = arith.constant 0 : index
      %31 = vector.load %arg10[%c0_25, %c0_26] : memref<128x128xf32, #tpu.memory_space<vmem>>, vector<128x128xf32>
      %c0_27 = arith.constant 0 : index
      %c0_28 = arith.constant 0 : index
      %c0_29 = arith.constant 0 : index
      %32 = vector.load %arg9[%c0_27, %c0_28, %c0_29] : memref<1x128x128xf32, #tpu.memory_space<vmem>>, vector<1x128x128xf32>
      %33 = vector.shape_cast %32 : vector<1x128x128xf32> to vector<128x128xf32>
      %34 = vector.shape_cast %31 : vector<128x128xf32> to vector<1x128x128xf32>
      tpu.vector_store %arg9[%c0_27, %c0_28, %c0_29], %34 {strides = array<i32>} : memref<1x128x128xf32, #tpu.memory_space<vmem>>, vector<1x128x128xf32>,
    } else {
    }
    return
  }
  func.func @transform_0(%arg0: i32, %arg1: i32) -> (i32, i32, i32) {
    %c0_i32 = arith.constant 0 : i32
    %c0_i32_0 = arith.constant 0 : i32
    return %arg0, %arg1, %c0_i32 : i32, i32, i32
  }
  func.func @transform_1(%arg0: i32, %arg1: i32) -> (i32, i32) {
    %c0_i32 = arith.constant 0 : i32
    %c0_i32_0 = arith.constant 0 : i32
    %c0_i32_1 = arith.constant 0 : i32
    return %c0_i32, %c0_i32_0 : i32, i32
  }
  func.func @transform_2(%arg0: i32, %arg1: i32) -> (i32, i32) {
    %c0_i32 = arith.constant 0 : i32
    %c0_i32_0 = arith.constant 0 : i32
    %c0_i32_1 = arith.constant 0 : i32
    return %c0_i32, %c0_i32_0 : i32, i32
  }
  func.func @transform_3(%arg0: i32, %arg1: i32) -> (i32, i32) {
    %c0_i32 = arith.constant 0 : i32
    %c0_i32_0 = arith.constant 0 : i32
    %c0_i32_1 = arith.constant 0 : i32
    return %c0_i32, %c0_i32_0 : i32, i32
  }
  func.func @transform_4(%arg0: i32, %arg1: i32) -> (i32, i32) {
    %c0_i32 = arith.constant 0 : i32
    %c0_i32_0 = arith.constant 0 : i32
    %c0_i32_1 = arith.constant 0 : i32
    return %c0_i32, %c0_i32_0 : i32, i32
  }
  func.func @transform_5(%arg0: i32, %arg1: i32) -> (i32, i32, i32) {
    %c0_i32 = arith.constant 0 : i32
    %c0_i32_0 = arith.constant 0 : i32
    return %arg0, %arg1, %c0_i32 : i32, i32, i32
  }
  func.func @transform_6(%arg0: i32, %arg1: i32) -> (i32, i32, i32) {
    %c0_i32 = arith.constant 0 : i32
    %c0_i32_0 = arith.constant 0 : i32
    return %arg0, %arg1, %c0_i32 : i32, i32, i32
  }
  func.func @transform_7(%arg0: i32, %arg1: i32) -> (i32, i32, i32) {
    %c0_i32 = arith.constant 0 : i32
    %c0_i32_0 = arith.constant 0 : i32
    %c0_i32_1 = arith.constant 0 : i32
    return %arg0, %c0_i32, %c0_i32_0 : i32, i32, i32
  }
}

</mosaic_0001>

<bundles_post_ra>
// kernel: non_local2d_forward.3
= control target key start
LH: loop header
LB: loop body
LE: loop exit
PB: predicated region body
PF: predicated region fallthrough
CT: control target
= control target key end

     0   :  { %s1283_s27 = smov 0   ;;  %s1285_s28 = smov 0   ;;  %s1524_s0 = inlined_call_operand.vmem [shape: f32[2,64,128], index: 0, kind: input, shape index: {}]   ;;  %s1525_s1 = inlined_call_operand.vmem [shape: f32[2,64,256], index: 1, kind: input, shape index: {}]   ;;  %s1526_s2 = inlined_call_operand.vmem [shape: f32[2,128,128], index: 2, kind: input, shape index: {}]   ;;  %s1527_s3 = inlined_call_operand.vmem [shape: f32[128,256], index: 3, kind: input, shape index: {}]   ;;  %s1528_s4 = inlined_call_operand.vmem [shape: f32[1,256], index: 4, kind: input, shape index: {}]   ;;  %s1529_s5 = inlined_call_operand.vmem [shape: f32[8,256], index: 5, kind: input, shape index: {}]   ;;  %s1530_s6 = inlined_call_operand.vmem [shape: f32[8,256], index: 6, kind: input, shape index: {}]   ;;  %s1531_s7 = inlined_call_operand.vmem [shape: f32[8,1], index: 7, kind: input, shape index: {}]   ;;  %s1532_s8 = inlined_call_operand.vmem [shape: f32[2,8,64], index: 8, kind: output, shape index: {}]  }
   0x1   :  { %s1287_s29 = smov 0  }
   0x2 LB: > { %s30_s30 = sadd.s32 1, %s1230_s28  ;;  %p1004_p0 = scmp.ge.s32.totalorder %s1234_s29, 1  ;;  %s1234_s29 = sphi %s1287_s29, %s18_s29   ;;  %s1230_s28 = sphi %s1285_s28, %s1534_s28   ;;  %s1226_s27 = sphi %s1283_s27, %s1533_s27  }
   0x3   : > { %p32_p1 = scmp.ge.s32.totalorder %s30_s30, 2  ;;  %p311_p2 = scmp.lt.s32.totalorder %s1234_s29, 3 }
   0x5   : > { %s1536_s30 = smov (%p32_p1, %s30_s30), 0  ;;  %p312_p3 = pnand %p1004_p0, %p311_p2 }
   0x6   : > { %p367_p4 = scmp.lt.s32.totalorder (!%p312_p3), %s1226_s27, 1  ;;  %v529_v0 = vld [vmem:[%s1527_s3 + $0x8] sm:$0xff] (!%p312_p3)  ;;  %v531_v1 = vld [vmem:[%s1527_s3 + $0x18] sm:$0xff] (!%p312_p3)  ;;  %v528_v2 = vld [vmem:[%s1527_s3] sm:$0xff] (!%p312_p3)  ;;  %vm868_vm0 = vcmask (!%p312_p3), 523264  }
   0x7   : > { %315 = sbr.rel (%p312_p3) target bundleno = 793 (0x319), region = 52  ;;  %v1117_v3 = vpack.c.bf16 (!%p312_p3), %v531_v1, %v529_v0  ;;  %v530_v4 = vld [vmem:[%s1527_s3 + $0x10] sm:$0xff] (!%p312_p3)  ;;  %v533_v5 = vld [vmem:[%s1527_s3 + $0x28] sm:$0xff] (!%p312_p3)  ;;  %v535_v6 = vld [vmem:[%s1527_s3 + $0x38] sm:$0xff] (!%p312_p3) }
   0x8   : > { %v1119_v7 = vpack.c.bf16 (!%p312_p3), %v530_v4, %v528_v2  ;;  %v1121_v8 = vpack.c.bf16 (!%p312_p3), %v535_v6, %v533_v5  ;;  %v532_v9 = vld [vmem:[%s1527_s3 + $0x20] sm:$0xff] (!%p312_p3)  ;;  %v534_v10 = vld [vmem:[%s1527_s3 + $0x30] sm:$0xff] (!%p312_p3)  ;;  %v537_v11 = vld [vmem:[%s1527_s3 + $0x48] sm:$0xff] (!%p312_p3) }
   0x9   : > { %1118 = vmatprep.subr.bf16.mxu1 (!%p312_p3), %v1117_v3  ;;  %v539_v12 = vld [vmem:[%s1527_s3 + $0x58] sm:$0xff] (!%p312_p3)  ;;  %v1123_v13 = vpack.c.bf16 (!%p312_p3), %v534_v10, %v532_v9  ;;  %v536_v14 = vld [vmem:[%s1527_s3 + $0x40] sm:$0xff] (!%p312_p3)  ;;  %v538_v16 = vld [vmem:[%s1527_s3 + $0x50] sm:$0xff] (!%p312_p3) }
   0xa   : > { %1120 = vmatpush1.bf16.msra.mxu1 (!%p312_p3), %v1119_v7  ;;  %v1125_v15 = vpack.c.bf16 (!%p312_p3), %v539_v12, %v537_v11  ;;  %v541_v17 = vld [vmem:[%s1527_s3 + $0x68] sm:$0xff] (!%p312_p3)  ;;  %v543_v18 = vld [vmem:[%s1527_s3 + $0x78] sm:$0xff] (!%p312_p3)  ;;  %v1127_v27 = vpack.c.bf16 (!%p312_p3), %v538_v16, %v536_v14  ;;  %v540_v29 = vld [vmem:[%s1527_s3 + $0x60] sm:$0xff] (!%p312_p3)  ;;  %v1236_v16 = vmov (!%p312_p3), 0.0  }
   0xb   : > { %1122 = vmatprep.subr.bf16.mxu1 (!%p312_p3), %v1121_v8  ;;  %v1129_v28 = vpack.c.bf16 (!%p312_p3), %v543_v18, %v541_v17  ;;  %v542_v30 = vld [vmem:[%s1527_s3 + $0x70] sm:$0xff] (!%p312_p3)  ;;  %v545_v31 = vld [vmem:[%s1527_s3 + $0x88] sm:$0xff] (!%p312_p3)  ;;  %v547_v32 = vld [vmem:[%s1527_s3 + $0x98] sm:$0xff] (!%p312_p3)  ;;  %636 = vmatprep.mubr.f32.mxu1 (!%p312_p3), %v1236_v16 }
   0xc   : > { %v1131_v37 = vpack.c.bf16 (!%p312_p3), %v542_v30, %v540_v29  ;;  %v1133_v38 = vpack.c.bf16 (!%p312_p3), %v547_v32, %v545_v31  ;;  %v544_v39 = vld [vmem:[%s1527_s3 + $0x80] sm:$0xff] (!%p312_p3)  ;;  %v546_v40 = vld [vmem:[%s1527_s3 + $0x90] sm:$0xff] (!%p312_p3)  ;;  %v549_v41 = vld [vmem:[%s1527_s3 + $0xa8] sm:$0xff] (!%p312_p3) }
   0xd   : > { %v551_v43 = vld [vmem:[%s1527_s3 + $0xb8] sm:$0xff] (!%p312_p3)  ;;  %v1135_v46 = vpack.c.bf16 (!%p312_p3), %v546_v40, %v544_v39  ;;  %v548_v48 = vld [vmem:[%s1527_s3 + $0xa0] sm:$0xff] (!%p312_p3)  ;;  %v550_v49 = vld [vmem:[%s1527_s3 + $0xb0] sm:$0xff] (!%p312_p3) }
   0xe   : > { %s1538_s27 = smov (!%p367_p4, %s1226_s27), 1  ;;  %1124 = vmatpush1.bf16.msra.mxu1 %v1123_v13  ;;  %v1137_v47 = vpack.c.bf16 %v551_v43, %v549_v41  ;;  %v553_v50 = vld [vmem:[%s1527_s3 + $0xc8] sm:$0xff]  ;;  %v555_v51 = vld [vmem:[%s1527_s3 + $0xd8] sm:$0xff]  ;;  %v1139_v55 = vpack.c.bf16 %v550_v49, %v548_v48  ;;  %v552_v57 = vld [vmem:[%s1527_s3 + $0xc0] sm:$0xff] }
   0xf   : > { %s1015_s11 = sshll.u32 %s1538_s27, 7  ;;  %s1014_s17 = sshll.u32 %s1538_s27, 6  ;;  %1126 = vmatprep.subr.bf16.mxu1 %v1125_v15  ;;  %v1141_v56 = vpack.c.bf16 %v555_v51, %v553_v50  ;;  %v554_v58 = vld [vmem:[%s1527_s3 + $0xd0] sm:$0xff]  ;;  %v557_v59 = vld [vmem:[%s1527_s3 + $0xe8] sm:$0xff]  ;;  %v559_v60 = vld [vmem:[%s1527_s3 + $0xf8] sm:$0xff] }
  0x10   : > { %s1342_s16 = scalar_lea.vmem %s1526_s2, %s1015_s11  ;;  %s1363_s26 = scalar_lea.vmem %s1524_s0, %s1014_s17  ;;  %v1143_v0 = vpack.c.bf16 %v554_v58, %v552_v57  ;;  %v1145_v1 = vpack.c.bf16 %v559_v60, %v557_v59  ;;  %v556_v2 = vld [vmem:[%s1527_s3 + $0xe0] sm:$0xff]  ;;  %v558_v3 = vld [vmem:[%s1527_s3 + $0xf0] sm:$0xff]  ;;  %v718_v49 = vld [vmem:[%s1529_s5 + $0x8] sm:$0xff] }
  0x11   : > { %v407_v19 = vld [vmem:[%s1342_s16] sm:$0xff]  ;;  %v408_v20 = vld [vmem:[%s1342_s16 + $0x8] sm:$0xff]  ;;  %v409_v21 = vld [vmem:[%s1342_s16 + $0x10] sm:$0xff]  ;;  %v1147_v7 = vpack.c.bf16 %v558_v3, %v556_v2  ;;  %s385_s17 = scalar_lea.vmem %s1525_s1, %s1015_s11  ;;  %s1011_s13 = sshll.u32 %s1538_s27, 3 }
  0x12   : > { %v1085_v22 = vpack.c.bf16 %v408_v20, %v407_v19  ;;  %v410_v23 = vld [vmem:[%s1342_s16 + $0x18] sm:$0xff]  ;;  %v411_v25 = vld [vmem:[%s1342_s16 + $0x20] sm:$0xff]  ;;  %v412_v26 = vld [vmem:[%s1342_s16 + $0x28] sm:$0xff]  ;;  %1128 = vmatpush1.bf16.msra.mxu1 %v1127_v27 }
  0x13   : > { %v1089_v24 = vpack.c.bf16 %v410_v23, %v409_v21  ;;  %v1093_v33 = vpack.c.bf16 %v412_v26, %v411_v25  ;;  %v399_v34 = vld [vmem:[%s1363_s26] sm:$0xff]  ;;  %v413_v35 = vld [vmem:[%s1342_s16 + $0x30] sm:$0xff]  ;;  %v414_v36 = vld [vmem:[%s1342_s16 + $0x38] sm:$0xff]  ;;  %1130 = vmatprep.subr.bf16.mxu1 %v1129_v28 }
  0x14   : > { %1086 = vmatprep.subr.bf16.mxu0 %v1085_v22  ;;  %1073 = vmatprep.mubr.f32.mxu0 %v399_v34  ;;  %v1097_v42 = vpack.c.bf16 %v414_v36, %v413_v35  ;;  %v415_v44 = vld [vmem:[%s1342_s16 + $0x40] sm:$0xff]  ;;  %v416_v45 = vld [vmem:[%s1342_s16 + $0x48] sm:$0xff]  ;;  %v417_v53 = vld [vmem:[%s1342_s16 + $0x50] sm:$0xff] }
  0x15   : > { %1088 = vmatpush3.bf16.msra.mxu0 %v1085_v22  ;;  %v1101_v52 = vpack.c.bf16 %v416_v45, %v415_v44  ;;  %v418_v54 = vld [vmem:[%s1342_s16 + $0x58] sm:$0xff]  ;;  %v419_v62 = vld [vmem:[%s1342_s16 + $0x60] sm:$0xff]  ;;  %v420_v63 = vld [vmem:[%s1342_s16 + $0x68] sm:$0xff] }
  0x16   : > { %1090 = vmatprep.subr.bf16.mxu0 %v1089_v24  ;;  %1132 = vmatpush1.bf16.msra.mxu1 %v1131_v37  ;;  %v1105_v61 = vpack.c.bf16 %v418_v54, %v417_v53  ;;  %v1109_v4 = vpack.c.bf16 %v420_v63, %v419_v62  ;;  %v421_v5 = vld [vmem:[%s1342_s16 + $0x70] sm:$0xff]  ;;  %v422_v6 = vld [vmem:[%s1342_s16 + $0x78] sm:$0xff]  ;;  %v400_v9 = vld [vmem:[%s1363_s26 + $0x8] sm:$0xff]  ;;  %v1237_v53 = vmov 0   ;;  %v562_v54 = vlaneseq  ;;  %s398_s16 = scalar_lea.vmem %s1532_s8, %s1011_s13 }
  0x17   : > { %1134 = vmatprep.subr.bf16.mxu1 %v1133_v38  ;;  %v1113_v8 = vpack.c.bf16 %v422_v6, %v421_v5  ;;  %v401_v10 = vld [vmem:[%s1363_s26 + $0x10] sm:$0xff]  ;;  %v402_v11 = vld [vmem:[%s1363_s26 + $0x18] sm:$0xff]  ;;  %v403_v12 = vld [vmem:[%s1363_s26 + $0x20] sm:$0xff]  ;;  %1207 = vset.pattern.permute.xlu0 %v1237_v53 }
  0x18   : > { %v404_v13 = vld [vmem:[%s1363_s26 + $0x28] sm:$0xff]  ;;  %v405_v14 = vld [vmem:[%s1363_s26 + $0x30] sm:$0xff]  ;;  %v406_v15 = vld [vmem:[%s1363_s26 + $0x38] sm:$0xff] }
  0x19   : > { %1092 = vmatpush3.bf16.msra.mxu0 %v1089_v24  ;;  %v688_v25 = vld [vmem:[%s385_s17 + $0x18] sm:$0xff]  ;;  %v685_v26 = vld [vmem:[%s385_s17] sm:$0xff]  ;;  %v686_v27 = vld [vmem:[%s385_s17 + $0x8] sm:$0xff] }
  0x1a   : > { %1094 = vmatprep.subr.bf16.mxu0 %v1093_v33  ;;  %1136 = vmatpush1.bf16.msra.mxu1 %v1135_v46  ;;  %v687_v28 = vld [vmem:[%s385_s17 + $0x10] sm:$0xff]  ;;  %v1165_v30 = vpack.c.bf16 %v688_v25, %v686_v27  ;;  %v1442_v31 = vld [vmem:[%s385_s17 + $0x38] sm:$0xff]  ;;  %v1444_v32 = vld [vmem:[%s385_s17 + $0x20] sm:$0xff] }
  0x1b   : > { %1138 = vmatprep.subr.bf16.mxu1 %v1137_v47  ;;  %v1167_v29 = vpack.c.bf16 %v687_v28, %v685_v26  ;;  %v1448_v34 = vld [vmem:[%s385_s17 + $0x30] sm:$0xff]  ;;  %v1454_v37 = vld [vmem:[%s385_s17 + $0x58] sm:$0xff]  ;;  %v1456_v38 = vld [vmem:[%s385_s17 + $0x40] sm:$0xff] }
  0x1c   : > { %v1171_v35 = vpack.c.bf16 %v1448_v34, %v1444_v32  ;;  %v1458_v39 = vld [vmem:[%s385_s17 + $0x48] sm:$0xff]  ;;  %v1460_v40 = vld [vmem:[%s385_s17 + $0x50] sm:$0xff]  ;;  %v1466_v43 = vld [vmem:[%s385_s17 + $0x78] sm:$0xff] }
  0x1d   : > { %1096 = vmatpush3.bf16.msra.mxu0 %v1093_v33  ;;  %v1446_v33 = vld [vmem:[%s385_s17 + $0x28] sm:$0xff]  ;;  %v1175_v41 = vpack.c.bf16 %v1460_v40, %v1456_v38  ;;  %v1468_v44 = vld [vmem:[%s385_s17 + $0x60] sm:$0xff]  ;;  %v1472_v46 = vld [vmem:[%s385_s17 + $0x70] sm:$0xff] }
  0x1e   : > { %1098 = vmatprep.subr.bf16.mxu0 %v1097_v42  ;;  %1140 = vmatpush1.bf16.msra.mxu1 %v1139_v55  ;;  %v1169_v36 = vpack.c.bf16 %v1442_v31, %v1446_v33  ;;  %v1470_v45 = vld [vmem:[%s385_s17 + $0x68] sm:$0xff]  ;;  %v1179_v47 = vpack.c.bf16 %v1472_v46, %v1468_v44  ;;  %v717_v51 = vld [vmem:[%s1529_s5] sm:$0xff]  ;;  %v563_v55 = vshrl.u32 %v562_v54, 7 }
  0x1f   : > { %1142 = vmatprep.subr.bf16.mxu1 %v1141_v56  ;;  %v1177_v48 = vpack.c.bf16 %v1466_v43, %v1470_v45  ;;  %v720_v50 = vld [vmem:[%s1530_s6 + $0x8] sm:$0xff]  ;;  %v560_v57 = vld [vmem:[%s1528_s4] sm:$0x3] }
  0x20   : > { %v564_v56 = vsub.s32 0, %v563_v55  ;;  %v568_v58 = vsub.s32 1, %v563_v55 }
  0x21   : > { %1100 = vmatpush3.bf16.msra.mxu0 %v1097_v42  ;;  %v1173_v42 = vpack.c.bf16 %v1454_v37, %v1458_v39 }
  0x22   : > { %1102 = vmatprep.subr.bf16.mxu0 %v1101_v52  ;;  %1144 = vmatpush1.bf16.msra.mxu1 %v1143_v0  ;;  %v565_v59 = vrot.slane %v560_v57, %v564_v56 }
  0x23   : > { %1146 = vmatprep.subr.bf16.mxu1 %v1145_v1 }
  0x25   : > { %1104 = vmatpush3.bf16.msra.mxu0 %v1101_v52  ;;  %v861_v52 = vld [vmem:[%s1531_s7] sm:$0xff] }
  0x26   : > { %1106 = vmatprep.subr.bf16.mxu0 %v1105_v61  ;;  %1148 = vmatpush1.bf16.msra.mxu1 %v1147_v7 }
  0x27   : > { %1166 = vmatprep.subr.bf16.mxu1 %v1165_v30  ;;  %864 = vperm.xlu0 %1207, %v861_v52  }
  0x29   : > { %1108 = vmatpush3.bf16.msra.mxu0 %v1105_v61  ;;  %v569_v61 = vrot.slane %v560_v57, %v568_v58  ;;  %v719_v57 = vld [vmem:[%s1530_s6] sm:$0xff] }
  0x2a   : > { %1110 = vmatprep.subr.bf16.mxu0 %v1109_v4 }
  0x2d   : > { %1112 = vmatpush3.bf16.msra.mxu0 %v1109_v4 }
  0x2e   : > { %1114 = vmatprep.subr.bf16.mxu0 %v1113_v8 }
  0x31   : > { %1116 = vmatpush3.bf16.msra.mxu0 %v1113_v8 }
  0x34   : > { %1074 = vmatmul.mubr.f32.vlgmr.msra.gmra.mrb[0].mxu0 %v400_v9 }
  0x35   : > { %1076 = vmatprep.mubr.f32.mxu0 %v401_v10 }
  0x38   : > { %1077 = vmatmul.mubr.f32.gmra.mrb[2].mxu0 %v402_v11 }
  0x39   : > { %1079 = vmatprep.mubr.f32.mxu0 %v403_v12 }
  0x3c   : > { %1080 = vmatmul.mubr.f32.gmra.mrb[4].mxu0 %v404_v13 }
  0x3d   : > { %1082 = vmatprep.mubr.f32.mxu0 %v405_v14 }
  0x40   : > { %1083 = vmatmul.mubr.f32.gmra.mrb[6].mxu0 %v406_v15 }
  0x41   : > { %785 = vmatprep.mubr.f32.mxu0 %v720_v50 }
 0x107   : > { %v1075_v17 = vpop.f32.mrb[0].mxu0 }
 0x108   : > { %v489_v18 = vpop.f32.mrb[1].mxu0 }
 0x109   : > { %637 = vmatmul.mubr.f32.vlgmr.msra.gmra.mrb[0].mxu1 %v489_v18 }
 0x10a   : > { %642 = vmatprep.mubr.f32.mxu1 %v1236_v16  ;;  %1168 = vmatpush1.bf16.xpose.msra.mxu1 %v1167_v29 }
 0x10b   : > { %v1078_v19 = vpop.f32.mrb[2].mxu0  ;;  %1170 = vmatprep.subr.bf16.mxu1 %v1169_v36 }
 0x10c   : > { %v499_v20 = vpop.f32.mrb[3].mxu0 }
 0x10d   : > { %643 = vmatmul.mubr.f32.gmra.mrb[2].mxu1 %v1075_v17 }
 0x10e   : > { %648 = vmatprep.mubr.f32.mxu1 %v1236_v16 }
 0x10f   : > { %v1081_v21 = vpop.f32.mrb[4].mxu0 }
 0x110   : > { %v509_v22 = vpop.f32.mrb[5].mxu0 }
 0x111   : > { %649 = vmatmul.mubr.f32.gmra.mrb[4].mxu1 %v499_v20 }
 0x112   : > { %654 = vmatprep.mubr.f32.mxu1 %v1236_v16  ;;  %1172 = vmatpush1.bf16.xpose.msra.mxu1 %v1171_v35 }
 0x113   : > { %v1084_v23 = vpop.f32.mrb[6].mxu0  ;;  %1174 = vmatprep.subr.bf16.mxu1 %v1173_v42 }
 0x114   : > { %v519_v24 = vpop.f32.mrb[7].mxu0 }
 0x115   : > { %655 = vmatmul.mubr.f32.gmra.mrb[6].mxu1 %v1078_v19 }
 0x116   : > { %660 = vmatprep.mubr.f32.mxu1 %v1236_v16 }
 0x119   : > { %661 = vmatmul.mubr.f32.gmra.mrb[8].mxu1 %v509_v22 }
 0x11a   : > { %666 = vmatprep.mubr.f32.mxu1 %v1236_v16  ;;  %1176 = vmatpush1.bf16.xpose.msra.mxu1 %v1175_v41 }
 0x11b   : > { %1178 = vmatprep.subr.bf16.mxu1 %v1177_v48 }
 0x11d   : > { %667 = vmatmul.mubr.f32.gmra.mrb[10].mxu1 %v1081_v21 }
 0x11e   : > { %672 = vmatprep.mubr.f32.mxu1 %v1236_v16 }
 0x121   : > { %673 = vmatmul.mubr.f32.gmra.mrb[12].mxu1 %v519_v24 }
 0x122   : > { %678 = vmatprep.mubr.f32.mxu1 %v1236_v16  ;;  %1180 = vmatpush1.bf16.xpose.msra.mxu1 %v1179_v47 }
 0x125   : > { %679 = vmatmul.mubr.f32.gmra.mrb[14].mxu1 %v1084_v23 }
 0x126   : > { %855 = vmatprep.mubr.f32.mxu1 %v718_v49 }
 0x129   : > { %856 = vmatmul.mubr.f32.vlgmr.msra.gmra.mrb[16].mxu1 %v717_v51 }
 0x1dc   : > { %v638_v60 = vpop.f32.mrb[0].mxu1 }
 0x1dd   : > { %v640_v62 = vpop.f32.mrb[1].mxu1  ;;  %v639_v63 = vadd.f32 %v638_v60, %v565_v59 }
 0x1de   : > { %v641_v0 = vadd.f32 %v640_v62, %v569_v61 }
 0x1df   : > { %v701_v5 = vadd.f32 %v685_v26, %v639_v63 }
 0x1e0   : > { %v644_v1 = vpop.f32.mrb[2].mxu1  ;;  %v702_v7 = vadd.f32 %v686_v27, %v641_v0 }
 0x1e1   : > { %v645_v2 = vadd.f32 %v644_v1, %v565_v59  ;;  %v646_v3 = vpop.f32.mrb[3].mxu1 }
 0x1e2   : > { %v647_v4 = vadd.f32 %v646_v3, %v569_v61 }
 0x1e3   : > { %v703_v6 = vadd.f32 %v687_v28, %v645_v2 }
 0x1e4   : > { %v704_v8 = vadd.f32 %v688_v25, %v647_v4  ;;  %v650_v9 = vpop.f32.mrb[4].mxu1 }
 0x1e5   : > { %v1151_v10 = vpack.c.bf16 %v703_v6, %v701_v5  ;;  %v652_v11 = vpop.f32.mrb[5].mxu1  ;;  %v651_v13 = vadd.f32 %v650_v9, %v565_v59 }
 0x1e6   : > { %v1149_v12 = vpack.c.bf16 %v704_v8, %v702_v7  ;;  %v653_v14 = vadd.f32 %v652_v11, %v569_v61 }
 0x1e7   : > { %v705_v19 = vadd.f32 %v1444_v32, %v651_v13 }
 0x1e8   : > { %v656_v15 = vpop.f32.mrb[6].mxu1  ;;  %1150 = vmatprep.subr.bf16.mxu0 %v1149_v12  ;;  %v706_v21 = vadd.f32 %v1446_v33, %v653_v14 }
 0x1e9   : > { %v657_v16 = vadd.f32 %v656_v15, %v565_v59  ;;  %v658_v17 = vpop.f32.mrb[7].mxu1  ;;  %1152 = vmatpush1.bf16.xpose.msra.mxu0 %v1151_v10 }
 0x1ea   : > { %v659_v18 = vadd.f32 %v658_v17, %v569_v61 }
 0x1eb   : > { %v707_v20 = vadd.f32 %v1448_v34, %v657_v16 }
 0x1ec   : > { %v708_v22 = vadd.f32 %v1442_v31, %v659_v18  ;;  %v662_v23 = vpop.f32.mrb[8].mxu1 }
 0x1ed   : > { %v1155_v24 = vpack.c.bf16 %v707_v20, %v705_v19  ;;  %v664_v25 = vpop.f32.mrb[9].mxu1  ;;  %v663_v27 = vadd.f32 %v662_v23, %v565_v59 }
 0x1ee   : > { %v1153_v26 = vpack.c.bf16 %v708_v22, %v706_v21  ;;  %v665_v28 = vadd.f32 %v664_v25, %v569_v61 }
 0x1ef   : > { %v709_v32 = vadd.f32 %v1456_v38, %v663_v27 }
 0x1f0   : > { %v668_v29 = vpop.f32.mrb[10].mxu1  ;;  %1154 = vmatprep.subr.bf16.mxu0 %v1153_v26  ;;  %v710_v33 = vadd.f32 %v1458_v39, %v665_v28 }
 0x1f1   : > { %v669_v30 = vadd.f32 %v668_v29, %v565_v59  ;;  %v670_v35 = vpop.f32.mrb[11].mxu1  ;;  %1156 = vmatpush1.bf16.xpose.msra.mxu0 %v1155_v24 }
 0x1f2   : > { %v671_v36 = vadd.f32 %v670_v35, %v569_v61 }
 0x1f3   : > { %v711_v34 = vadd.f32 %v1460_v40, %v669_v30 }
 0x1f4   : > { %v712_v31 = vadd.f32 %v1454_v37, %v671_v36  ;;  %v674_v41 = vpop.f32.mrb[12].mxu1 }
 0x1f5   : > { %v1159_v42 = vpack.c.bf16 %v711_v34, %v709_v32  ;;  %v676_v47 = vpop.f32.mrb[13].mxu1  ;;  %v675_v49 = vadd.f32 %v674_v41, %v565_v59 }
 0x1f6   : > { %v1157_v48 = vpack.c.bf16 %v712_v31, %v710_v33  ;;  %v677_v50 = vadd.f32 %v676_v47, %v569_v61 }
 0x1f7   : > { %v713_v38 = vadd.f32 %v1468_v44, %v675_v49 }
 0x1f8   : > { %v680_v51 = vpop.f32.mrb[14].mxu1  ;;  %1158 = vmatprep.subr.bf16.mxu0 %v1157_v48  ;;  %v714_v39 = vadd.f32 %v1470_v45, %v677_v50 }
 0x1f9   : > { %v681_v52 = vadd.f32 %v680_v51, %v565_v59  ;;  %v682_v53 = vpop.f32.mrb[15].mxu1  ;;  %1160 = vmatpush1.bf16.xpose.msra.mxu0 %v1159_v42 }
 0x1fa   : > { %v683_v54 = vadd.f32 %v682_v53, %v569_v61  ;;  %v865_v61 = vpop.permute.xlu0 %864 }
 0x1fb   : > { %v715_v40 = vadd.f32 %v1472_v46, %v681_v52 }
 0x1fc   : > { %v716_v37 = vadd.f32 %v1466_v43, %v683_v54  ;;  %v857_v58 = vpop.f32.mrb[16].mxu1 }
 0x1fd   : > { %v1163_v55 = vpack.c.bf16 %v715_v40, %v713_v38  ;;  %v859_v59 = vpop.f32.mrb[17].mxu1 }
 0x1fe   : > { %v1161_v56 = vpack.c.bf16 %v716_v37, %v714_v39 }
 0x200   : > { %1162 = vmatprep.subr.bf16.mxu0 %v1161_v56 }
 0x201   : > { %1164 = vmatpush1.bf16.xpose.msra.mxu0 %v1163_v55 }
 0x208   : > { %786 = vmatmul.mubr.f32.vlgmr.msra.gmra.mrb[8].mxu0 %v719_v57 }
 0x2db   : > { %v787_v60 = vpop.f32.mrb[8].mxu0 }
 0x2dc   : > { %v858_v44 = vadd.f32 %v857_v58, %v787_v60  ;;  %v789_v62 = vpop.f32.mrb[9].mxu0 }
 0x2de   : > { %v867_v46 = vadd.f32 %v865_v61, %v858_v44 }
 0x2e0   : > { %v869_v45 = vsel %vm868_vm0, %v867_v46, -inf }
 0x2e1   : > { %v870_v43 = vrot.slane %v869_v45, 4 }
 0x2e3   : > { %v871_v63 = vmax.f32 %v869_v45, %v870_v43 }
 0x2e5   : > { %v872_v0 = vrot.slane %v871_v63, 2 }
 0x2e7   : > { %v873_v1 = vmax.f32 %v871_v63, %v872_v0 }
 0x2e9   : > { %v874_v2 = vrot.slane %v873_v1, 1 }
 0x2eb   : > { %v875_v3 = vmax.f32 %v873_v1, %v874_v2 }
 0x2ed   : > { %v876_v4 = vsub.f32 %v867_v46, %v875_v3 }
 0x2ef   : > { %v877_v5 = vmul.f32 1.442695, %v876_v4 }
 0x2f1   : > { %1208 = vpow2.f32 %v877_v5 }
 0x2fb   : > { %v1209_v6 = vpop.eup %1208 }
 0x2fc   : > { %v879_v7 = vsel %vm868_vm0, %v1209_v6, 0.0 }
 0x2fd   : > { %v880_v8 = vrot.slane %v879_v7, 4 }
 0x2ff   : > { %v881_v9 = vadd.f32 %v880_v8, %v879_v7 }
 0x301   : > { %v882_v10 = vrot.slane %v881_v9, 2 }
 0x303   : > { %v883_v11 = vadd.f32 %v882_v10, %v881_v9 }
 0x305   : > { %v884_v12 = vrot.slane %v883_v11, 1 }
 0x307   : > { %v885_v13 = vadd.f32 %v884_v12, %v883_v11 }
 0x309   : > { %1210 = vlog2.f32 %v885_v13 }
 0x313   : > { %v1211_v14 = vpop.eup %1210 }
 0x314   : > { %v887_v15 = vmul.f32 0.6931472, %v1211_v14 }
 0x316   : > { %v888_v16 = vsub.f32 %v876_v4, %v887_v15 }
 0x318   : > { %889 = vst.msk [vmem:[%s398_s16] sm:$0xff] %vm868_vm0, %v888_v16 }
 0x319 PF: > { %s18_s29 = sadd.s32 1, %s1234_s29   ;;  %s1533_s27 = smov %s1230_s28 }
 0x31a   : > { %p15_p5 = scmp.ge.s32.totalorder %s18_s29, 4   ;;  %s1534_s28 = smov %s1536_s30 }
 0x31c   :  { %17 = sbr.rel (!%p15_p5) target bundleno = 2 (0x2), region = 88 }

// kernel: non_local2d_forward.2
= control target key start
LH: loop header
LB: loop body
LE: loop exit
PB: predicated region body
PF: predicated region fallthrough
CT: control target
= control target key end

     0   :  { %13 = vsyncpa [#allocation4], 0  ;;  %s4822_s0 = inlined_call_operand.hbm [shape: f32[2,64,2048], index: 0, kind: input, shape index: {}]   ;;  %s4823_s1 = inlined_call_operand.hbm [shape: f32[2048,256], index: 1, kind: input, shape index: {}]   ;;  %s4824_s2 = inlined_call_operand.hbm [shape: f32[1,256], index: 2, kind: input, shape index: {}]   ;;  %s4825_s3 = inlined_call_operand.vmem [shape: f32[256,384], index: 3, kind: input, shape index: {}]   ;;  %s4826_s4 = inlined_call_operand.vmem [shape: f32[1,384], index: 4, kind: input, shape index: {}]   ;;  %s4827_s5 = inlined_call_operand.vmem [shape: f32[2,64,256], index: 5, kind: output, shape index: {0}]   ;;  %s4828_s6 = inlined_call_operand.vmem [shape: f32[2,64,128], index: 6, kind: output, shape index: {1}]   ;;  %s4829_s7 = inlined_call_operand.vmem [shape: f32[2,128,128], index: 7, kind: output, shape index: {2}]  }
   0x1   :  { %15 = vsyncpa [#allocation4 + $0x1], 0 }
   0x2   :  { %16 = vsyncpa [#allocation6], 0  ;;  %s4019_s24 = smov 0   ;;  %s4021_s25 = smov 0  }
   0x3   :  { %s4023_s26 = smov 0   ;;  %s4025_s27 = smov 0  }
   0x4   :  { %s4027_s28 = smov 0   ;;  %s4029_s29 = smov 0  }
   0x5 LB: > { %s2836_s30 = sadd.s32 4294967295, %s3970_s29   ;;  %p56_p0 = scmp.ne.s32.totalorder %s3954_s25, %s3950_s24  ;;  %s3970_s29 = sphi %s4029_s29, %s22_s29   ;;  %s3966_s28 = sphi %s4027_s28, %s4846_s28   ;;  %s3962_s27 = sphi %s4025_s27, %s4845_s27   ;;  %s3958_s26 = sphi %s4023_s26, %s4844_s26   ;;  %s3954_s25 = sphi %s4021_s25, %s4843_s25   ;;  %s3950_s24 = sphi %s4019_s24, %s4842_s24  }
   0x6   : > { %p4049_p1 = scmp.eq.s32.totalorder %s2836_s30, 0  ;;  %p2838_p2 = scmp.ge.s32.totalorder %s3970_s29, 1 }
   0x7   : > { %p233_p3 = scmp.lt.s32.totalorder %s3970_s29, 3  ;;  %s3972_s11 = smov [#allocation5]  }
   0x8   : > { %s4834_s8 = scalar_select %p4049_p1, 1, 0 }
   0x9   : > { %p4057_p4 = por %p4049_p1, %p56_p0  ;;  %p4061_p5 = pnand %p2838_p2, %p233_p3 }
   0xa   : > { %s245_s12 = sshll.u32 %s3972_s11, 4  ;;  %s3973_s14 = smov [#allocation7]   ;;  %s246_s12 = int_to_ptr.vmem [resolvable:$true] %s245_s12 }
   0xb   : > { %s4835_s9 = scalar_select %p4057_p4, 1, 0 }
   0xc   : > { %s4836_s10 = scalar_select %p4061_p5, 1, 0 }
   0xd   : > { %p3759_p6 = pneg %p4061_p5  ;;  %s259_s15 = sshll.u32 %s3973_s14, 4  ;;  %s4073_s15 = int_to_ptr.vmem [resolvable:$true] %s259_s15 }
   0xe   : > { %s3830_s18 = scalar_lea.hbm %s4823_s1, 65536 }
   0xf   : > { %p4069_p7 = pnand %p3759_p6, %p4049_p1  ;;  %p3831_p8 = scmp.ne.s32.totalorder %s4823_s1, %s3830_s18 }
  0x10   : > { %p3837_p12 = scmp.lt.u32.totalorder %s3830_s18, %s4823_s1 }
  0x11   : > { %p3832_p9 = pneg %p4069_p7 }
  0x13   : > { %p3833_p10 = pnand %p3832_p9, %p3831_p8 }
  0x15   : > { %p3834_p11 = pneg %p3833_p10 }
  0x17   : > { %p3839_p13 = pnand %p3837_p12, %p3834_p11 }
  0x19   : > { %3842 = shalt.err (!%p3839_p13)
}
  0x1a   : > { %s3843_s23 = scalar_lea.vmem %s246_s12, 65536  ;;  %p3851_p6 = scmp.lt.s32.totalorder %s246_s12, %s246_s12 }
  0x1b   : > { %p3844_p0 = scmp.ne.s32.totalorder %s246_s12, %s3843_s23  ;;  %p3852_p1 = scmp.lt.s32.totalorder %s3843_s23, %s3843_s23 }
  0x1d   : > { %p3846_p2 = pnand %p3844_p0, %p3832_p9  ;;  %p3853_p4 = por %p3852_p1, %p3851_p6 }
  0x1f   : > { %p3847_p3 = pneg %p3846_p2 }
  0x21   : > { %p3854_p5 = pnand %p3853_p4, %p3847_p3 }
  0x23   : > { %3857 = shalt.err (!%p3854_p5)
}
  0x24   : > { %s3974_s24 = smov 256   ;;  %s3975_s30 = smov 16  }
  0x25   : > { %3762 = dma.hbm_to_vmem [thread:$0]  (!%p4069_p7), %s4823_s1, 65536, %s246_s12, [#allocation6], %s3974_s24, %s3974_s24, %s3975_s30  }
  0x26   : > { %s3858_s18 = scalar_lea.hbm %s4824_s2, 32 }
  0x27   : > { %p3859_p8 = scmp.ne.s32.totalorder %s4824_s2, %s3858_s18  ;;  %p3865_p5 = scmp.lt.u32.totalorder %s3858_s18, %s4824_s2 }
  0x29   : > { %p3861_p1 = pnand %p3859_p8, %p3832_p9 }
  0x2b   : > { %p3862_p4 = pneg %p3861_p1 }
  0x2d   : > { %p3867_p10 = pnand %p3865_p5, %p3862_p4 }
  0x2f   : > { %3870 = shalt.err (!%p3867_p10)
}
  0x30   : > { %s3871_s12 = scalar_lea.vmem %s4073_s15, 32  ;;  %p3879_p0 = scmp.lt.s32.totalorder %s4073_s15, %s4073_s15 }
  0x31   : > { %p3872_p11 = scmp.ne.s32.totalorder %s4073_s15, %s3871_s12  ;;  %p3880_p2 = scmp.lt.s32.totalorder %s3871_s12, %s3871_s12 }
  0x33   : > { %p3874_p12 = pnand %p3872_p11, %p3832_p9  ;;  %p3881_p3 = por %p3880_p2, %p3879_p0 }
  0x35   : > { %p3875_p13 = pneg %p3874_p12 }
  0x37   : > { %p3882_p6 = pnand %p3881_p3, %p3875_p13 }
  0x39   : > { %3885 = shalt.err (!%p3882_p6)
}
  0x3a   : > { %3765 = dma.hbm_to_vmem [thread:$0]  (!%p4069_p7), %s4824_s2, 32, %s4073_s15, [#allocation6]  }
  0x3b   : > { %s34_s30 = sadd.s32 1, %s3966_s28  ;;  %s43_s11 = sadd.s32 1, %s3958_s26 }
  0x3c   : > { %p36_p9 = scmp.ge.s32.totalorder %s34_s30, 2  ;;  %p50_p8 = scmp.ne.s32.totalorder %s3958_s26, %s3954_s25 }
  0x3d   : > { %p51_p1 = scmp.eq.s32.totalorder %s3970_s29, 0  ;;  %p3772_p4 = scmp.lt.s32.totalorder %s3970_s29, 2 }
  0x3e   : > { %s4848_s30 = smov (%p36_p9, %s34_s30), 0  ;;  %s276_s13 = sand.u32 1, %s3958_s26  }
  0x3f   : > { %p52_p5 = por %p51_p1, %p50_p8  ;;  %s38_s14 = ssub.s32 %s3966_s28, %s4848_s30 }
  0x40   : > { %p41_p10 = scmp.eq.s32.totalorder %s38_s14, 0  ;;  %s2842_s16 = sshll.u32 %s276_s13, 10 }
  0x41   : > { %s2873_s17 = sshll.u32 %s3966_s28, 14  ;;  %s280_s21 = scalar_lea.vmem [#allocation3], %s2842_s16 }
  0x42   : > { %s4135_s18 = scalar_select %p41_p10, %s3958_s26, %s43_s11  }
  0x43   : > { %s4140_s20 = scalar_lea.hbm %s4822_s0, %s2873_s17  ;;  %s290_s22 = sshll.u32 %s280_s21, 4  ;;  %s4142_s22 = int_to_ptr.vmem [resolvable:$true] %s290_s22 }
  0x44   : > { %p4146_p7 = pnand %p3772_p4, %p52_p5  ;;  %s4150_s23 = scalar_lea.sflag [#allocation4], %s276_s13 }
  0x45   : > { %s3886_s24 = scalar_lea.hbm %s4140_s20, 16384  ;;  %s3891_s16 = scalar_lea.hbm %s4822_s0, 32768 }
  0x46   : > { %p3887_p11 = scmp.ne.s32.totalorder %s4140_s20, %s3886_s24  ;;  %p3888_p12 = pneg %p4146_p7 }
  0x47   : > { %p3892_p2 = scmp.lt.u32.totalorder %s4140_s20, %s4822_s0  ;;  %p3893_p3 = scmp.lt.u32.totalorder %s3891_s16, %s3886_s24 }
  0x48   : > { %p3889_p13 = pnand %p3888_p12, %p3887_p11  ;;  %p3895_p9 = scmp.lt.u32.totalorder %s3886_s24, %s4140_s20 }
  0x49   : > { %p3894_p6 = por %p3893_p3, %p3892_p2 }
  0x4a   : > { %p3890_p0 = pneg %p3889_p13 }
  0x4b   : > { %p3896_p8 = por %p3895_p9, %p3894_p6 }
  0x4d   : > { %p3897_p1 = pnand %p3896_p8, %p3890_p0 }
  0x4f   : > { %3900 = shalt.err (!%p3897_p1)
}
  0x50   : > { %s3901_s13 = scalar_lea.vmem %s4142_s22, 16384  ;;  %s3976_s15 = smov [#allocation3]  }
  0x51   : > { %p3902_p4 = scmp.ne.s32.totalorder %s4142_s22, %s3901_s13  ;;  %s3906_s21 = sshll.u32 %s3976_s15, 4  ;;  %s3907_s21 = int_to_ptr.vmem [resolvable:$false] %s3906_s21 }
  0x52   : > { %s3908_s11 = scalar_lea.vmem %s3907_s21, 32768  ;;  %p3909_p11 = scmp.lt.s32.totalorder %s4142_s22, %s3907_s21 }
  0x53   : > { %p3904_p5 = pnand %p3902_p4, %p3888_p12  ;;  %p3910_p13 = scmp.lt.s32.totalorder %s3908_s11, %s3901_s13 }
  0x55   : > { %p3905_p10 = pneg %p3904_p5  ;;  %p3911_p2 = por %p3910_p13, %p3909_p11 }
  0x57   : > { %p3912_p3 = pnand %p3911_p2, %p3905_p10 }
  0x59   : > { %3915 = shalt.err (!%p3912_p3)
}
  0x5a   : > { %s3977_s24 = smov 2048   ;;  %s3978_s14 = smov 128  }
  0x5b   : > { %3769 = dma.hbm_to_vmem [thread:$0]  (!%p4146_p7), %s4140_s20, 16384, %s4142_s22, %s4150_s23, %s3977_s24, %s3977_s24, %s3978_s14  }
  0x5c   : > { %p4839_p12 = scmp.ne.s32.totalorder %s4836_s10, 0 }
  0x5d   : > { %s304_s16 = sand.u32 (!%p4839_p12), 1, %s3954_s25   ;;  %p4840_p0 = scmp.ne.s32.totalorder (!%p4839_p12), %s4835_s9, 0 }
  0x5e   : > { %302 = sbr.rel (%p4839_p12) target bundleno = 1264 (0x4f0), region = 40  ;;  %s2846_s17 = sshll.u32 (!%p4839_p12), %s304_s16, 10 }
  0x5f   : > { %s305_s19 = scalar_lea.sflag (!%p4839_p12), [#allocation4], %s304_s16  ;;  %s4181_s13 = scalar_lea.vmem (!%p4839_p12), [#allocation3], %s2846_s17 }
  0x65   : > { %3941 = dma.done.wait (%p4840_p0), %s305_s19, 16384  }
  0x66   : > { %3943 = vsyncadd (%p4840_p0), %s305_s19, 4294950912  ;;  %p4841_p6 = scmp.ne.s32.totalorder %s4834_s8, 0 }
  0x68   : > { %3945 = dma.done.wait (%p4841_p6), [#allocation6], 65568  }
  0x69   : > { %3947 = vsyncadd (%p4841_p6), [#allocation6], 4294901728  ;;  %v542_v0 = vld [vmem:[#allocation5 + $0x8] sm:$0xff]  ;;  %v544_v1 = vld [vmem:[#allocation5 + $0x18] sm:$0xff]  ;;  %p368_p7 = scmp.lt.s32.totalorder %s3962_s27, 1  ;;  %vm2372_vm0 = vcmask 523264  }
  0x6a   : > { %v734_v2 = vld [vmem:[#allocation5 + $0x608] sm:$0xff]  ;;  %v2997_v3 = vpack.c.bf16 %v544_v1, %v542_v0  ;;  %v736_v4 = vld [vmem:[#allocation5 + $0x618] sm:$0xff]  ;;  %v541_v5 = vld [vmem:[#allocation5] sm:$0xff] }
  0x6b   : > { %v543_v6 = vld [vmem:[#allocation5 + $0x10] sm:$0xff]  ;;  %v3189_v7 = vpack.c.bf16 %v736_v4, %v734_v2  ;;  %v733_v9 = vld [vmem:[#allocation5 + $0x600] sm:$0xff]  ;;  %v546_v11 = vld [vmem:[#allocation5 + $0x28] sm:$0xff]  ;;  %s4850_s27 = smov (!%p368_p7, %s3962_s27), 1 }
  0x6c   : > { %v2999_v8 = vpack.c.bf16 %v543_v6, %v541_v5  ;;  %v735_v10 = vld [vmem:[#allocation5 + $0x610] sm:$0xff]  ;;  %2998 = vmatprep.subr.bf16.mxu1 %v2997_v3  ;;  %v548_v13 = vld [vmem:[#allocation5 + $0x38] sm:$0xff]  ;;  %v738_v14 = vld [vmem:[#allocation5 + $0x628] sm:$0xff]  ;;  %s2875_s20 = sshll.u32 %s4850_s27, 6 }
  0x6d   : > { %v3191_v12 = vpack.c.bf16 %v735_v10, %v733_v9  ;;  %v740_v15 = vld [vmem:[#allocation5 + $0x638] sm:$0xff]  ;;  %3190 = vmatprep.subr.bf16.mxu0 %v3189_v7  ;;  %v3001_v16 = vpack.c.bf16 %v548_v13, %v546_v11  ;;  %v545_v18 = vld [vmem:[#allocation5 + $0x20] sm:$0xff]  ;;  %v547_v19 = vld [vmem:[#allocation5 + $0x30] sm:$0xff]  ;;  %s4754_s23 = scalar_lea.vmem %s4828_s6, %s2875_s20 }
  0x6e   : > { %3000 = vmatpush1.bf16.msra.mxu1 %v2999_v8  ;;  %v3193_v17 = vpack.c.bf16 %v740_v15, %v738_v14  ;;  %v737_v20 = vld [vmem:[#allocation5 + $0x620] sm:$0xff]  ;;  %v3003_v21 = vpack.c.bf16 %v547_v19, %v545_v18  ;;  %v739_v22 = vld [vmem:[#allocation5 + $0x630] sm:$0xff]  ;;  %v550_v23 = vld [vmem:[#allocation5 + $0x48] sm:$0xff] }
  0x6f   : > { %3192 = vmatpush1.bf16.msra.mxu0 %v3191_v12  ;;  %v552_v24 = vld [vmem:[#allocation5 + $0x58] sm:$0xff]  ;;  %3002 = vmatprep.subr.bf16.mxu1 %v3001_v16  ;;  %v3195_v25 = vpack.c.bf16 %v739_v22, %v737_v20  ;;  %v742_v27 = vld [vmem:[#allocation5 + $0x648] sm:$0xff]  ;;  %v549_v29 = vld [vmem:[#allocation5 + $0x40] sm:$0xff] }
  0x70   : > { %3194 = vmatprep.subr.bf16.mxu0 %v3193_v17  ;;  %v3005_v26 = vpack.c.bf16 %v552_v24, %v550_v23  ;;  %v744_v28 = vld [vmem:[#allocation5 + $0x658] sm:$0xff]  ;;  %v551_v31 = vld [vmem:[#allocation5 + $0x50] sm:$0xff]  ;;  %v741_v32 = vld [vmem:[#allocation5 + $0x640] sm:$0xff] }
  0x71   : > { %v3197_v30 = vpack.c.bf16 %v744_v28, %v742_v27  ;;  %v743_v33 = vld [vmem:[#allocation5 + $0x650] sm:$0xff]  ;;  %v3007_v34 = vpack.c.bf16 %v551_v31, %v549_v29  ;;  %v554_v35 = vld [vmem:[#allocation5 + $0x68] sm:$0xff]  ;;  %v556_v36 = vld [vmem:[#allocation5 + $0x78] sm:$0xff] }
  0x72   : > { %3004 = vmatpush1.bf16.msra.mxu1 %v3003_v21  ;;  %v746_v37 = vld [vmem:[#allocation5 + $0x668] sm:$0xff]  ;;  %v3199_v38 = vpack.c.bf16 %v743_v33, %v741_v32  ;;  %v3009_v39 = vpack.c.bf16 %v556_v36, %v554_v35  ;;  %v748_v40 = vld [vmem:[#allocation5 + $0x678] sm:$0xff]  ;;  %v553_v41 = vld [vmem:[#allocation5 + $0x60] sm:$0xff] }
  0x73   : > { %3196 = vmatpush1.bf16.msra.mxu0 %v3195_v25  ;;  %3006 = vmatprep.subr.bf16.mxu1 %v3005_v26  ;;  %v555_v42 = vld [vmem:[#allocation5 + $0x70] sm:$0xff]  ;;  %v3201_v43 = vpack.c.bf16 %v748_v40, %v746_v37  ;;  %v745_v44 = vld [vmem:[#allocation5 + $0x660] sm:$0xff]  ;;  %v558_v46 = vld [vmem:[#allocation5 + $0x88] sm:$0xff] }
  0x74   : > { %3198 = vmatprep.subr.bf16.mxu0 %v3197_v30  ;;  %v747_v45 = vld [vmem:[#allocation5 + $0x670] sm:$0xff]  ;;  %v560_v47 = vld [vmem:[#allocation5 + $0x98] sm:$0xff]  ;;  %v750_v48 = vld [vmem:[#allocation5 + $0x688] sm:$0xff]  ;;  %v3011_v50 = vpack.c.bf16 %v555_v42, %v553_v41 }
  0x75   : > { %v752_v49 = vld [vmem:[#allocation5 + $0x698] sm:$0xff]  ;;  %v3203_v51 = vpack.c.bf16 %v747_v45, %v745_v44  ;;  %v3013_v52 = vpack.c.bf16 %v560_v47, %v558_v46  ;;  %v557_v53 = vld [vmem:[#allocation5 + $0x80] sm:$0xff]  ;;  %v559_v54 = vld [vmem:[#allocation5 + $0x90] sm:$0xff] }
  0x76   : > { %3008 = vmatpush1.bf16.msra.mxu1 %v3007_v34  ;;  %v749_v55 = vld [vmem:[#allocation5 + $0x680] sm:$0xff]  ;;  %v3205_v56 = vpack.c.bf16 %v752_v49, %v750_v48  ;;  %v751_v57 = vld [vmem:[#allocation5 + $0x690] sm:$0xff]  ;;  %v562_v58 = vld [vmem:[#allocation5 + $0xa8] sm:$0xff]  ;;  %v3015_v62 = vpack.c.bf16 %v559_v54, %v557_v53 }
  0x77   : > { %3200 = vmatpush1.bf16.msra.mxu0 %v3199_v38  ;;  %3010 = vmatprep.subr.bf16.mxu1 %v3009_v39  ;;  %v564_v59 = vld [vmem:[#allocation5 + $0xb8] sm:$0xff]  ;;  %v754_v60 = vld [vmem:[#allocation5 + $0x6a8] sm:$0xff]  ;;  %v3207_v63 = vpack.c.bf16 %v751_v57, %v749_v55  ;;  %v561_v1 = vld [vmem:[#allocation5 + $0xa0] sm:$0xff] }
  0x78   : > { %3202 = vmatprep.subr.bf16.mxu0 %v3201_v43  ;;  %v756_v61 = vld [vmem:[#allocation5 + $0x6b8] sm:$0xff]  ;;  %v3017_v0 = vpack.c.bf16 %v564_v59, %v562_v58  ;;  %v563_v2 = vld [vmem:[#allocation5 + $0xb0] sm:$0xff]  ;;  %v753_v3 = vld [vmem:[#allocation5 + $0x6a0] sm:$0xff] }
  0x79   : > { %v3209_v4 = vpack.c.bf16 %v756_v61, %v754_v60  ;;  %v755_v5 = vld [vmem:[#allocation5 + $0x6b0] sm:$0xff]  ;;  %v566_v6 = vld [vmem:[#allocation5 + $0xc8] sm:$0xff]  ;;  %v568_v7 = vld [vmem:[#allocation5 + $0xd8] sm:$0xff]  ;;  %v3019_v10 = vpack.c.bf16 %v563_v2, %v561_v1 }
  0x7a   : > { %3012 = vmatpush1.bf16.msra.mxu1 %v3011_v50  ;;  %v758_v8 = vld [vmem:[#allocation5 + $0x6c8] sm:$0xff]  ;;  %v760_v9 = vld [vmem:[#allocation5 + $0x6d8] sm:$0xff]  ;;  %v3211_v11 = vpack.c.bf16 %v755_v5, %v753_v3  ;;  %v3021_v12 = vpack.c.bf16 %v568_v7, %v566_v6  ;;  %v565_v13 = vld [vmem:[#allocation5 + $0xc0] sm:$0xff] }
  0x7b   : > { %3204 = vmatpush1.bf16.msra.mxu0 %v3203_v51  ;;  %3014 = vmatprep.subr.bf16.mxu1 %v3013_v52  ;;  %v567_v14 = vld [vmem:[#allocation5 + $0xd0] sm:$0xff]  ;;  %v757_v15 = vld [vmem:[#allocation5 + $0x6c0] sm:$0xff]  ;;  %v3213_v16 = vpack.c.bf16 %v760_v9, %v758_v8  ;;  %v570_v18 = vld [vmem:[#allocation5 + $0xe8] sm:$0xff] }
  0x7c   : > { %3206 = vmatprep.subr.bf16.mxu0 %v3205_v56  ;;  %v759_v17 = vld [vmem:[#allocation5 + $0x6d0] sm:$0xff]  ;;  %v572_v19 = vld [vmem:[#allocation5 + $0xf8] sm:$0xff]  ;;  %v762_v20 = vld [vmem:[#allocation5 + $0x6e8] sm:$0xff]  ;;  %v3023_v22 = vpack.c.bf16 %v567_v14, %v565_v13 }
  0x7d   : > { %v764_v21 = vld [vmem:[#allocation5 + $0x6f8] sm:$0xff]  ;;  %v3215_v23 = vpack.c.bf16 %v759_v17, %v757_v15  ;;  %v3025_v24 = vpack.c.bf16 %v572_v19, %v570_v18  ;;  %v569_v25 = vld [vmem:[#allocation5 + $0xe0] sm:$0xff]  ;;  %v571_v26 = vld [vmem:[#allocation5 + $0xf0] sm:$0xff] }
  0x7e   : > { %3016 = vmatpush1.bf16.msra.mxu1 %v3015_v62  ;;  %v761_v27 = vld [vmem:[#allocation5 + $0x6e0] sm:$0xff]  ;;  %v3217_v28 = vpack.c.bf16 %v764_v21, %v762_v20  ;;  %v763_v29 = vld [vmem:[#allocation5 + $0x6f0] sm:$0xff]  ;;  %v574_v30 = vld [vmem:[#allocation5 + $0x108] sm:$0xff]  ;;  %v3027_v34 = vpack.c.bf16 %v571_v26, %v569_v25 }
  0x7f   : > { %3208 = vmatpush1.bf16.msra.mxu0 %v3207_v63  ;;  %3018 = vmatprep.subr.bf16.mxu1 %v3017_v0  ;;  %v576_v31 = vld [vmem:[#allocation5 + $0x118] sm:$0xff]  ;;  %v766_v32 = vld [vmem:[#allocation5 + $0x708] sm:$0xff]  ;;  %v3219_v35 = vpack.c.bf16 %v763_v29, %v761_v27  ;;  %v573_v37 = vld [vmem:[#allocation5 + $0x100] sm:$0xff] }
  0x80   : > { %3210 = vmatprep.subr.bf16.mxu0 %v3209_v4  ;;  %v768_v33 = vld [vmem:[#allocation5 + $0x718] sm:$0xff]  ;;  %v3029_v36 = vpack.c.bf16 %v576_v31, %v574_v30  ;;  %v575_v38 = vld [vmem:[#allocation5 + $0x110] sm:$0xff]  ;;  %v765_v39 = vld [vmem:[#allocation5 + $0x700] sm:$0xff] }
  0x81   : > { %v3221_v40 = vpack.c.bf16 %v768_v33, %v766_v32  ;;  %v767_v41 = vld [vmem:[#allocation5 + $0x710] sm:$0xff]  ;;  %v578_v42 = vld [vmem:[#allocation5 + $0x128] sm:$0xff]  ;;  %v580_v43 = vld [vmem:[#allocation5 + $0x138] sm:$0xff]  ;;  %v3031_v46 = vpack.c.bf16 %v575_v38, %v573_v37 }
  0x82   : > { %3020 = vmatpush1.bf16.msra.mxu1 %v3019_v10  ;;  %v770_v44 = vld [vmem:[#allocation5 + $0x728] sm:$0xff]  ;;  %v772_v45 = vld [vmem:[#allocation5 + $0x738] sm:$0xff]  ;;  %v3223_v47 = vpack.c.bf16 %v767_v41, %v765_v39  ;;  %v3033_v48 = vpack.c.bf16 %v580_v43, %v578_v42  ;;  %v577_v49 = vld [vmem:[#allocation5 + $0x120] sm:$0xff] }
  0x83   : > { %3212 = vmatpush1.bf16.msra.mxu0 %v3211_v11  ;;  %3022 = vmatprep.subr.bf16.mxu1 %v3021_v12  ;;  %v579_v50 = vld [vmem:[#allocation5 + $0x130] sm:$0xff]  ;;  %v769_v51 = vld [vmem:[#allocation5 + $0x720] sm:$0xff]  ;;  %v3225_v52 = vpack.c.bf16 %v772_v45, %v770_v44  ;;  %v582_v54 = vld [vmem:[#allocation5 + $0x148] sm:$0xff] }
  0x84   : > { %3214 = vmatprep.subr.bf16.mxu0 %v3213_v16  ;;  %v771_v53 = vld [vmem:[#allocation5 + $0x730] sm:$0xff]  ;;  %v584_v55 = vld [vmem:[#allocation5 + $0x158] sm:$0xff]  ;;  %v774_v56 = vld [vmem:[#allocation5 + $0x748] sm:$0xff]  ;;  %v3035_v58 = vpack.c.bf16 %v579_v50, %v577_v49 }
  0x85   : > { %v776_v57 = vld [vmem:[#allocation5 + $0x758] sm:$0xff]  ;;  %v3227_v59 = vpack.c.bf16 %v771_v53, %v769_v51  ;;  %v3037_v60 = vpack.c.bf16 %v584_v55, %v582_v54  ;;  %v581_v61 = vld [vmem:[#allocation5 + $0x140] sm:$0xff]  ;;  %v583_v62 = vld [vmem:[#allocation5 + $0x150] sm:$0xff] }
  0x86   : > { %3024 = vmatpush1.bf16.msra.mxu1 %v3023_v22  ;;  %v773_v63 = vld [vmem:[#allocation5 + $0x740] sm:$0xff]  ;;  %v3229_v0 = vpack.c.bf16 %v776_v57, %v774_v56  ;;  %v775_v1 = vld [vmem:[#allocation5 + $0x750] sm:$0xff]  ;;  %v586_v2 = vld [vmem:[#allocation5 + $0x168] sm:$0xff]  ;;  %v3039_v6 = vpack.c.bf16 %v583_v62, %v581_v61 }
  0x87   : > { %3216 = vmatpush1.bf16.msra.mxu0 %v3215_v23  ;;  %3026 = vmatprep.subr.bf16.mxu1 %v3025_v24  ;;  %v588_v3 = vld [vmem:[#allocation5 + $0x178] sm:$0xff]  ;;  %v778_v4 = vld [vmem:[#allocation5 + $0x768] sm:$0xff]  ;;  %v585_v7 = vld [vmem:[#allocation5 + $0x160] sm:$0xff]  ;;  %v3231_v8 = vpack.c.bf16 %v775_v1, %v773_v63 }
  0x88   : > { %3218 = vmatprep.subr.bf16.mxu0 %v3217_v28  ;;  %v780_v5 = vld [vmem:[#allocation5 + $0x778] sm:$0xff]  ;;  %v3041_v9 = vpack.c.bf16 %v588_v3, %v586_v2  ;;  %v587_v10 = vld [vmem:[#allocation5 + $0x170] sm:$0xff]  ;;  %v777_v11 = vld [vmem:[#allocation5 + $0x760] sm:$0xff] }
  0x89   : > { %v779_v12 = vld [vmem:[#allocation5 + $0x770] sm:$0xff]  ;;  %v3233_v13 = vpack.c.bf16 %v780_v5, %v778_v4  ;;  %v590_v14 = vld [vmem:[#allocation5 + $0x188] sm:$0xff]  ;;  %v592_v15 = vld [vmem:[#allocation5 + $0x198] sm:$0xff]  ;;  %v3043_v20 = vpack.c.bf16 %v587_v10, %v585_v7 }
  0x8a   : > { %3028 = vmatpush1.bf16.msra.mxu1 %v3027_v34  ;;  %v414_v16 = vld [vmem:[%s4181_s13 + $0x8] sm:$0xff]  ;;  %v784_v18 = vld [vmem:[#allocation5 + $0x798] sm:$0xff]  ;;  %v3235_v21 = vpack.c.bf16 %v779_v12, %v777_v11  ;;  %v3045_v22 = vpack.c.bf16 %v592_v15, %v590_v14  ;;  %v589_v23 = vld [vmem:[#allocation5 + $0x180] sm:$0xff] }
  0x8b   : > { %3220 = vmatpush1.bf16.msra.mxu0 %v3219_v35  ;;  %3030 = vmatprep.subr.bf16.mxu1 %v3029_v36  ;;  %v782_v17 = vld [vmem:[#allocation5 + $0x788] sm:$0xff]  ;;  %v420_v19 = vld [vmem:[%s4181_s13 + $0x38] sm:$0xff]  ;;  %v591_v24 = vld [vmem:[#allocation5 + $0x190] sm:$0xff] }
  0x8c   : > { %3222 = vmatprep.subr.bf16.mxu0 %v3221_v40  ;;  %1129 = vmatprep.mubr.f32.mxu1 %v414_v16  ;;  %v781_v25 = vld [vmem:[#allocation5 + $0x780] sm:$0xff]  ;;  %v3237_v26 = vpack.c.bf16 %v784_v18, %v782_v17  ;;  %v783_v27 = vld [vmem:[#allocation5 + $0x790] sm:$0xff]  ;;  %v594_v28 = vld [vmem:[#allocation5 + $0x1a8] sm:$0xff]  ;;  %v3047_v32 = vpack.c.bf16 %v591_v24, %v589_v23 }
  0x8d   : > { %1468 = vmatprep.mubr.f32.mxu0 %v420_v19  ;;  %v596_v29 = vld [vmem:[#allocation5 + $0x1b8] sm:$0xff]  ;;  %v786_v30 = vld [vmem:[#allocation5 + $0x7a8] sm:$0xff]  ;;  %v3239_v33 = vpack.c.bf16 %v783_v27, %v781_v25  ;;  %v593_v35 = vld [vmem:[#allocation5 + $0x1a0] sm:$0xff] }
  0x8e   : > { %3032 = vmatpush1.bf16.msra.mxu1 %v3031_v46  ;;  %v788_v31 = vld [vmem:[#allocation5 + $0x7b8] sm:$0xff]  ;;  %v3049_v34 = vpack.c.bf16 %v596_v29, %v594_v28  ;;  %v595_v36 = vld [vmem:[#allocation5 + $0x1b0] sm:$0xff]  ;;  %v785_v37 = vld [vmem:[#allocation5 + $0x7a0] sm:$0xff] }
  0x8f   : > { %3224 = vmatpush1.bf16.msra.mxu0 %v3223_v47  ;;  %3034 = vmatprep.subr.bf16.mxu1 %v3033_v48  ;;  %v3241_v38 = vpack.c.bf16 %v788_v31, %v786_v30  ;;  %v787_v39 = vld [vmem:[#allocation5 + $0x7b0] sm:$0xff]  ;;  %v598_v40 = vld [vmem:[#allocation5 + $0x1c8] sm:$0xff]  ;;  %v600_v41 = vld [vmem:[#allocation5 + $0x1d8] sm:$0xff]  ;;  %v3051_v44 = vpack.c.bf16 %v595_v36, %v593_v35 }
  0x90   : > { %3226 = vmatprep.subr.bf16.mxu0 %v3225_v52  ;;  %v790_v42 = vld [vmem:[#allocation5 + $0x7c8] sm:$0xff]  ;;  %v792_v43 = vld [vmem:[#allocation5 + $0x7d8] sm:$0xff]  ;;  %v3243_v45 = vpack.c.bf16 %v787_v39, %v785_v37  ;;  %v3053_v46 = vpack.c.bf16 %v600_v41, %v598_v40  ;;  %v597_v47 = vld [vmem:[#allocation5 + $0x1c0] sm:$0xff] }
  0x91   : > { %v599_v48 = vld [vmem:[#allocation5 + $0x1d0] sm:$0xff]  ;;  %v789_v49 = vld [vmem:[#allocation5 + $0x7c0] sm:$0xff]  ;;  %v3245_v50 = vpack.c.bf16 %v792_v43, %v790_v42  ;;  %v602_v52 = vld [vmem:[#allocation5 + $0x1e8] sm:$0xff] }
  0x92   : > { %3036 = vmatpush1.bf16.msra.mxu1 %v3035_v58  ;;  %v791_v51 = vld [vmem:[#allocation5 + $0x7d0] sm:$0xff]  ;;  %v604_v53 = vld [vmem:[#allocation5 + $0x1f8] sm:$0xff]  ;;  %v794_v54 = vld [vmem:[#allocation5 + $0x7e8] sm:$0xff]  ;;  %v3055_v56 = vpack.c.bf16 %v599_v48, %v597_v47 }
  0x93   : > { %3228 = vmatpush1.bf16.msra.mxu0 %v3227_v59  ;;  %3038 = vmatprep.subr.bf16.mxu1 %v3037_v60  ;;  %v796_v55 = vld [vmem:[#allocation5 + $0x7f8] sm:$0xff]  ;;  %v3247_v57 = vpack.c.bf16 %v791_v51, %v789_v49  ;;  %v3057_v58 = vpack.c.bf16 %v604_v53, %v602_v52  ;;  %v601_v59 = vld [vmem:[#allocation5 + $0x1e0] sm:$0xff]  ;;  %v603_v60 = vld [vmem:[#allocation5 + $0x1f0] sm:$0xff] }
  0x94   : > { %3230 = vmatprep.subr.bf16.mxu0 %v3229_v0  ;;  %v793_v61 = vld [vmem:[#allocation5 + $0x7e0] sm:$0xff]  ;;  %v3249_v62 = vpack.c.bf16 %v796_v55, %v794_v54  ;;  %v795_v63 = vld [vmem:[#allocation5 + $0x7f0] sm:$0xff]  ;;  %v606_v0 = vld [vmem:[#allocation5 + $0x208] sm:$0xff]  ;;  %v3059_v4 = vpack.c.bf16 %v603_v60, %v601_v59 }
  0x95   : > { %v608_v1 = vld [vmem:[#allocation5 + $0x218] sm:$0xff]  ;;  %v798_v2 = vld [vmem:[#allocation5 + $0x808] sm:$0xff]  ;;  %v3251_v5 = vpack.c.bf16 %v795_v63, %v793_v61  ;;  %v605_v7 = vld [vmem:[#allocation5 + $0x200] sm:$0xff] }
  0x96   : > { %3040 = vmatpush1.bf16.msra.mxu1 %v3039_v6  ;;  %v800_v3 = vld [vmem:[#allocation5 + $0x818] sm:$0xff]  ;;  %v3061_v6 = vpack.c.bf16 %v608_v1, %v606_v0  ;;  %v799_v11 = vld [vmem:[#allocation5 + $0x810] sm:$0xff]  ;;  %v610_v12 = vld [vmem:[#allocation5 + $0x228] sm:$0xff] }
  0x97   : > { %3232 = vmatpush1.bf16.msra.mxu0 %v3231_v8  ;;  %3042 = vmatprep.subr.bf16.mxu1 %v3041_v9  ;;  %v607_v8 = vld [vmem:[#allocation5 + $0x210] sm:$0xff]  ;;  %v797_v9 = vld [vmem:[#allocation5 + $0x800] sm:$0xff]  ;;  %v3253_v10 = vpack.c.bf16 %v800_v3, %v798_v2  ;;  %v802_v14 = vld [vmem:[#allocation5 + $0x828] sm:$0xff] }
  0x98   : > { %3234 = vmatprep.subr.bf16.mxu0 %v3233_v13  ;;  %v612_v13 = vld [vmem:[#allocation5 + $0x238] sm:$0xff]  ;;  %v413_v16 = vld [vmem:[%s4181_s13] sm:$0xff]  ;;  %v3063_v17 = vpack.c.bf16 %v607_v8, %v605_v7  ;;  %v419_v18 = vld [vmem:[%s4181_s13 + $0x30] sm:$0xff]  ;;  %v3255_v19 = vpack.c.bf16 %v799_v11, %v797_v9 }
  0x99   : > { %v804_v15 = vld [vmem:[#allocation5 + $0x838] sm:$0xff]  ;;  %v801_v23 = vld [vmem:[#allocation5 + $0x820] sm:$0xff]  ;;  %v803_v25 = vld [vmem:[#allocation5 + $0x830] sm:$0xff] }
  0x9a   : > { %3044 = vmatpush1.bf16.msra.mxu1 %v3043_v20  ;;  %v3065_v20 = vpack.c.bf16 %v612_v13, %v610_v12  ;;  %v3257_v24 = vpack.c.bf16 %v804_v15, %v802_v14  ;;  %v616_v27 = vld [vmem:[#allocation5 + $0x258] sm:$0xff]  ;;  %v806_v28 = vld [vmem:[#allocation5 + $0x848] sm:$0xff]  ;;  %v613_v31 = vld [vmem:[#allocation5 + $0x240] sm:$0xff] }
  0x9b   : > { %3236 = vmatpush1.bf16.msra.mxu0 %v3235_v21  ;;  %3046 = vmatprep.subr.bf16.mxu1 %v3045_v22  ;;  %v609_v21 = vld [vmem:[#allocation5 + $0x220] sm:$0xff]  ;;  %v611_v22 = vld [vmem:[#allocation5 + $0x230] sm:$0xff]  ;;  %v808_v29 = vld [vmem:[#allocation5 + $0x858] sm:$0xff] }
  0x9c   : > { %3238 = vmatprep.subr.bf16.mxu0 %v3237_v26  ;;  %v614_v26 = vld [vmem:[#allocation5 + $0x248] sm:$0xff]  ;;  %v3067_v30 = vpack.c.bf16 %v611_v22, %v609_v21  ;;  %v805_v36 = vld [vmem:[#allocation5 + $0x840] sm:$0xff]  ;;  %v807_v37 = vld [vmem:[#allocation5 + $0x850] sm:$0xff]  ;;  %v3261_v39 = vpack.c.bf16 %v808_v29, %v806_v28 }
  0x9d   : > { %v3069_v35 = vpack.c.bf16 %v616_v27, %v614_v26  ;;  %v618_v40 = vld [vmem:[#allocation5 + $0x268] sm:$0xff]  ;;  %v620_v41 = vld [vmem:[#allocation5 + $0x278] sm:$0xff]  ;;  %v429_v42 = vld [vmem:[%s4181_s13 + $0x80] sm:$0xff] }
  0x9e   : > { %3048 = vmatpush1.bf16.msra.mxu1 %v3047_v32  ;;  %v615_v32 = vld [vmem:[#allocation5 + $0x250] sm:$0xff]  ;;  %v810_v43 = vld [vmem:[#allocation5 + $0x868] sm:$0xff]  ;;  %v617_v47 = vld [vmem:[#allocation5 + $0x260] sm:$0xff]  ;;  %v3073_v51 = vpack.c.bf16 %v620_v41, %v618_v40 }
  0x9f   : > { %3240 = vmatpush1.bf16.msra.mxu0 %v3239_v33  ;;  %3050 = vmatprep.subr.bf16.mxu1 %v3049_v34  ;;  %v430_v33 = vld [vmem:[%s4181_s13 + $0x88] sm:$0xff]  ;;  %v3259_v34 = vpack.c.bf16 %v803_v25, %v801_v23  ;;  %v619_v48 = vld [vmem:[#allocation5 + $0x270] sm:$0xff]  ;;  %v809_v52 = vld [vmem:[#allocation5 + $0x860] sm:$0xff] }
  0xa0   : > { %3242 = vmatprep.subr.bf16.mxu0 %v3241_v38  ;;  %v436_v38 = vld [vmem:[%s4181_s13 + $0xb8] sm:$0xff]  ;;  %v446_v49 = vld [vmem:[%s4181_s13 + $0x108] sm:$0xff]  ;;  %v811_v53 = vld [vmem:[#allocation5 + $0x870] sm:$0xff] }
  0xa1   : > { %v452_v54 = vld [vmem:[%s4181_s13 + $0x138] sm:$0xff]  ;;  %v814_v59 = vld [vmem:[#allocation5 + $0x888] sm:$0xff]  ;;  %v451_v61 = vld [vmem:[%s4181_s13 + $0x130] sm:$0xff]  ;;  %v3267_v2 = vpack.c.bf16 %v811_v53, %v809_v52 }
  0xa2   : > { %3052 = vmatpush1.bf16.msra.mxu1 %v3051_v44  ;;  %v812_v44 = vld [vmem:[#allocation5 + $0x878] sm:$0xff]  ;;  %v621_v63 = vld [vmem:[#allocation5 + $0x280] sm:$0xff]  ;;  %v623_v0 = vld [vmem:[#allocation5 + $0x290] sm:$0xff] }
  0xa3   : > { %3244 = vmatpush1.bf16.msra.mxu0 %v3243_v45  ;;  %3054 = vmatprep.subr.bf16.mxu1 %v3053_v46  ;;  %v435_v45 = vld [vmem:[%s4181_s13 + $0xb0] sm:$0xff]  ;;  %v3071_v46 = vpack.c.bf16 %v615_v32, %v613_v31  ;;  %v3265_v55 = vpack.c.bf16 %v812_v44, %v810_v43  ;;  %v816_v60 = vld [vmem:[#allocation5 + $0x898] sm:$0xff]  ;;  %v462_v1 = vld [vmem:[%s4181_s13 + $0x188] sm:$0xff]  ;;  %v3079_v14 = vpack.c.bf16 %v623_v0, %v621_v63 }
  0xa4   : > { %3246 = vmatprep.subr.bf16.mxu0 %v3245_v50  ;;  %v3263_v50 = vpack.c.bf16 %v807_v37, %v805_v36  ;;  %v3269_v7 = vpack.c.bf16 %v816_v60, %v814_v59  ;;  %v626_v8 = vld [vmem:[#allocation5 + $0x2a8] sm:$0xff]  ;;  %v628_v9 = vld [vmem:[#allocation5 + $0x2b8] sm:$0xff]  ;;  %v467_v13 = vld [vmem:[%s4181_s13 + $0x1b0] sm:$0xff] }
  0xa5   : > { %v818_v11 = vld [vmem:[#allocation5 + $0x8a8] sm:$0xff]  ;;  %v820_v12 = vld [vmem:[#allocation5 + $0x8b8] sm:$0xff]  ;;  %v625_v15 = vld [vmem:[#allocation5 + $0x2a0] sm:$0xff] }
  0xa6   : > { %3056 = vmatpush1.bf16.msra.mxu1 %v3055_v56  ;;  %v622_v56 = vld [vmem:[#allocation5 + $0x288] sm:$0xff]  ;;  %v819_v21 = vld [vmem:[#allocation5 + $0x8b0] sm:$0xff]  ;;  %v484_v22 = vld [vmem:[%s4181_s13 + $0x238] sm:$0xff]  ;;  %v3273_v23 = vpack.c.bf16 %v820_v12, %v818_v11 }
  0xa7   : > { %3248 = vmatpush1.bf16.msra.mxu0 %v3247_v57  ;;  %3058 = vmatprep.subr.bf16.mxu1 %v3057_v58  ;;  %v624_v57 = vld [vmem:[#allocation5 + $0x298] sm:$0xff]  ;;  %v445_v58 = vld [vmem:[%s4181_s13 + $0x100] sm:$0xff]  ;;  %v822_v27 = vld [vmem:[#allocation5 + $0x8c8] sm:$0xff] }
  0xa8   : > { %3250 = vmatprep.subr.bf16.mxu0 %v3249_v62  ;;  %v3075_v62 = vpack.c.bf16 %v619_v48, %v617_v47  ;;  %v3077_v3 = vpack.c.bf16 %v624_v57, %v622_v56  ;;  %v632_v25 = vld [vmem:[#allocation5 + $0x2d8] sm:$0xff]  ;;  %v477_v26 = vld [vmem:[%s4181_s13 + $0x200] sm:$0xff]  ;;  %v483_v29 = vld [vmem:[%s4181_s13 + $0x230] sm:$0xff] }
  0xa9   : > { %v824_v28 = vld [vmem:[#allocation5 + $0x8d8] sm:$0xff]  ;;  %v629_v31 = vld [vmem:[#allocation5 + $0x2c0] sm:$0xff]  ;;  %v631_v32 = vld [vmem:[#allocation5 + $0x2d0] sm:$0xff] }
  0xaa   : > { %3060 = vmatpush1.bf16.msra.mxu1 %v3059_v4  ;;  %v813_v4 = vld [vmem:[#allocation5 + $0x880] sm:$0xff]  ;;  %v823_v37 = vld [vmem:[#allocation5 + $0x8d0] sm:$0xff]  ;;  %v634_v40 = vld [vmem:[#allocation5 + $0x2e8] sm:$0xff] }
  0xab   : > { %3252 = vmatpush1.bf16.msra.mxu0 %v3251_v5  ;;  %3062 = vmatprep.subr.bf16.mxu1 %v3061_v6  ;;  %v815_v5 = vld [vmem:[#allocation5 + $0x890] sm:$0xff]  ;;  %v468_v6 = vld [vmem:[%s4181_s13 + $0x1b8] sm:$0xff]  ;;  %v821_v36 = vld [vmem:[#allocation5 + $0x8c0] sm:$0xff] }
  0xac   : > { %3254 = vmatprep.subr.bf16.mxu0 %v3253_v10  ;;  %v461_v10 = vld [vmem:[%s4181_s13 + $0x180] sm:$0xff]  ;;  %v636_v41 = vld [vmem:[#allocation5 + $0x2f8] sm:$0xff]  ;;  %v826_v43 = vld [vmem:[#allocation5 + $0x8e8] sm:$0xff] }
  0xad   : > { %1130 = vmatmul.mubr.f32.vlgmr.msra.gmra.mrb[0].mxu1 %v413_v16  ;;  %v627_v16 = vld [vmem:[#allocation5 + $0x2b0] sm:$0xff]  ;;  %v828_v44 = vld [vmem:[#allocation5 + $0x8f8] sm:$0xff]  ;;  %v633_v47 = vld [vmem:[#allocation5 + $0x2e0] sm:$0xff] }
  0xae   : > { %3064 = vmatpush1.bf16.msra.mxu1 %v3063_v17  ;;  %1469 = vmatmul.mubr.f32.vlgmr.msra.gmra.mrb[0].mxu0 %v419_v18  ;;  %v478_v17 = vld [vmem:[%s4181_s13 + $0x208] sm:$0xff]  ;;  %v3271_v18 = vpack.c.bf16 %v815_v5, %v813_v4  ;;  %v635_v48 = vld [vmem:[#allocation5 + $0x2f0] sm:$0xff]  ;;  %v825_v52 = vld [vmem:[#allocation5 + $0x8e0] sm:$0xff] }
  0xaf   : > { %3256 = vmatpush1.bf16.msra.mxu0 %v3255_v19  ;;  %3066 = vmatprep.subr.bf16.mxu1 %v3065_v20  ;;  %v3081_v19 = vpack.c.bf16 %v628_v9, %v626_v8  ;;  %v817_v20 = vld [vmem:[#allocation5 + $0x8a0] sm:$0xff]  ;;  %v827_v53 = vld [vmem:[#allocation5 + $0x8f0] sm:$0xff]  ;;  %v638_v56 = vld [vmem:[#allocation5 + $0x308] sm:$0xff] }
  0xb0   : > { %3258 = vmatprep.subr.bf16.mxu0 %v3257_v24  ;;  %1135 = vmatprep.mubr.f32.mxu1 %v430_v33  ;;  %v630_v24 = vld [vmem:[#allocation5 + $0x2c8] sm:$0xff]  ;;  %v640_v57 = vld [vmem:[#allocation5 + $0x318] sm:$0xff]  ;;  %v637_v63 = vld [vmem:[#allocation5 + $0x300] sm:$0xff] }
  0xb1   : > { %1474 = vmatprep.mubr.f32.mxu0 %v436_v38  ;;  %1136 = vmatmul.mubr.f32.gmra.mrb[2].mxu1 %v429_v42  ;;  %v494_v33 = vld [vmem:[%s4181_s13 + $0x288] sm:$0xff]  ;;  %v500_v38 = vld [vmem:[%s4181_s13 + $0x2b8] sm:$0xff]  ;;  %v493_v42 = vld [vmem:[%s4181_s13 + $0x280] sm:$0xff] }
  0xb2   : > { %3068 = vmatpush1.bf16.msra.mxu1 %v3067_v30  ;;  %1475 = vmatmul.mubr.f32.gmra.mrb[2].mxu0 %v435_v45  ;;  %v3083_v30 = vpack.c.bf16 %v627_v16, %v625_v15  ;;  %v499_v45 = vld [vmem:[%s4181_s13 + $0x2b0] sm:$0xff]  ;;  %v830_v59 = vld [vmem:[#allocation5 + $0x908] sm:$0xff]  ;;  %v832_v60 = vld [vmem:[#allocation5 + $0x918] sm:$0xff] }
  0xb3   : > { %3260 = vmatpush1.bf16.msra.mxu0 %v3259_v34  ;;  %3070 = vmatprep.subr.bf16.mxu1 %v3069_v35  ;;  %v3275_v34 = vpack.c.bf16 %v819_v21, %v817_v20  ;;  %v3085_v35 = vpack.c.bf16 %v632_v25, %v630_v24  ;;  %v639_v0 = vld [vmem:[#allocation5 + $0x310] sm:$0xff]  ;;  %v829_v4 = vld [vmem:[#allocation5 + $0x900] sm:$0xff]  ;;  %v642_v8 = vld [vmem:[#allocation5 + $0x328] sm:$0xff] }
  0xb4   : > { %3262 = vmatprep.subr.bf16.mxu0 %v3261_v39  ;;  %1141 = vmatprep.mubr.f32.mxu1 %v446_v49  ;;  %v3277_v39 = vpack.c.bf16 %v824_v28, %v822_v27  ;;  %v510_v49 = vld [vmem:[%s4181_s13 + $0x308] sm:$0xff]  ;;  %v831_v5 = vld [vmem:[#allocation5 + $0x910] sm:$0xff]  ;;  %v644_v9 = vld [vmem:[#allocation5 + $0x338] sm:$0xff] }
  0xb5   : > { %1480 = vmatprep.mubr.f32.mxu0 %v452_v54  ;;  %1142 = vmatmul.mubr.f32.gmra.mrb[4].mxu1 %v445_v58  ;;  %v516_v54 = vld [vmem:[%s4181_s13 + $0x338] sm:$0xff]  ;;  %v509_v58 = vld [vmem:[%s4181_s13 + $0x300] sm:$0xff]  ;;  %v834_v11 = vld [vmem:[#allocation5 + $0x928] sm:$0xff] }
  0xb6   : > { %3072 = vmatpush1.bf16.msra.mxu1 %v3071_v46  ;;  %1481 = vmatmul.mubr.f32.gmra.mrb[4].mxu0 %v451_v61  ;;  %v3087_v46 = vpack.c.bf16 %v631_v32, %v629_v31  ;;  %v515_v61 = vld [vmem:[%s4181_s13 + $0x330] sm:$0xff]  ;;  %v836_v12 = vld [vmem:[#allocation5 + $0x938] sm:$0xff]  ;;  %v641_v15 = vld [vmem:[#allocation5 + $0x320] sm:$0xff] }
  0xb7   : > { %3264 = vmatpush1.bf16.msra.mxu0 %v3263_v50  ;;  %3074 = vmatprep.subr.bf16.mxu1 %v3073_v51  ;;  %v3279_v50 = vpack.c.bf16 %v823_v37, %v821_v36  ;;  %v3089_v51 = vpack.c.bf16 %v636_v41, %v634_v40  ;;  %v416_v16 = vld [vmem:[%s4181_s13 + $0x18] sm:$0xff]  ;;  %v833_v20 = vld [vmem:[#allocation5 + $0x920] sm:$0xff]  ;;  %v422_v21 = vld [vmem:[%s4181_s13 + $0x48] sm:$0xff] }
  0xb8   : > { %3266 = vmatprep.subr.bf16.mxu0 %v3265_v55  ;;  %1147 = vmatprep.mubr.f32.mxu1 %v462_v1  ;;  %v3281_v55 = vpack.c.bf16 %v828_v44, %v826_v43  ;;  %v526_v1 = vld [vmem:[%s4181_s13 + $0x388] sm:$0xff]  ;;  %v648_v25 = vld [vmem:[#allocation5 + $0x358] sm:$0xff]  ;;  %v645_v31 = vld [vmem:[#allocation5 + $0x340] sm:$0xff] }
  0xb9   : > { %1486 = vmatprep.mubr.f32.mxu0 %v468_v6  ;;  %1148 = vmatmul.mubr.f32.gmra.mrb[6].mxu1 %v461_v10  ;;  %v532_v6 = vld [vmem:[%s4181_s13 + $0x3b8] sm:$0xff]  ;;  %v525_v10 = vld [vmem:[%s4181_s13 + $0x380] sm:$0xff]  ;;  %v646_v24 = vld [vmem:[#allocation5 + $0x348] sm:$0xff] }
  0xba   : > { %3076 = vmatpush1.bf16.msra.mxu1 %v3075_v62  ;;  %1487 = vmatmul.mubr.f32.gmra.mrb[6].mxu0 %v467_v13  ;;  %v3091_v62 = vpack.c.bf16 %v635_v48, %v633_v47  ;;  %v531_v13 = vld [vmem:[%s4181_s13 + $0x3b0] sm:$0xff]  ;;  %v840_v27 = vld [vmem:[#allocation5 + $0x958] sm:$0xff]  ;;  %v650_v36 = vld [vmem:[#allocation5 + $0x368] sm:$0xff] }
  0xbb   : > { %3268 = vmatpush1.bf16.msra.mxu0 %v3267_v2  ;;  %3078 = vmatprep.subr.bf16.mxu1 %v3077_v3  ;;  %v3283_v2 = vpack.c.bf16 %v827_v53, %v825_v52  ;;  %v3093_v3 = vpack.c.bf16 %v640_v57, %v638_v56  ;;  %v647_v32 = vld [vmem:[#allocation5 + $0x350] sm:$0xff]  ;;  %v652_v37 = vld [vmem:[#allocation5 + $0x378] sm:$0xff]  ;;  %v649_v43 = vld [vmem:[#allocation5 + $0x360] sm:$0xff] }
  0xbc   : > { %3270 = vmatprep.subr.bf16.mxu0 %v3269_v7  ;;  %1153 = vmatprep.mubr.f32.mxu1 %v478_v17  ;;  %v3285_v7 = vpack.c.bf16 %v832_v60, %v830_v59  ;;  %v3287_v17 = vpack.c.bf16 %v831_v5, %v829_v4  ;;  %v3103_v40 = vpack.c.bf16 %v647_v32, %v645_v31  ;;  %v651_v44 = vld [vmem:[#allocation5 + $0x370] sm:$0xff]  ;;  %v654_v48 = vld [vmem:[#allocation5 + $0x388] sm:$0xff]  ;;  %v845_v57 = vld [vmem:[#allocation5 + $0x980] sm:$0xff] }
  0xbd   : > { %1492 = vmatprep.mubr.f32.mxu0 %v484_v22  ;;  %1154 = vmatmul.mubr.f32.gmra.mrb[8].mxu1 %v477_v26  ;;  %v3289_v22 = vpack.c.bf16 %v836_v12, %v834_v11  ;;  %v838_v26 = vld [vmem:[#allocation5 + $0x948] sm:$0xff]  ;;  %v843_v47 = vld [vmem:[#allocation5 + $0x970] sm:$0xff]  ;;  %v3107_v52 = vpack.c.bf16 %v651_v44, %v649_v43  ;;  %v849_v5 = vld [vmem:[#allocation5 + $0x9a0] sm:$0xff] }
  0xbe   : > { %3080 = vmatpush1.bf16.msra.mxu1 %v3079_v14  ;;  %1493 = vmatmul.mubr.f32.gmra.mrb[8].mxu0 %v483_v29  ;;  %v3095_v14 = vpack.c.bf16 %v639_v0, %v637_v63  ;;  %v655_v56 = vld [vmem:[#allocation5 + $0x390] sm:$0xff]  ;;  %v658_v60 = vld [vmem:[#allocation5 + $0x3a8] sm:$0xff]  ;;  %v852_v63 = vld [vmem:[#allocation5 + $0x9b8] sm:$0xff] }
  0xbf   : > { %3272 = vmatpush1.bf16.msra.mxu0 %v3271_v18  ;;  %3082 = vmatprep.subr.bf16.mxu1 %v3081_v19  ;;  %v3097_v18 = vpack.c.bf16 %v644_v9, %v642_v8  ;;  %v643_v19 = vld [vmem:[#allocation5 + $0x330] sm:$0xff]  ;;  %v662_v8 = vld [vmem:[#allocation5 + $0x3c8] sm:$0xff]  ;;  %v664_v9 = vld [vmem:[#allocation5 + $0x3d8] sm:$0xff] }
  0xc0   : > { %3274 = vmatprep.subr.bf16.mxu0 %v3273_v23  ;;  %1159 = vmatprep.mubr.f32.mxu1 %v494_v33  ;;  %v835_v23 = vld [vmem:[#allocation5 + $0x930] sm:$0xff]  ;;  %v3099_v28 = vpack.c.bf16 %v643_v19, %v641_v15  ;;  %v837_v33 = vld [vmem:[#allocation5 + $0x940] sm:$0xff]  ;;  %v856_v11 = vld [vmem:[#allocation5 + $0x9d8] sm:$0xff] }
  0xc1   : > { %1498 = vmatprep.mubr.f32.mxu0 %v500_v38  ;;  %1160 = vmatmul.mubr.f32.gmra.mrb[10].mxu1 %v493_v42  ;;  %v3291_v29 = vpack.c.bf16 %v835_v23, %v833_v20  ;;  %v842_v38 = vld [vmem:[#allocation5 + $0x968] sm:$0xff]  ;;  %v3105_v42 = vpack.c.bf16 %v652_v37, %v650_v36  ;;  %v847_v59 = vld [vmem:[#allocation5 + $0x990] sm:$0xff]  ;;  %v661_v15 = vld [vmem:[#allocation5 + $0x3c0] sm:$0xff] }
  0xc2   : > { %3084 = vmatpush1.bf16.msra.mxu1 %v3083_v30  ;;  %1499 = vmatmul.mubr.f32.gmra.mrb[10].mxu0 %v499_v45  ;;  %v3101_v30 = vpack.c.bf16 %v648_v25, %v646_v24  ;;  %v841_v45 = vld [vmem:[#allocation5 + $0x960] sm:$0xff]  ;;  %v659_v4 = vld [vmem:[#allocation5 + $0x3b0] sm:$0xff]  ;;  %v666_v20 = vld [vmem:[#allocation5 + $0x3e8] sm:$0xff] }
  0xc3   : > { %3276 = vmatpush1.bf16.msra.mxu0 %v3275_v34  ;;  %3086 = vmatprep.subr.bf16.mxu1 %v3085_v35  ;;  %v3293_v34 = vpack.c.bf16 %v840_v27, %v838_v26  ;;  %v839_v35 = vld [vmem:[#allocation5 + $0x950] sm:$0xff]  ;;  %v3299_v53 = vpack.c.bf16 %v843_v47, %v841_v45  ;;  %v860_v23 = vld [vmem:[#allocation5 + $0x9f8] sm:$0xff]  ;;  %v665_v27 = vld [vmem:[#allocation5 + $0x3e0] sm:$0xff] }
  0xc4   : > { %3278 = vmatprep.subr.bf16.mxu0 %v3277_v39  ;;  %1165 = vmatprep.mubr.f32.mxu1 %v510_v49  ;;  %v844_v39 = vld [vmem:[#allocation5 + $0x978] sm:$0xff]  ;;  %v3295_v41 = vpack.c.bf16 %v839_v35, %v837_v33  ;;  %v855_v19 = vld [vmem:[#allocation5 + $0x9d0] sm:$0xff]  ;;  %v670_v32 = vld [vmem:[#allocation5 + $0x408] sm:$0xff] }
  0xc5   : > { %1504 = vmatprep.mubr.f32.mxu0 %v516_v54  ;;  %1166 = vmatmul.mubr.f32.gmra.mrb[12].mxu1 %v509_v58  ;;  %v656_v49 = vld [vmem:[#allocation5 + $0x398] sm:$0xff]  ;;  %v859_v31 = vld [vmem:[#allocation5 + $0x9f0] sm:$0xff]  ;;  %v674_v44 = vld [vmem:[#allocation5 + $0x428] sm:$0xff] }
  0xc6   : > { %3088 = vmatpush1.bf16.msra.mxu1 %v3087_v46  ;;  %1505 = vmatmul.mubr.f32.gmra.mrb[12].mxu0 %v515_v61  ;;  %v3297_v46 = vpack.c.bf16 %v844_v39, %v842_v38  ;;  %v3109_v54 = vpack.c.bf16 %v656_v49, %v654_v48  ;;  %v660_v61 = vld [vmem:[#allocation5 + $0x3b8] sm:$0xff]  ;;  %v669_v39 = vld [vmem:[#allocation5 + $0x400] sm:$0xff]  ;;  %v863_v43 = vld [vmem:[#allocation5 + $0xa10] sm:$0xff] }
  0xc7   : > { %3280 = vmatpush1.bf16.msra.mxu0 %v3279_v50  ;;  %3090 = vmatprep.subr.bf16.mxu1 %v3089_v51  ;;  %v846_v50 = vld [vmem:[#allocation5 + $0x988] sm:$0xff]  ;;  %v848_v51 = vld [vmem:[#allocation5 + $0x998] sm:$0xff]  ;;  %v415_v48 = vld [vmem:[%s4181_s13 + $0x10] sm:$0xff] }
  0xc8   : > { %3282 = vmatprep.subr.bf16.mxu0 %v3281_v55  ;;  %1171 = vmatprep.mubr.f32.mxu1 %v526_v1  ;;  %v653_v55 = vld [vmem:[#allocation5 + $0x380] sm:$0xff]  ;;  %v3301_v58 = vpack.c.bf16 %v848_v51, %v846_v50  ;;  %v3303_v1 = vpack.c.bf16 %v847_v59, %v845_v57  ;;  %v672_v33 = vld [vmem:[#allocation5 + $0x418] sm:$0xff]  ;;  %v867_v57 = vld [vmem:[#allocation5 + $0xa30] sm:$0xff] }
  0xc9   : > { %1510 = vmatprep.mubr.f32.mxu0 %v532_v6  ;;  %1172 = vmatmul.mubr.f32.gmra.mrb[14].mxu1 %v525_v10  ;;  %v3111_v0 = vpack.c.bf16 %v655_v56, %v653_v55  ;;  %v854_v10 = vld [vmem:[#allocation5 + $0x9c8] sm:$0xff]  ;;  %v864_v35 = vld [vmem:[#allocation5 + $0xa18] sm:$0xff]  ;;  %v3125_v38 = vpack.c.bf16 %v672_v33, %v670_v32  ;;  %v421_v50 = vld [vmem:[%s4181_s13 + $0x40] sm:$0xff] }
  0xca   : > { %3092 = vmatpush1.bf16.msra.mxu1 %v3091_v62  ;;  %1511 = vmatmul.mubr.f32.gmra.mrb[14].mxu0 %v531_v13  ;;  %v850_v62 = vld [vmem:[#allocation5 + $0x9a8] sm:$0xff]  ;;  %v676_v45 = vld [vmem:[#allocation5 + $0x438] sm:$0xff]  ;;  %v865_v55 = vld [vmem:[#allocation5 + $0xa20] sm:$0xff] }
  0xcb   : > { %3284 = vmatpush1.bf16.msra.mxu0 %v3283_v2  ;;  %3094 = vmatprep.subr.bf16.mxu1 %v3093_v3  ;;  %v3113_v2 = vpack.c.bf16 %v660_v61, %v658_v60  ;;  %v657_v3 = vld [vmem:[#allocation5 + $0x3a0] sm:$0xff]  ;;  %v3305_v6 = vpack.c.bf16 %v852_v63, %v850_v62  ;;  %v868_v47 = vld [vmem:[#allocation5 + $0xa38] sm:$0xff]  ;;  %v870_v60 = vld [vmem:[#allocation5 + $0xa48] sm:$0xff] }
  0xcc   : > { %3286 = vmatprep.subr.bf16.mxu0 %v3285_v7  ;;  %1242 = vmatprep.mubr.f32.mxu1 %v416_v16  ;;  %v851_v7 = vld [vmem:[#allocation5 + $0x9b0] sm:$0xff]  ;;  %v3115_v12 = vpack.c.bf16 %v659_v4, %v657_v3  ;;  %v680_v59 = vld [vmem:[#allocation5 + $0x458] sm:$0xff]  ;;  %v3323_v3 = vpack.c.bf16 %v867_v57, %v865_v55  ;;  %v685_v32 = vld [vmem:[#allocation5 + $0x480] sm:$0xff] }
  0xcd   : > { %1581 = vmatprep.mubr.f32.mxu0 %v422_v21  ;;  %v3307_v13 = vpack.c.bf16 %v851_v7, %v849_v5  ;;  %v663_v16 = vld [vmem:[#allocation5 + $0x3d0] sm:$0xff]  ;;  %v668_v21 = vld [vmem:[#allocation5 + $0x3f8] sm:$0xff]  ;;  %v437_v7 = vld [vmem:[%s4181_s13 + $0xc0] sm:$0xff] }
  0xce   : > { %3096 = vmatpush1.bf16.msra.mxu1 %v3095_v14  ;;  %v3117_v14 = vpack.c.bf16 %v664_v9, %v662_v8  ;;  %v3119_v24 = vpack.c.bf16 %v663_v16, %v661_v15  ;;  %v3121_v26 = vpack.c.bf16 %v668_v21, %v666_v20  ;;  %v872_v61 = vld [vmem:[#allocation5 + $0xa58] sm:$0xff]  ;;  %v679_v5 = vld [vmem:[#allocation5 + $0x450] sm:$0xff]  ;;  %v681_v16 = vld [vmem:[#allocation5 + $0x460] sm:$0xff] }
  0xcf   : > { %3288 = vmatpush1.bf16.msra.mxu0 %v3287_v17  ;;  %3098 = vmatprep.subr.bf16.mxu1 %v3097_v18  ;;  %v853_v17 = vld [vmem:[#allocation5 + $0x9c0] sm:$0xff]  ;;  %v3309_v18 = vpack.c.bf16 %v856_v11, %v854_v10  ;;  %v432_v62 = vld [vmem:[%s4181_s13 + $0x98] sm:$0xff]  ;;  %v3325_v8 = vpack.c.bf16 %v872_v61, %v870_v60  ;;  %v871_v9 = vld [vmem:[#allocation5 + $0xa50] sm:$0xff] }
  0xd0   : > { %3290 = vmatprep.subr.bf16.mxu0 %v3289_v22  ;;  %v858_v22 = vld [vmem:[#allocation5 + $0x9e8] sm:$0xff]  ;;  %v3311_v25 = vpack.c.bf16 %v855_v19, %v853_v17  ;;  %v684_v11 = vld [vmem:[#allocation5 + $0x478] sm:$0xff]  ;;  %v447_v17 = vld [vmem:[%s4181_s13 + $0x110] sm:$0xff] }
  0xd1   : > { %v682_v10 = vld [vmem:[#allocation5 + $0x468] sm:$0xff]  ;;  %v683_v21 = vld [vmem:[#allocation5 + $0x470] sm:$0xff]  ;;  %v485_v55 = vld [vmem:[%s4181_s13 + $0x240] sm:$0xff] }
  0xd2   : > { %3100 = vmatpush1.bf16.msra.mxu1 %v3099_v28  ;;  %v667_v28 = vld [vmem:[#allocation5 + $0x3f0] sm:$0xff]  ;;  %v3137_v20 = vpack.c.bf16 %v684_v11, %v682_v10  ;;  %v886_v60 = vld [vmem:[#allocation5 + $0xac8] sm:$0xff]  ;;  %v888_v61 = vld [vmem:[#allocation5 + $0xad8] sm:$0xff] }
  0xd3   : > { %3292 = vmatpush1.bf16.msra.mxu0 %v3291_v29  ;;  %3102 = vmatprep.subr.bf16.mxu1 %v3101_v30  ;;  %v857_v29 = vld [vmem:[#allocation5 + $0x9e0] sm:$0xff]  ;;  %v3313_v30 = vpack.c.bf16 %v860_v23, %v858_v22  ;;  %v3123_v36 = vpack.c.bf16 %v667_v28, %v665_v27  ;;  %v688_v27 = vld [vmem:[#allocation5 + $0x498] sm:$0xff]  ;;  %v878_v28 = vld [vmem:[#allocation5 + $0xa88] sm:$0xff] }
  0xd4   : > { %3294 = vmatprep.subr.bf16.mxu0 %v3293_v34  ;;  %v862_v34 = vld [vmem:[#allocation5 + $0xa08] sm:$0xff]  ;;  %v3315_v37 = vpack.c.bf16 %v859_v31, %v857_v29  ;;  %v873_v22 = vld [vmem:[#allocation5 + $0xa60] sm:$0xff]  ;;  %v880_v29 = vld [vmem:[#allocation5 + $0xa98] sm:$0xff]  ;;  %v3139_v31 = vpack.c.bf16 %v683_v21, %v681_v16 }
  0xd5   : > { %v453_v23 = vld [vmem:[%s4181_s13 + $0x140] sm:$0xff]  ;;  %v463_v33 = vld [vmem:[%s4181_s13 + $0x190] sm:$0xff]  ;;  %v698_v10 = vld [vmem:[#allocation5 + $0x4e8] sm:$0xff] }
  0xd6   : > { %3104 = vmatpush1.bf16.msra.mxu1 %v3103_v40  ;;  %v671_v40 = vld [vmem:[#allocation5 + $0x410] sm:$0xff]  ;;  %v700_v11 = vld [vmem:[#allocation5 + $0x4f8] sm:$0xff]  ;;  %v697_v16 = vld [vmem:[#allocation5 + $0x4e0] sm:$0xff] }
  0xd7   : > { %3296 = vmatpush1.bf16.msra.mxu0 %v3295_v41  ;;  %3106 = vmatprep.subr.bf16.mxu1 %v3105_v42  ;;  %v861_v41 = vld [vmem:[#allocation5 + $0xa00] sm:$0xff]  ;;  %v3317_v42 = vpack.c.bf16 %v864_v35, %v862_v34  ;;  %v3127_v49 = vpack.c.bf16 %v671_v40, %v669_v39  ;;  %v470_v34 = vld [vmem:[%s4181_s13 + $0x1c8] sm:$0xff]  ;;  %v3333_v40 = vpack.c.bf16 %v880_v29, %v878_v28  ;;  %v883_v57 = vld [vmem:[#allocation5 + $0xab0] sm:$0xff] }
  0xd8   : > { %3298 = vmatprep.subr.bf16.mxu0 %v3297_v46  ;;  %v866_v46 = vld [vmem:[#allocation5 + $0xa28] sm:$0xff]  ;;  %v3319_v51 = vpack.c.bf16 %v863_v43, %v861_v41  ;;  %v469_v39 = vld [vmem:[%s4181_s13 + $0x1c0] sm:$0xff]  ;;  %v879_v41 = vld [vmem:[#allocation5 + $0xa90] sm:$0xff] }
  0xd9   : > { %v3321_v56 = vpack.c.bf16 %v868_v47, %v866_v46  ;;  %v692_v43 = vld [vmem:[#allocation5 + $0x4b8] sm:$0xff]  ;;  %v699_v21 = vld [vmem:[#allocation5 + $0x4f0] sm:$0xff]  ;;  %v894_v28 = vld [vmem:[#allocation5 + $0xb08] sm:$0xff] }
  0xda   : > { %3108 = vmatpush1.bf16.msra.mxu1 %v3107_v52  ;;  %v3129_v52 = vpack.c.bf16 %v676_v45, %v674_v44  ;;  %v882_v44 = vld [vmem:[#allocation5 + $0xaa8] sm:$0xff]  ;;  %v884_v45 = vld [vmem:[#allocation5 + $0xab8] sm:$0xff] }
  0xdb   : > { %3300 = vmatpush1.bf16.msra.mxu0 %v3299_v53  ;;  %3110 = vmatprep.subr.bf16.mxu1 %v3109_v54  ;;  %v673_v53 = vld [vmem:[#allocation5 + $0x420] sm:$0xff]  ;;  %v675_v54 = vld [vmem:[#allocation5 + $0x430] sm:$0xff]  ;;  %v480_v46 = vld [vmem:[%s4181_s13 + $0x218] sm:$0xff] }
  0xdc   : > { %3302 = vmatprep.subr.bf16.mxu0 %v3301_v58  ;;  %v678_v58 = vld [vmem:[#allocation5 + $0x448] sm:$0xff]  ;;  %v3131_v63 = vpack.c.bf16 %v675_v54, %v673_v53  ;;  %v691_v53 = vld [vmem:[#allocation5 + $0x4b0] sm:$0xff]  ;;  %v881_v54 = vld [vmem:[#allocation5 + $0xaa0] sm:$0xff] }
  0xdd   : > { %v3133_v4 = vpack.c.bf16 %v680_v59, %v678_v58  ;;  %v694_v58 = vld [vmem:[#allocation5 + $0x4c8] sm:$0xff]  ;;  %v696_v59 = vld [vmem:[#allocation5 + $0x4d8] sm:$0xff] }
  0xde   : > { %3112 = vmatpush1.bf16.msra.mxu1 %v3111_v0  ;;  %v677_v0 = vld [vmem:[#allocation5 + $0x440] sm:$0xff]  ;;  %v896_v29 = vld [vmem:[#allocation5 + $0xb18] sm:$0xff] }
  0xdf   : > { %3304 = vmatpush1.bf16.msra.mxu0 %v3303_v1  ;;  %3114 = vmatprep.subr.bf16.mxu1 %v3113_v2  ;;  %v431_v1 = vld [vmem:[%s4181_s13 + $0x90] sm:$0xff]  ;;  %v438_v2 = vld [vmem:[%s4181_s13 + $0xc8] sm:$0xff]  ;;  %v3135_v15 = vpack.c.bf16 %v679_v5, %v677_v0  ;;  %v693_v0 = vld [vmem:[#allocation5 + $0x4c0] sm:$0xff] }
  0xe0   : > { %3306 = vmatprep.subr.bf16.mxu0 %v3305_v6  ;;  %v869_v6 = vld [vmem:[#allocation5 + $0xa40] sm:$0xff]  ;;  %v695_v5 = vld [vmem:[#allocation5 + $0x4d0] sm:$0xff] }
  0xe1   : > { %v3327_v19 = vpack.c.bf16 %v871_v9, %v869_v6  ;;  %v885_v6 = vld [vmem:[#allocation5 + $0xac0] sm:$0xff]  ;;  %v887_v9 = vld [vmem:[#allocation5 + $0xad0] sm:$0xff] }
  0xe2   : > { %3116 = vmatpush1.bf16.msra.mxu1 %v3115_v12  ;;  %v874_v12 = vld [vmem:[#allocation5 + $0xa68] sm:$0xff] }
  0xe3   : > { %3308 = vmatpush1.bf16.msra.mxu0 %v3307_v13  ;;  %3118 = vmatprep.subr.bf16.mxu1 %v3117_v14  ;;  %v876_v13 = vld [vmem:[#allocation5 + $0xa78] sm:$0xff] }
  0xe4   : > { %3310 = vmatprep.subr.bf16.mxu0 %v3309_v18  ;;  %v448_v14 = vld [vmem:[%s4181_s13 + $0x118] sm:$0xff]  ;;  %v454_v18 = vld [vmem:[%s4181_s13 + $0x148] sm:$0xff] }
  0xe6   : > { %3120 = vmatpush1.bf16.msra.mxu1 %v3119_v24  ;;  %v3329_v24 = vpack.c.bf16 %v876_v13, %v874_v12  ;;  %v890_v12 = vld [vmem:[#allocation5 + $0xae8] sm:$0xff]  ;;  %v892_v13 = vld [vmem:[#allocation5 + $0xaf8] sm:$0xff] }
  0xe7   : > { %3312 = vmatpush1.bf16.msra.mxu0 %v3311_v25  ;;  %3122 = vmatprep.subr.bf16.mxu1 %v3121_v26  ;;  %v875_v25 = vld [vmem:[#allocation5 + $0xa70] sm:$0xff]  ;;  %v686_v26 = vld [vmem:[#allocation5 + $0x488] sm:$0xff] }
  0xe8   : > { %3314 = vmatprep.subr.bf16.mxu0 %v3313_v30  ;;  %v464_v30 = vld [vmem:[%s4181_s13 + $0x198] sm:$0xff]  ;;  %v3331_v35 = vpack.c.bf16 %v875_v25, %v873_v22  ;;  %v889_v22 = vld [vmem:[#allocation5 + $0xae0] sm:$0xff]  ;;  %v891_v25 = vld [vmem:[#allocation5 + $0xaf0] sm:$0xff] }
  0xea   : > { %3124 = vmatpush1.bf16.msra.mxu1 %v3123_v36  ;;  %v3141_v36 = vpack.c.bf16 %v688_v27, %v686_v26  ;;  %v702_v26 = vld [vmem:[#allocation5 + $0x508] sm:$0xff]  ;;  %v704_v27 = vld [vmem:[#allocation5 + $0x518] sm:$0xff] }
  0xeb   : > { %3316 = vmatpush1.bf16.msra.mxu0 %v3315_v37  ;;  %3126 = vmatprep.subr.bf16.mxu1 %v3125_v38  ;;  %v687_v37 = vld [vmem:[#allocation5 + $0x490] sm:$0xff]  ;;  %v877_v38 = vld [vmem:[#allocation5 + $0xa80] sm:$0xff] }
  0xec   : > { %3318 = vmatprep.subr.bf16.mxu0 %v3317_v42  ;;  %v690_v42 = vld [vmem:[#allocation5 + $0x4a8] sm:$0xff]  ;;  %v3143_v47 = vpack.c.bf16 %v687_v37, %v685_v32  ;;  %v701_v32 = vld [vmem:[#allocation5 + $0x500] sm:$0xff]  ;;  %v703_v37 = vld [vmem:[#allocation5 + $0x510] sm:$0xff] }
  0xed   : > { %1243 = vmatmul.mubr.f32.vlgmr.msra.gmra.mrb[0].mxu1 %v415_v48  ;;  %v689_v48 = vld [vmem:[#allocation5 + $0x4a0] sm:$0xff] }
  0xee   : > { %3128 = vmatpush1.bf16.msra.mxu1 %v3127_v49  ;;  %1582 = vmatmul.mubr.f32.vlgmr.msra.gmra.mrb[0].mxu0 %v421_v50  ;;  %v479_v49 = vld [vmem:[%s4181_s13 + $0x210] sm:$0xff]  ;;  %v486_v50 = vld [vmem:[%s4181_s13 + $0x248] sm:$0xff] }
  0xef   : > { %3320 = vmatpush1.bf16.msra.mxu0 %v3319_v51  ;;  %3130 = vmatprep.subr.bf16.mxu1 %v3129_v52  ;;  %v3335_v51 = vpack.c.bf16 %v879_v41, %v877_v38  ;;  %v3145_v52 = vpack.c.bf16 %v692_v43, %v690_v42  ;;  %v893_v38 = vld [vmem:[#allocation5 + $0xb00] sm:$0xff]  ;;  %v895_v41 = vld [vmem:[#allocation5 + $0xb10] sm:$0xff]  ;;  %v706_v42 = vld [vmem:[#allocation5 + $0x528] sm:$0xff] }
  0xf0   : > { %3322 = vmatprep.subr.bf16.mxu0 %v3321_v56  ;;  %1248 = vmatprep.mubr.f32.mxu1 %v432_v62  ;;  %v3337_v56 = vpack.c.bf16 %v884_v45, %v882_v44  ;;  %v496_v62 = vld [vmem:[%s4181_s13 + $0x298] sm:$0xff]  ;;  %v898_v44 = vld [vmem:[#allocation5 + $0xb28] sm:$0xff] }
  0xf1   : > { %1249 = vmatmul.mubr.f32.gmra.mrb[2].mxu1 %v431_v1  ;;  %1587 = vmatprep.mubr.f32.mxu0 %v438_v2  ;;  %v495_v1 = vld [vmem:[%s4181_s13 + $0x290] sm:$0xff]  ;;  %v502_v2 = vld [vmem:[%s4181_s13 + $0x2c8] sm:$0xff]  ;;  %v708_v43 = vld [vmem:[#allocation5 + $0x538] sm:$0xff] }
  0xf2   : > { %3132 = vmatpush1.bf16.msra.mxu1 %v3131_v63  ;;  %1588 = vmatmul.mubr.f32.gmra.mrb[2].mxu0 %v437_v7  ;;  %v3147_v63 = vpack.c.bf16 %v691_v53, %v689_v48  ;;  %v501_v7 = vld [vmem:[%s4181_s13 + $0x2c0] sm:$0xff]  ;;  %v900_v45 = vld [vmem:[#allocation5 + $0xb38] sm:$0xff] }
  0xf3   : > { %3324 = vmatpush1.bf16.msra.mxu0 %v3323_v3  ;;  %3134 = vmatprep.subr.bf16.mxu1 %v3133_v4  ;;  %v3339_v3 = vpack.c.bf16 %v883_v57, %v881_v54  ;;  %v3149_v4 = vpack.c.bf16 %v696_v59, %v694_v58  ;;  %v424_v48 = vld [vmem:[%s4181_s13 + $0x58] sm:$0xff]  ;;  %v897_v53 = vld [vmem:[#allocation5 + $0xb20] sm:$0xff]  ;;  %v3353_v54 = vpack.c.bf16 %v900_v45, %v898_v44  ;;  %v902_v58 = vld [vmem:[#allocation5 + $0xb48] sm:$0xff] }
  0xf4   : > { %3326 = vmatprep.subr.bf16.mxu0 %v3325_v8  ;;  %1254 = vmatprep.mubr.f32.mxu1 %v448_v14  ;;  %v3341_v8 = vpack.c.bf16 %v888_v61, %v886_v60  ;;  %v512_v14 = vld [vmem:[%s4181_s13 + $0x318] sm:$0xff] }
  0xf5   : > { %1255 = vmatmul.mubr.f32.gmra.mrb[4].mxu1 %v447_v17  ;;  %1593 = vmatprep.mubr.f32.mxu0 %v454_v18  ;;  %v511_v17 = vld [vmem:[%s4181_s13 + $0x310] sm:$0xff]  ;;  %v518_v18 = vld [vmem:[%s4181_s13 + $0x348] sm:$0xff]  ;;  %v712_v57 = vld [vmem:[#allocation5 + $0x558] sm:$0xff] }
  0xf6   : > { %3136 = vmatpush1.bf16.msra.mxu1 %v3135_v15  ;;  %1594 = vmatmul.mubr.f32.gmra.mrb[4].mxu0 %v453_v23  ;;  %v3151_v15 = vpack.c.bf16 %v695_v5, %v693_v0  ;;  %v517_v23 = vld [vmem:[%s4181_s13 + $0x340] sm:$0xff]  ;;  %v904_v59 = vld [vmem:[#allocation5 + $0xb58] sm:$0xff]  ;;  %v711_v0 = vld [vmem:[#allocation5 + $0x550] sm:$0xff] }
  0xf7   : > { %3328 = vmatpush1.bf16.msra.mxu0 %v3327_v19  ;;  %3138 = vmatprep.subr.bf16.mxu1 %v3137_v20  ;;  %v3343_v19 = vpack.c.bf16 %v887_v9, %v885_v6  ;;  %v3153_v20 = vpack.c.bf16 %v700_v11, %v698_v10  ;;  %v716_v5 = vld [vmem:[#allocation5 + $0x578] sm:$0xff]  ;;  %v906_v6 = vld [vmem:[#allocation5 + $0xb68] sm:$0xff]  ;;  %v713_v11 = vld [vmem:[#allocation5 + $0x560] sm:$0xff] }
  0xf8   : > { %3330 = vmatprep.subr.bf16.mxu0 %v3329_v24  ;;  %1260 = vmatprep.mubr.f32.mxu1 %v464_v30  ;;  %v3345_v24 = vpack.c.bf16 %v892_v13, %v890_v12  ;;  %v528_v30 = vld [vmem:[%s4181_s13 + $0x398] sm:$0xff]  ;;  %v715_v12 = vld [vmem:[#allocation5 + $0x570] sm:$0xff]  ;;  %v905_v13 = vld [vmem:[#allocation5 + $0xb60] sm:$0xff] }
  0xf9   : > { %1261 = vmatmul.mubr.f32.gmra.mrb[6].mxu1 %v463_v33  ;;  %1599 = vmatprep.mubr.f32.mxu0 %v470_v34  ;;  %v527_v33 = vld [vmem:[%s4181_s13 + $0x390] sm:$0xff]  ;;  %v534_v34 = vld [vmem:[%s4181_s13 + $0x3c8] sm:$0xff] }
  0xfa   : > { %3140 = vmatpush1.bf16.msra.mxu1 %v3139_v31  ;;  %1600 = vmatmul.mubr.f32.gmra.mrb[6].mxu0 %v469_v39  ;;  %v3155_v31 = vpack.c.bf16 %v699_v21, %v697_v16  ;;  %v533_v39 = vld [vmem:[%s4181_s13 + $0x3c0] sm:$0xff]  ;;  %v718_v16 = vld [vmem:[#allocation5 + $0x588] sm:$0xff] }
  0xfb   : > { %3332 = vmatpush1.bf16.msra.mxu0 %v3331_v35  ;;  %3142 = vmatprep.subr.bf16.mxu1 %v3141_v36  ;;  %v3347_v35 = vpack.c.bf16 %v891_v25, %v889_v22  ;;  %v3157_v36 = vpack.c.bf16 %v704_v27, %v702_v26  ;;  %v909_v25 = vld [vmem:[#allocation5 + $0xb80] sm:$0xff]  ;;  %v911_v27 = vld [vmem:[#allocation5 + $0xb90] sm:$0xff] }
  0xfc   : > { %3334 = vmatprep.subr.bf16.mxu0 %v3333_v40  ;;  %1266 = vmatprep.mubr.f32.mxu1 %v480_v46  ;;  %v3349_v40 = vpack.c.bf16 %v896_v29, %v894_v28  ;;  %v418_v46 = vld [vmem:[%s4181_s13 + $0x28] sm:$0xff]  ;;  %v724_v29 = vld [vmem:[#allocation5 + $0x5b8] sm:$0xff] }
  0xfd   : > { %1267 = vmatmul.mubr.f32.gmra.mrb[8].mxu1 %v479_v49  ;;  %1605 = vmatprep.mubr.f32.mxu0 %v486_v50  ;;  %v3351_v49 = vpack.c.bf16 %v895_v41, %v893_v38  ;;  %v3161_v50 = vpack.c.bf16 %v708_v43, %v706_v42  ;;  %v722_v28 = vld [vmem:[#allocation5 + $0x5a8] sm:$0xff]  ;;  %v728_v41 = vld [vmem:[#allocation5 + $0x5d8] sm:$0xff] }
  0xfe   : > { %3144 = vmatpush1.bf16.msra.mxu1 %v3143_v47  ;;  %1606 = vmatmul.mubr.f32.gmra.mrb[8].mxu0 %v485_v55  ;;  %v3159_v47 = vpack.c.bf16 %v703_v37, %v701_v32  ;;  %v899_v55 = vld [vmem:[#allocation5 + $0xb30] sm:$0xff]  ;;  %v913_v37 = vld [vmem:[#allocation5 + $0xba0] sm:$0xff]  ;;  %v918_v42 = vld [vmem:[#allocation5 + $0xbc8] sm:$0xff] }
  0xff   : > { %3336 = vmatpush1.bf16.msra.mxu0 %v3335_v51  ;;  %3146 = vmatprep.subr.bf16.mxu1 %v3145_v52  ;;  %v705_v51 = vld [vmem:[#allocation5 + $0x520] sm:$0xff]  ;;  %v707_v52 = vld [vmem:[#allocation5 + $0x530] sm:$0xff]  ;;  %v3355_v61 = vpack.c.bf16 %v899_v55, %v897_v53  ;;  %v920_v43 = vld [vmem:[#allocation5 + $0xbd8] sm:$0xff] }
 0x100   : > { %3338 = vmatprep.subr.bf16.mxu0 %v3337_v56  ;;  %1272 = vmatprep.mubr.f32.mxu1 %v496_v62  ;;  %v710_v56 = vld [vmem:[#allocation5 + $0x548] sm:$0xff]  ;;  %v3163_v60 = vpack.c.bf16 %v707_v52, %v705_v51  ;;  %v919_v51 = vld [vmem:[#allocation5 + $0xbd0] sm:$0xff]  ;;  %v732_v53 = vld [vmem:[#allocation5 + $0x5f8] sm:$0xff] }
 0x101   : > { %1273 = vmatmul.mubr.f32.gmra.mrb[10].mxu1 %v495_v1  ;;  %1611 = vmatprep.mubr.f32.mxu0 %v502_v2  ;;  %v3165_v62 = vpack.c.bf16 %v712_v57, %v710_v56  ;;  %v901_v1 = vld [vmem:[#allocation5 + $0xb40] sm:$0xff]  ;;  %v3357_v2 = vpack.c.bf16 %v904_v59, %v902_v58  ;;  %v730_v52 = vld [vmem:[#allocation5 + $0x5e8] sm:$0xff]  ;;  %v924_v55 = vld [vmem:[#allocation5 + $0xbf8] sm:$0xff] }
 0x102   : > { %3148 = vmatpush1.bf16.msra.mxu1 %v3147_v63  ;;  %1612 = vmatmul.mubr.f32.gmra.mrb[10].mxu0 %v501_v7  ;;  %v709_v63 = vld [vmem:[#allocation5 + $0x540] sm:$0xff]  ;;  %v908_v7 = vld [vmem:[#allocation5 + $0xb78] sm:$0xff]  ;;  %v3185_v58 = vpack.c.bf16 %v732_v53, %v730_v52  ;;  %v487_v52 = vld [vmem:[%s4181_s13 + $0x250] sm:$0xff] }
 0x103   : > { %3340 = vmatpush1.bf16.msra.mxu0 %v3339_v3  ;;  %3150 = vmatprep.subr.bf16.mxu1 %v3149_v4  ;;  %v903_v3 = vld [vmem:[#allocation5 + $0xb50] sm:$0xff]  ;;  %v714_v4 = vld [vmem:[#allocation5 + $0x568] sm:$0xff]  ;;  %v729_v59 = vld [vmem:[#allocation5 + $0x5e0] sm:$0xff] }
 0x104   : > { %3342 = vmatprep.subr.bf16.mxu0 %v3341_v8  ;;  %1278 = vmatprep.mubr.f32.mxu1 %v512_v14  ;;  %v3167_v8 = vpack.c.bf16 %v711_v0, %v709_v63  ;;  %v3359_v9 = vpack.c.bf16 %v903_v3, %v901_v1  ;;  %v3169_v10 = vpack.c.bf16 %v716_v5, %v714_v4  ;;  %v923_v63 = vld [vmem:[#allocation5 + $0xbf0] sm:$0xff]  ;;  %v926_v0 = vld [vmem:[#allocation5 + $0xc08] sm:$0xff]  ;;  %v928_v1 = vld [vmem:[#allocation5 + $0xc18] sm:$0xff] }
 0x105   : > { %1279 = vmatmul.mubr.f32.gmra.mrb[12].mxu1 %v511_v17  ;;  %1617 = vmatprep.mubr.f32.mxu0 %v518_v18  ;;  %v3361_v14 = vpack.c.bf16 %v908_v7, %v906_v6  ;;  %v720_v17 = vld [vmem:[#allocation5 + $0x598] sm:$0xff]  ;;  %v910_v18 = vld [vmem:[#allocation5 + $0xb88] sm:$0xff]  ;;  %v3381_v4 = vpack.c.bf16 %v928_v1, %v926_v0  ;;  %v925_v5 = vld [vmem:[#allocation5 + $0xc00] sm:$0xff] }
 0x106   : > { %3152 = vmatpush1.bf16.msra.mxu1 %v3151_v15  ;;  %1618 = vmatmul.mubr.f32.gmra.mrb[12].mxu0 %v517_v23  ;;  %v907_v15 = vld [vmem:[#allocation5 + $0xb70] sm:$0xff]  ;;  %v3173_v22 = vpack.c.bf16 %v720_v17, %v718_v16  ;;  %v717_v23 = vld [vmem:[#allocation5 + $0x580] sm:$0xff]  ;;  %v930_v7 = vld [vmem:[#allocation5 + $0xc28] sm:$0xff] }
 0x107   : > { %3344 = vmatpush1.bf16.msra.mxu0 %v3343_v19  ;;  %3154 = vmatprep.subr.bf16.mxu1 %v3153_v20  ;;  %v912_v19 = vld [vmem:[#allocation5 + $0xb98] sm:$0xff]  ;;  %v3171_v20 = vpack.c.bf16 %v715_v12, %v713_v11  ;;  %v3363_v21 = vpack.c.bf16 %v907_v15, %v905_v13  ;;  %v927_v6 = vld [vmem:[#allocation5 + $0xc10] sm:$0xff]  ;;  %v434_v12 = vld [vmem:[%s4181_s13 + $0xa8] sm:$0xff] }
 0x108   : > { %3346 = vmatprep.subr.bf16.mxu0 %v3345_v24  ;;  %1284 = vmatprep.mubr.f32.mxu1 %v528_v30  ;;  %v719_v24 = vld [vmem:[#allocation5 + $0x590] sm:$0xff]  ;;  %v3365_v26 = vpack.c.bf16 %v912_v19, %v910_v18  ;;  %v914_v30 = vld [vmem:[#allocation5 + $0xba8] sm:$0xff]  ;;  %v3383_v11 = vpack.c.bf16 %v927_v6, %v925_v5  ;;  %v440_v16 = vld [vmem:[%s4181_s13 + $0xd8] sm:$0xff] }
 0x109   : > { %1285 = vmatmul.mubr.f32.gmra.mrb[14].mxu1 %v527_v33  ;;  %1623 = vmatprep.mubr.f32.mxu0 %v534_v34  ;;  %v3175_v32 = vpack.c.bf16 %v719_v24, %v717_v23  ;;  %v3367_v33 = vpack.c.bf16 %v911_v27, %v909_v25  ;;  %v3177_v34 = vpack.c.bf16 %v724_v29, %v722_v28  ;;  %v931_v15 = vld [vmem:[#allocation5 + $0xc30] sm:$0xff]  ;;  %v934_v17 = vld [vmem:[#allocation5 + $0xc48] sm:$0xff]  ;;  %v936_v18 = vld [vmem:[#allocation5 + $0xc58] sm:$0xff] }
 0x10a   : > { %3156 = vmatpush1.bf16.msra.mxu1 %v3155_v31  ;;  %1624 = vmatmul.mubr.f32.gmra.mrb[14].mxu0 %v533_v39  ;;  %v916_v31 = vld [vmem:[#allocation5 + $0xbb8] sm:$0xff]  ;;  %v915_v39 = vld [vmem:[#allocation5 + $0xbb0] sm:$0xff]  ;;  %v433_v19 = vld [vmem:[%s4181_s13 + $0xa0] sm:$0xff]  ;;  %v3389_v23 = vpack.c.bf16 %v936_v18, %v934_v17 }
 0x10b   : > { %3348 = vmatpush1.bf16.msra.mxu0 %v3347_v35  ;;  %3158 = vmatprep.subr.bf16.mxu1 %v3157_v36  ;;  %v721_v35 = vld [vmem:[#allocation5 + $0x5a0] sm:$0xff]  ;;  %v723_v36 = vld [vmem:[#allocation5 + $0x5b0] sm:$0xff]  ;;  %v3369_v38 = vpack.c.bf16 %v916_v31, %v914_v30  ;;  %v3371_v45 = vpack.c.bf16 %v915_v39, %v913_v37  ;;  %v938_v27 = vld [vmem:[#allocation5 + $0xc68] sm:$0xff] }
 0x10c   : > { %3350 = vmatprep.subr.bf16.mxu0 %v3349_v40  ;;  %1355 = vmatprep.mubr.f32.mxu1 %v418_v46  ;;  %v726_v40 = vld [vmem:[#allocation5 + $0x5c8] sm:$0xff]  ;;  %v3179_v44 = vpack.c.bf16 %v723_v36, %v721_v35  ;;  %v933_v24 = vld [vmem:[#allocation5 + $0xc40] sm:$0xff]  ;;  %v935_v25 = vld [vmem:[#allocation5 + $0xc50] sm:$0xff] }
 0x10d   : > { %1694 = vmatprep.mubr.f32.mxu0 %v424_v48  ;;  %v3181_v46 = vpack.c.bf16 %v728_v41, %v726_v40  ;;  %v727_v48 = vld [vmem:[#allocation5 + $0x5d0] sm:$0xff]  ;;  %v940_v28 = vld [vmem:[#allocation5 + $0xc78] sm:$0xff]  ;;  %v449_v29 = vld [vmem:[%s4181_s13 + $0x120] sm:$0xff]  ;;  %v3391_v30 = vpack.c.bf16 %v935_v25, %v933_v24 }
 0x10e   : > { %3160 = vmatpush1.bf16.msra.mxu1 %v3159_v47  ;;  %v725_v47 = vld [vmem:[#allocation5 + $0x5c0] sm:$0xff]  ;;  %v466_v31 = vld [vmem:[%s4181_s13 + $0x1a8] sm:$0xff]  ;;  %v939_v35 = vld [vmem:[#allocation5 + $0xc70] sm:$0xff] }
 0x10f   : > { %3352 = vmatpush1.bf16.msra.mxu0 %v3351_v49  ;;  %3162 = vmatprep.subr.bf16.mxu1 %v3161_v50  ;;  %v917_v49 = vld [vmem:[#allocation5 + $0xbc0] sm:$0xff]  ;;  %v3373_v50 = vpack.c.bf16 %v920_v43, %v918_v42  ;;  %v3183_v56 = vpack.c.bf16 %v727_v48, %v725_v47  ;;  %v472_v36 = vld [vmem:[%s4181_s13 + $0x1d8] sm:$0xff]  ;;  %v942_v37 = vld [vmem:[#allocation5 + $0xc88] sm:$0xff] }
 0x110   : > { %3354 = vmatprep.subr.bf16.mxu0 %v3353_v54  ;;  %v922_v54 = vld [vmem:[#allocation5 + $0xbe8] sm:$0xff]  ;;  %v3375_v57 = vpack.c.bf16 %v919_v51, %v917_v49  ;;  %v465_v39 = vld [vmem:[%s4181_s13 + $0x1a0] sm:$0xff]  ;;  %v471_v42 = vld [vmem:[%s4181_s13 + $0x1d0] sm:$0xff] }
 0x111   : > { %v482_v41 = vld [vmem:[%s4181_s13 + $0x228] sm:$0xff]  ;;  %v948_v48 = vld [vmem:[#allocation5 + $0xcb8] sm:$0xff]  ;;  %v481_v49 = vld [vmem:[%s4181_s13 + $0x220] sm:$0xff] }
 0x112   : > { %3164 = vmatpush1.bf16.msra.mxu1 %v3163_v60  ;;  %v731_v60 = vld [vmem:[#allocation5 + $0x5f0] sm:$0xff]  ;;  %v946_v47 = vld [vmem:[#allocation5 + $0xca8] sm:$0xff]  ;;  %v949_v0 = vld [vmem:[#allocation5 + $0xcc0] sm:$0xff] }
 0x113   : > { %3356 = vmatpush1.bf16.msra.mxu0 %v3355_v61  ;;  %3166 = vmatprep.subr.bf16.mxu1 %v3165_v62  ;;  %v3377_v61 = vpack.c.bf16 %v924_v55, %v922_v54  ;;  %v921_v62 = vld [vmem:[#allocation5 + $0xbe0] sm:$0xff]  ;;  %v498_v51 = vld [vmem:[%s4181_s13 + $0x2a8] sm:$0xff]  ;;  %v3401_v53 = vpack.c.bf16 %v948_v48, %v946_v47  ;;  %v947_v55 = vld [vmem:[#allocation5 + $0xcb0] sm:$0xff] }
 0x114   : > { %3358 = vmatprep.subr.bf16.mxu0 %v3357_v2  ;;  %v3187_v2 = vpack.c.bf16 %v731_v60, %v729_v59  ;;  %v3379_v3 = vpack.c.bf16 %v923_v63, %v921_v62  ;;  %v945_v54 = vld [vmem:[#allocation5 + $0xca0] sm:$0xff]  ;;  %v503_v62 = vld [vmem:[%s4181_s13 + $0x2d0] sm:$0xff]  ;;  %v980_v47 = vld [vmem:[#allocation5 + $0xdb8] sm:$0xff] }
 0x115   : > { %v497_v59 = vld [vmem:[%s4181_s13 + $0x2a0] sm:$0xff]  ;;  %v3403_v60 = vpack.c.bf16 %v947_v55, %v945_v54  ;;  %v951_v1 = vld [vmem:[#allocation5 + $0xcd0] sm:$0xff] }
 0x116   : > { %3168 = vmatpush1.bf16.msra.mxu1 %v3167_v8  ;;  %v932_v8 = vld [vmem:[#allocation5 + $0xc38] sm:$0xff]  ;;  %v513_v5 = vld [vmem:[%s4181_s13 + $0x320] sm:$0xff]  ;;  %v3407_v6 = vpack.c.bf16 %v951_v1, %v949_v0  ;;  %v535_v17 = vld [vmem:[%s4181_s13 + $0x3d0] sm:$0xff] }
 0x117   : > { %3360 = vmatpush1.bf16.msra.mxu0 %v3359_v9  ;;  %3170 = vmatprep.subr.bf16.mxu1 %v3169_v10  ;;  %v417_v9 = vld [vmem:[%s4181_s13 + $0x20] sm:$0xff]  ;;  %v423_v10 = vld [vmem:[%s4181_s13 + $0x50] sm:$0xff]  ;;  %v3385_v13 = vpack.c.bf16 %v932_v8, %v930_v7  ;;  %v530_v7 = vld [vmem:[%s4181_s13 + $0x3a8] sm:$0xff] }
 0x118   : > { %3362 = vmatprep.subr.bf16.mxu0 %v3361_v14  ;;  %v929_v14 = vld [vmem:[#allocation5 + $0xc20] sm:$0xff]  ;;  %v519_v8 = vld [vmem:[%s4181_s13 + $0x350] sm:$0xff]  ;;  %v990_v0 = vld [vmem:[#allocation5 + $0xe08] sm:$0xff] }
 0x119   : > { %v992_v1 = vld [vmem:[#allocation5 + $0xe18] sm:$0xff] }
 0x11a   : > { %3172 = vmatpush1.bf16.msra.mxu1 %v3171_v20  ;;  %v3387_v20 = vpack.c.bf16 %v931_v15, %v929_v14  ;;  %v960_v14 = vld [vmem:[#allocation5 + $0xd18] sm:$0xff]  ;;  %v529_v15 = vld [vmem:[%s4181_s13 + $0x3a0] sm:$0xff] }
 0x11b   : > { %3364 = vmatpush1.bf16.msra.mxu0 %v3363_v21  ;;  %3174 = vmatprep.subr.bf16.mxu1 %v3173_v22  ;;  %v450_v21 = vld [vmem:[%s4181_s13 + $0x128] sm:$0xff]  ;;  %v439_v22 = vld [vmem:[%s4181_s13 + $0xd0] sm:$0xff] }
 0x11c   : > { %3366 = vmatprep.subr.bf16.mxu0 %v3365_v26  ;;  %v456_v26 = vld [vmem:[%s4181_s13 + $0x158] sm:$0xff] }
 0x11e   : > { %3176 = vmatpush1.bf16.msra.mxu1 %v3175_v32  ;;  %v455_v32 = vld [vmem:[%s4181_s13 + $0x150] sm:$0xff] }
 0x11f   : > { %3368 = vmatpush1.bf16.msra.mxu0 %v3367_v33  ;;  %3178 = vmatprep.subr.bf16.mxu1 %v3177_v34  ;;  %v3393_v33 = vpack.c.bf16 %v940_v28, %v938_v27  ;;  %v937_v34 = vld [vmem:[#allocation5 + $0xc60] sm:$0xff]  ;;  %v963_v27 = vld [vmem:[#allocation5 + $0xd30] sm:$0xff]  ;;  %v966_v28 = vld [vmem:[#allocation5 + $0xd48] sm:$0xff] }
 0x120   : > { %3370 = vmatprep.subr.bf16.mxu0 %v3369_v38  ;;  %v944_v38 = vld [vmem:[#allocation5 + $0xc98] sm:$0xff]  ;;  %v3395_v40 = vpack.c.bf16 %v939_v35, %v937_v34  ;;  %v970_v34 = vld [vmem:[#allocation5 + $0xd68] sm:$0xff] }
 0x121   : > { %v3397_v43 = vpack.c.bf16 %v944_v38, %v942_v37  ;;  %v972_v35 = vld [vmem:[#allocation5 + $0xd78] sm:$0xff]  ;;  %v969_v38 = vld [vmem:[#allocation5 + $0xd60] sm:$0xff] }
 0x122   : > { %3180 = vmatpush1.bf16.msra.mxu1 %v3179_v44  ;;  %v941_v44 = vld [vmem:[#allocation5 + $0xc80] sm:$0xff]  ;;  %v3425_v37 = vpack.c.bf16 %v972_v35, %v970_v34 }
 0x123   : > { %3372 = vmatpush1.bf16.msra.mxu0 %v3371_v45  ;;  %3182 = vmatprep.subr.bf16.mxu1 %v3181_v46  ;;  %v943_v45 = vld [vmem:[#allocation5 + $0xc90] sm:$0xff]  ;;  %v488_v46 = vld [vmem:[%s4181_s13 + $0x258] sm:$0xff]  ;;  %v1005_v35 = vld [vmem:[#allocation5 + $0xe80] sm:$0xff] }
 0x124   : > { %3374 = vmatprep.subr.bf16.mxu0 %v3373_v50  ;;  %v3399_v50 = vpack.c.bf16 %v943_v45, %v941_v44  ;;  %v973_v44 = vld [vmem:[#allocation5 + $0xd80] sm:$0xff]  ;;  %v975_v45 = vld [vmem:[#allocation5 + $0xd90] sm:$0xff] }
 0x125   : > { %v3431_v48 = vpack.c.bf16 %v975_v45, %v973_v44  ;;  %v1011_v44 = vld [vmem:[#allocation5 + $0xeb0] sm:$0xff]  ;;  %v506_v45 = vld [vmem:[%s4181_s13 + $0x2e8] sm:$0xff] }
 0x126   : > { %3184 = vmatpush1.bf16.msra.mxu1 %v3183_v56  ;;  %v504_v56 = vld [vmem:[%s4181_s13 + $0x2d8] sm:$0xff] }
 0x127   : > { %3376 = vmatpush1.bf16.msra.mxu0 %v3375_v57  ;;  %3186 = vmatprep.subr.bf16.mxu1 %v3185_v58  ;;  %v950_v57 = vld [vmem:[#allocation5 + $0xcc8] sm:$0xff]  ;;  %v952_v58 = vld [vmem:[#allocation5 + $0xcd8] sm:$0xff] }
 0x128   : > { %3378 = vmatprep.subr.bf16.mxu0 %v3377_v61  ;;  %v514_v61 = vld [vmem:[%s4181_s13 + $0x328] sm:$0xff]  ;;  %v3405_v63 = vpack.c.bf16 %v952_v58, %v950_v57  ;;  %v983_v57 = vld [vmem:[#allocation5 + $0xdd0] sm:$0xff] }
 0x129   : > { %v986_v58 = vld [vmem:[#allocation5 + $0xde8] sm:$0xff] }
 0x12a   : > { %3188 = vmatpush1.bf16.msra.mxu1 %v3187_v2  ;;  %v520_v2 = vld [vmem:[%s4181_s13 + $0x358] sm:$0xff] }
 0x12b   : > { %3380 = vmatpush1.bf16.msra.mxu0 %v3379_v3  ;;  %v954_v3 = vld [vmem:[#allocation5 + $0xce8] sm:$0xff] }
 0x12c   : > { %3382 = vmatprep.subr.bf16.mxu0 %v3381_v4  ;;  %v956_v4 = vld [vmem:[#allocation5 + $0xcf8] sm:$0xff] }
 0x12d   : > { %1356 = vmatmul.mubr.f32.vlgmr.msra.gmra.mrb[0].mxu1 %v417_v9  ;;  %v3409_v9 = vpack.c.bf16 %v956_v4, %v954_v3  ;;  %v3445_v3 = vpack.c.bf16 %v992_v1, %v990_v0  ;;  %v989_v4 = vld [vmem:[#allocation5 + $0xe00] sm:$0xff] }
 0x12e   : > { %1695 = vmatmul.mubr.f32.vlgmr.msra.gmra.mrb[0].mxu0 %v423_v10  ;;  %1361 = vmatprep.mubr.f32.mxu1 %v434_v12  ;;  %v953_v10 = vld [vmem:[#allocation5 + $0xce0] sm:$0xff]  ;;  %v536_v12 = vld [vmem:[%s4181_s13 + $0x3d8] sm:$0xff] }
 0x12f   : > { %3384 = vmatpush1.bf16.msra.mxu0 %v3383_v11  ;;  %1700 = vmatprep.mubr.f32.mxu0 %v440_v16  ;;  %v955_v11 = vld [vmem:[#allocation5 + $0xcf0] sm:$0xff]  ;;  %v537_v1 = vld [vmem:[%s4181_s13 + $0x3e0] sm:$0xff] }
 0x130   : > { %3386 = vmatprep.subr.bf16.mxu0 %v3385_v13  ;;  %v958_v13 = vld [vmem:[#allocation5 + $0xd08] sm:$0xff]  ;;  %v3411_v16 = vpack.c.bf16 %v955_v11, %v953_v10  ;;  %v993_v11 = vld [vmem:[#allocation5 + $0xe20] sm:$0xff] }
 0x131   : > { %1362 = vmatmul.mubr.f32.gmra.mrb[2].mxu1 %v433_v19  ;;  %v3413_v18 = vpack.c.bf16 %v960_v14, %v958_v13  ;;  %v957_v19 = vld [vmem:[#allocation5 + $0xd00] sm:$0xff]  ;;  %v442_v13 = vld [vmem:[%s4181_s13 + $0xe8] sm:$0xff] }
 0x132   : > { %1367 = vmatprep.mubr.f32.mxu1 %v450_v21  ;;  %1701 = vmatmul.mubr.f32.gmra.mrb[2].mxu0 %v439_v22  ;;  %v426_v21 = vld [vmem:[%s4181_s13 + $0x68] sm:$0xff] }
 0x133   : > { %3388 = vmatpush1.bf16.msra.mxu0 %v3387_v20  ;;  %1706 = vmatprep.mubr.f32.mxu0 %v456_v26  ;;  %v959_v20 = vld [vmem:[#allocation5 + $0xd10] sm:$0xff]  ;;  %v962_v22 = vld [vmem:[#allocation5 + $0xd28] sm:$0xff]  ;;  %v961_v26 = vld [vmem:[#allocation5 + $0xd20] sm:$0xff] }
 0x134   : > { %3390 = vmatprep.subr.bf16.mxu0 %v3389_v23  ;;  %v964_v23 = vld [vmem:[#allocation5 + $0xd38] sm:$0xff]  ;;  %v3415_v24 = vpack.c.bf16 %v959_v20, %v957_v19  ;;  %v998_v14 = vld [vmem:[#allocation5 + $0xe48] sm:$0xff]  ;;  %v997_v19 = vld [vmem:[#allocation5 + $0xe40] sm:$0xff] }
 0x135   : > { %1368 = vmatmul.mubr.f32.gmra.mrb[4].mxu1 %v449_v29  ;;  %v3417_v25 = vpack.c.bf16 %v964_v23, %v962_v22  ;;  %v968_v29 = vld [vmem:[#allocation5 + $0xd58] sm:$0xff]  ;;  %v999_v20 = vld [vmem:[#allocation5 + $0xe50] sm:$0xff]  ;;  %v1002_v22 = vld [vmem:[#allocation5 + $0xe68] sm:$0xff] }
 0x136   : > { %1373 = vmatprep.mubr.f32.mxu1 %v466_v31  ;;  %1707 = vmatmul.mubr.f32.gmra.mrb[4].mxu0 %v455_v32  ;;  %v3421_v31 = vpack.c.bf16 %v968_v29, %v966_v28  ;;  %v965_v32 = vld [vmem:[#allocation5 + $0xd40] sm:$0xff]  ;;  %v1004_v23 = vld [vmem:[#allocation5 + $0xe78] sm:$0xff]  ;;  %v1003_v28 = vld [vmem:[#allocation5 + $0xe70] sm:$0xff] }
 0x137   : > { %3392 = vmatpush1.bf16.msra.mxu0 %v3391_v30  ;;  %1712 = vmatprep.mubr.f32.mxu0 %v472_v36  ;;  %v3419_v30 = vpack.c.bf16 %v963_v27, %v961_v26  ;;  %v3457_v26 = vpack.c.bf16 %v1004_v23, %v1002_v22  ;;  %v1001_v27 = vld [vmem:[#allocation5 + $0xe60] sm:$0xff]  ;;  %v474_v29 = vld [vmem:[%s4181_s13 + $0x1e8] sm:$0xff]  ;;  %v1035_v23 = vld [vmem:[#allocation5 + $0xf70] sm:$0xff] }
 0x138   : > { %3394 = vmatprep.subr.bf16.mxu0 %v3393_v33  ;;  %v967_v33 = vld [vmem:[#allocation5 + $0xd50] sm:$0xff]  ;;  %v1033_v22 = vld [vmem:[#allocation5 + $0xf60] sm:$0xff] }
 0x139   : > { %1374 = vmatmul.mubr.f32.gmra.mrb[6].mxu1 %v465_v39  ;;  %v3423_v36 = vpack.c.bf16 %v967_v33, %v965_v32  ;;  %v971_v39 = vld [vmem:[#allocation5 + $0xd70] sm:$0xff]  ;;  %v3459_v32 = vpack.c.bf16 %v1003_v28, %v1001_v27  ;;  %v473_v33 = vld [vmem:[%s4181_s13 + $0x1e0] sm:$0xff] }
 0x13a   : > { %1379 = vmatprep.mubr.f32.mxu1 %v482_v41  ;;  %1713 = vmatmul.mubr.f32.gmra.mrb[6].mxu0 %v471_v42  ;;  %v976_v41 = vld [vmem:[#allocation5 + $0xd98] sm:$0xff]  ;;  %v3427_v42 = vpack.c.bf16 %v971_v39, %v969_v38  ;;  %v1010_v38 = vld [vmem:[#allocation5 + $0xea8] sm:$0xff]  ;;  %v1037_v28 = vld [vmem:[#allocation5 + $0xf80] sm:$0xff] }
 0x13b   : > { %3396 = vmatpush1.bf16.msra.mxu0 %v3395_v40  ;;  %1718 = vmatprep.mubr.f32.mxu0 %v488_v46  ;;  %v974_v40 = vld [vmem:[#allocation5 + $0xd88] sm:$0xff]  ;;  %v1012_v39 = vld [vmem:[#allocation5 + $0xeb8] sm:$0xff] }
 0x13c   : > { %3398 = vmatprep.subr.bf16.mxu0 %v3397_v43  ;;  %v3429_v43 = vpack.c.bf16 %v976_v41, %v974_v40  ;;  %v978_v46 = vld [vmem:[#allocation5 + $0xda8] sm:$0xff]  ;;  %v489_v41 = vld [vmem:[%s4181_s13 + $0x260] sm:$0xff] }
 0x13d   : > { %1380 = vmatmul.mubr.f32.gmra.mrb[8].mxu1 %v481_v49  ;;  %v3433_v49 = vpack.c.bf16 %v980_v47, %v978_v46  ;;  %v1014_v46 = vld [vmem:[#allocation5 + $0xec8] sm:$0xff]  ;;  %v1016_v47 = vld [vmem:[#allocation5 + $0xed8] sm:$0xff] }
 0x13e   : > { %1385 = vmatprep.mubr.f32.mxu1 %v498_v51  ;;  %1719 = vmatmul.mubr.f32.gmra.mrb[8].mxu0 %v487_v52  ;;  %v979_v51 = vld [vmem:[#allocation5 + $0xdb0] sm:$0xff]  ;;  %v982_v52 = vld [vmem:[#allocation5 + $0xdc8] sm:$0xff] }
 0x13f   : > { %3400 = vmatpush1.bf16.msra.mxu0 %v3399_v50  ;;  %1724 = vmatprep.mubr.f32.mxu0 %v504_v56  ;;  %v977_v50 = vld [vmem:[#allocation5 + $0xda0] sm:$0xff] }
 0x140   : > { %3402 = vmatprep.subr.bf16.mxu0 %v3401_v53  ;;  %v984_v53 = vld [vmem:[#allocation5 + $0xdd8] sm:$0xff]  ;;  %v3435_v54 = vpack.c.bf16 %v979_v51, %v977_v50  ;;  %v981_v56 = vld [vmem:[#allocation5 + $0xdc0] sm:$0xff]  ;;  %v3469_v50 = vpack.c.bf16 %v1016_v47, %v1014_v46  ;;  %v1995_v47 = vld [vmem:[%s4825_s3 + $0x50] sm:$0xff] }
 0x141   : > { %1386 = vmatmul.mubr.f32.gmra.mrb[10].mxu1 %v497_v59  ;;  %v3437_v55 = vpack.c.bf16 %v984_v53, %v982_v52  ;;  %v988_v59 = vld [vmem:[#allocation5 + $0xdf8] sm:$0xff]  ;;  %v1013_v51 = vld [vmem:[#allocation5 + $0xec0] sm:$0xff]  ;;  %v1015_v52 = vld [vmem:[#allocation5 + $0xed0] sm:$0xff] }
 0x142   : > { %1391 = vmatprep.mubr.f32.mxu1 %v514_v61  ;;  %1725 = vmatmul.mubr.f32.gmra.mrb[10].mxu0 %v503_v62  ;;  %v3441_v61 = vpack.c.bf16 %v988_v59, %v986_v58  ;;  %v985_v62 = vld [vmem:[#allocation5 + $0xde0] sm:$0xff]  ;;  %v522_v53 = vld [vmem:[%s4181_s13 + $0x368] sm:$0xff]  ;;  %v1992_v46 = vld [vmem:[%s4825_s3 + $0x38] sm:$0xff] }
 0x143   : > { %3404 = vmatpush1.bf16.msra.mxu0 %v3403_v60  ;;  %1730 = vmatprep.mubr.f32.mxu0 %v520_v2  ;;  %v3439_v60 = vpack.c.bf16 %v983_v57, %v981_v56  ;;  %v3471_v56 = vpack.c.bf16 %v1015_v52, %v1013_v51  ;;  %v521_v57 = vld [vmem:[%s4181_s13 + $0x360] sm:$0xff]  ;;  %v1991_v51 = vld [vmem:[%s4825_s3 + $0x30] sm:$0xff]  ;;  %v1994_v52 = vld [vmem:[%s4825_s3 + $0x48] sm:$0xff] }
 0x144   : > { %3406 = vmatprep.subr.bf16.mxu0 %v3405_v63  ;;  %v987_v63 = vld [vmem:[#allocation5 + $0xdf0] sm:$0xff]  ;;  %v1017_v59 = vld [vmem:[#allocation5 + $0xee0] sm:$0xff] }
 0x145   : > { %1392 = vmatmul.mubr.f32.gmra.mrb[12].mxu1 %v513_v5  ;;  %v3443_v2 = vpack.c.bf16 %v987_v63, %v985_v62  ;;  %v991_v5 = vld [vmem:[#allocation5 + $0xe10] sm:$0xff]  ;;  %v1022_v62 = vld [vmem:[#allocation5 + $0xf08] sm:$0xff]  ;;  %v1024_v63 = vld [vmem:[#allocation5 + $0xf18] sm:$0xff] }
 0x146   : > { %1397 = vmatprep.mubr.f32.mxu1 %v530_v7  ;;  %1731 = vmatmul.mubr.f32.gmra.mrb[12].mxu0 %v519_v8  ;;  %v996_v7 = vld [vmem:[#allocation5 + $0xe38] sm:$0xff]  ;;  %v425_v8 = vld [vmem:[%s4181_s13 + $0x60] sm:$0xff] }
 0x147   : > { %3408 = vmatpush1.bf16.msra.mxu0 %v3407_v6  ;;  %1736 = vmatprep.mubr.f32.mxu0 %v536_v12  ;;  %v994_v6 = vld [vmem:[#allocation5 + $0xe28] sm:$0xff]  ;;  %v995_v12 = vld [vmem:[#allocation5 + $0xe30] sm:$0xff] }
 0x148   : > { %3410 = vmatprep.subr.bf16.mxu0 %v3409_v9  ;;  %v3447_v9 = vpack.c.bf16 %v991_v5, %v989_v4  ;;  %v3449_v10 = vpack.c.bf16 %v996_v7, %v994_v6  ;;  %v1023_v4 = vld [vmem:[#allocation5 + $0xf10] sm:$0xff]  ;;  %v428_v5 = vld [vmem:[%s4181_s13 + $0x78] sm:$0xff]  ;;  %v1026_v6 = vld [vmem:[#allocation5 + $0xf28] sm:$0xff] }
 0x149   : > { %1398 = vmatmul.mubr.f32.gmra.mrb[14].mxu1 %v529_v15  ;;  %v1000_v15 = vld [vmem:[#allocation5 + $0xe58] sm:$0xff] }
 0x14a   : > { %1737 = vmatmul.mubr.f32.gmra.mrb[14].mxu0 %v535_v17  ;;  %v441_v17 = vld [vmem:[%s4181_s13 + $0xe0] sm:$0xff]  ;;  %v1028_v7 = vld [vmem:[#allocation5 + $0xf38] sm:$0xff] }
 0x14b   : > { %3412 = vmatpush1.bf16.msra.mxu0 %v3411_v16  ;;  %1807 = vmatprep.mubr.f32.mxu0 %v426_v21  ;;  %v3451_v16 = vpack.c.bf16 %v995_v12, %v993_v11  ;;  %v458_v21 = vld [vmem:[%s4181_s13 + $0x168] sm:$0xff]  ;;  %v1027_v11 = vld [vmem:[#allocation5 + $0xf30] sm:$0xff] }
 0x14c   : > { %3414 = vmatprep.subr.bf16.mxu0 %v3413_v18  ;;  %v3453_v18 = vpack.c.bf16 %v1000_v15, %v998_v14  ;;  %v1030_v12 = vld [vmem:[#allocation5 + $0xf48] sm:$0xff] }
 0x14f   : > { %3416 = vmatpush1.bf16.msra.mxu0 %v3415_v24  ;;  %v3455_v24 = vpack.c.bf16 %v999_v20, %v997_v19  ;;  %v1036_v19 = vld [vmem:[#allocation5 + $0xf78] sm:$0xff] }
 0x150   : > { %3418 = vmatprep.subr.bf16.mxu0 %v3417_v25  ;;  %v457_v25 = vld [vmem:[%s4181_s13 + $0x160] sm:$0xff] }
 0x153   : > { %3420 = vmatpush1.bf16.msra.mxu0 %v3419_v30  ;;  %v1006_v30 = vld [vmem:[#allocation5 + $0xe88] sm:$0xff] }
 0x154   : > { %3422 = vmatprep.subr.bf16.mxu0 %v3421_v31  ;;  %v1008_v31 = vld [vmem:[#allocation5 + $0xe98] sm:$0xff] }
 0x155   : > { %v3461_v34 = vpack.c.bf16 %v1008_v31, %v1006_v30  ;;  %v1042_v30 = vld [vmem:[#allocation5 + $0xfa8] sm:$0xff]  ;;  %v1044_v31 = vld [vmem:[#allocation5 + $0xfb8] sm:$0xff] }
 0x157   : > { %3424 = vmatpush1.bf16.msra.mxu0 %v3423_v36  ;;  %v1007_v36 = vld [vmem:[#allocation5 + $0xe90] sm:$0xff] }
 0x158   : > { %3426 = vmatprep.subr.bf16.mxu0 %v3425_v37  ;;  %v490_v37 = vld [vmem:[%s4181_s13 + $0x268] sm:$0xff]  ;;  %v3463_v40 = vpack.c.bf16 %v1007_v36, %v1005_v35  ;;  %v1043_v35 = vld [vmem:[#allocation5 + $0xfb0] sm:$0xff] }
 0x159   : > { %v1046_v36 = vld [vmem:[#allocation5 + $0xfc8] sm:$0xff] }
 0x15b   : > { %3428 = vmatpush1.bf16.msra.mxu0 %v3427_v42  ;;  %v3465_v42 = vpack.c.bf16 %v1012_v39, %v1010_v38  ;;  %v1045_v38 = vld [vmem:[#allocation5 + $0xfc0] sm:$0xff]  ;;  %v1047_v39 = vld [vmem:[#allocation5 + $0xfd0] sm:$0xff] }
 0x15c   : > { %3430 = vmatprep.subr.bf16.mxu0 %v3429_v43  ;;  %v1009_v43 = vld [vmem:[#allocation5 + $0xea0] sm:$0xff] }
 0x15f   : > { %3432 = vmatpush1.bf16.msra.mxu0 %v3431_v48  ;;  %v3467_v48 = vpack.c.bf16 %v1011_v44, %v1009_v43 }
 0x160   : > { %3434 = vmatprep.subr.bf16.mxu0 %v3433_v49  ;;  %v505_v49 = vld [vmem:[%s4181_s13 + $0x2e0] sm:$0xff] }
 0x163   : > { %3436 = vmatpush1.bf16.msra.mxu0 %v3435_v54  ;;  %v1018_v54 = vld [vmem:[#allocation5 + $0xee8] sm:$0xff] }
 0x164   : > { %3438 = vmatprep.subr.bf16.mxu0 %v3437_v55  ;;  %v1020_v55 = vld [vmem:[#allocation5 + $0xef8] sm:$0xff] }
 0x165   : > { %v3473_v58 = vpack.c.bf16 %v1020_v55, %v1018_v54  ;;  %v1050_v54 = vld [vmem:[#allocation5 + $0xfe8] sm:$0xff]  ;;  %v1052_v55 = vld [vmem:[#allocation5 + $0xff8] sm:$0xff] }
 0x167   : > { %3440 = vmatpush1.bf16.msra.mxu0 %v3439_v60  ;;  %v1019_v60 = vld [vmem:[#allocation5 + $0xef0] sm:$0xff] }
 0x168   : > { %3442 = vmatprep.subr.bf16.mxu0 %v3441_v61  ;;  %v538_v61 = vld [vmem:[%s4181_s13 + $0x3e8] sm:$0xff]  ;;  %v3475_v0 = vpack.c.bf16 %v1019_v60, %v1017_v59  ;;  %v1049_v59 = vld [vmem:[#allocation5 + $0xfe0] sm:$0xff] }
 0x16b   : > { %3444 = vmatpush1.bf16.msra.mxu0 %v3443_v2  ;;  %v3477_v2 = vpack.c.bf16 %v1024_v63, %v1022_v62  ;;  %v2000_v62 = vld [vmem:[%s4825_s3 + $0x78] sm:$0xff]  ;;  %v3505_v63 = vpack.c.bf16 %v1052_v55, %v1050_v54  ;;  %v2042_v54 = vld [vmem:[%s4825_s3 + $0x1c8] sm:$0xff] }
 0x16c   : > { %3446 = vmatprep.subr.bf16.mxu0 %v3445_v3  ;;  %v1021_v3 = vld [vmem:[#allocation5 + $0xf00] sm:$0xff]  ;;  %v524_v55 = vld [vmem:[%s4181_s13 + $0x378] sm:$0xff] }
 0x16e   : > { %1808 = vmatmul.mubr.f32.vlgmr.msra.gmra.mrb[0].mxu0 %v425_v8  ;;  %v3479_v8 = vpack.c.bf16 %v1023_v4, %v1021_v3 }
 0x16f   : > { %3448 = vmatpush1.bf16.msra.mxu0 %v3447_v9  ;;  %1813 = vmatprep.mubr.f32.mxu0 %v442_v13  ;;  %v3481_v9 = vpack.c.bf16 %v1028_v7, %v1026_v6  ;;  %v1032_v13 = vld [vmem:[#allocation5 + $0xf58] sm:$0xff]  ;;  %v2003_v6 = vld [vmem:[%s4825_s3 + $0x90] sm:$0xff]  ;;  %v2006_v7 = vld [vmem:[%s4825_s3 + $0xa8] sm:$0xff] }
 0x170   : > { %3450 = vmatprep.subr.bf16.mxu0 %v3449_v10  ;;  %v1025_v10 = vld [vmem:[#allocation5 + $0xf20] sm:$0xff]  ;;  %v3485_v15 = vpack.c.bf16 %v1032_v13, %v1030_v12 }
 0x171   : > { %v3483_v14 = vpack.c.bf16 %v1027_v11, %v1025_v10  ;;  %v3523_v10 = vpack.c.bf16 %v2006_v7, %v2003_v6  ;;  %v427_v11 = vld [vmem:[%s4181_s13 + $0x70] sm:$0xff]  ;;  %v2009_v13 = vld [vmem:[%s4825_s3 + $0xc0] sm:$0xff]  ;;  %v2054_v6 = vld [vmem:[%s4825_s3 + $0x228] sm:$0xff] }
 0x172   : > { %1814 = vmatmul.mubr.f32.gmra.mrb[2].mxu0 %v441_v17  ;;  %v1031_v17 = vld [vmem:[#allocation5 + $0xf50] sm:$0xff]  ;;  %v2058_v7 = vld [vmem:[%s4825_s3 + $0x248] sm:$0xff] }
 0x173   : > { %3452 = vmatpush1.bf16.msra.mxu0 %v3451_v16  ;;  %1819 = vmatprep.mubr.f32.mxu0 %v458_v21  ;;  %v1029_v16 = vld [vmem:[#allocation5 + $0xf40] sm:$0xff] }
 0x174   : > { %3454 = vmatprep.subr.bf16.mxu0 %v3453_v18  ;;  %v1034_v18 = vld [vmem:[#allocation5 + $0xf68] sm:$0xff]  ;;  %v3487_v20 = vpack.c.bf16 %v1031_v17, %v1029_v16  ;;  %v2016_v16 = vld [vmem:[%s4825_s3 + $0xf8] sm:$0xff]  ;;  %v2019_v17 = vld [vmem:[%s4825_s3 + $0x110] sm:$0xff] }
 0x175   : > { %v3489_v21 = vpack.c.bf16 %v1036_v19, %v1034_v18  ;;  %v443_v19 = vld [vmem:[%s4181_s13 + $0xf0] sm:$0xff] }
 0x176   : > { %1820 = vmatmul.mubr.f32.gmra.mrb[4].mxu0 %v457_v25  ;;  %v1040_v25 = vld [vmem:[#allocation5 + $0xf98] sm:$0xff] }
 0x177   : > { %3456 = vmatpush1.bf16.msra.mxu0 %v3455_v24  ;;  %1825 = vmatprep.mubr.f32.mxu0 %v474_v29  ;;  %v1038_v24 = vld [vmem:[#allocation5 + $0xf88] sm:$0xff]  ;;  %v1039_v29 = vld [vmem:[#allocation5 + $0xf90] sm:$0xff] }
 0x178   : > { %3458 = vmatprep.subr.bf16.mxu0 %v3457_v26  ;;  %v3491_v26 = vpack.c.bf16 %v1035_v23, %v1033_v22  ;;  %v3493_v27 = vpack.c.bf16 %v1040_v25, %v1038_v24  ;;  %v2018_v22 = vld [vmem:[%s4825_s3 + $0x108] sm:$0xff]  ;;  %v460_v23 = vld [vmem:[%s4181_s13 + $0x178] sm:$0xff]  ;;  %v2025_v25 = vld [vmem:[%s4825_s3 + $0x140] sm:$0xff] }
 0x179   : > { %v2022_v24 = vld [vmem:[%s4825_s3 + $0x128] sm:$0xff] }
 0x17a   : > { %1826 = vmatmul.mubr.f32.gmra.mrb[6].mxu0 %v473_v33  ;;  %v3497_v33 = vpack.c.bf16 %v1044_v31, %v1042_v30  ;;  %v2024_v30 = vld [vmem:[%s4825_s3 + $0x138] sm:$0xff] }
 0x17b   : > { %3460 = vmatpush1.bf16.msra.mxu0 %v3459_v32  ;;  %1831 = vmatprep.mubr.f32.mxu0 %v490_v37  ;;  %v3495_v32 = vpack.c.bf16 %v1039_v29, %v1037_v28  ;;  %v1048_v37 = vld [vmem:[#allocation5 + $0xfd8] sm:$0xff]  ;;  %v3533_v28 = vpack.c.bf16 %v2025_v25, %v2022_v24  ;;  %v2021_v29 = vld [vmem:[%s4825_s3 + $0x120] sm:$0xff] }
 0x17c   : > { %3462 = vmatprep.subr.bf16.mxu0 %v3461_v34  ;;  %v1041_v34 = vld [vmem:[#allocation5 + $0xfa0] sm:$0xff]  ;;  %v476_v31 = vld [vmem:[%s4181_s13 + $0x1f8] sm:$0xff] }
 0x17d   : > { %v3499_v43 = vpack.c.bf16 %v1043_v35, %v1041_v34  ;;  %v3535_v34 = vpack.c.bf16 %v2024_v30, %v2021_v29  ;;  %v475_v35 = vld [vmem:[%s4181_s13 + $0x1f0] sm:$0xff]  ;;  %v2072_v24 = vld [vmem:[%s4825_s3 + $0x2b8] sm:$0xff] }
 0x17e   : > { %1832 = vmatmul.mubr.f32.gmra.mrb[8].mxu0 %v489_v41  ;;  %v1989_v41 = vld [vmem:[%s4825_s3 + $0x20] sm:$0xff]  ;;  %v2075_v30 = vld [vmem:[%s4825_s3 + $0x2d0] sm:$0xff] }
 0x17f   : > { %3464 = vmatpush1.bf16.msra.mxu0 %v3463_v40  ;;  %1837 = vmatprep.mubr.f32.mxu0 %v506_v45  ;;  %v1986_v40 = vld [vmem:[%s4825_s3 + $0x8] sm:$0xff]  ;;  %v1988_v45 = vld [vmem:[%s4825_s3 + $0x18] sm:$0xff] }
 0x180   : > { %3466 = vmatprep.subr.bf16.mxu0 %v3465_v42  ;;  %v1985_v42 = vld [vmem:[%s4825_s3] sm:$0xff]  ;;  %v3509_v44 = vpack.c.bf16 %v1989_v41, %v1986_v40  ;;  %v2034_v40 = vld [vmem:[%s4825_s3 + $0x188] sm:$0xff] }
 0x181   : > { %v2037_v41 = vld [vmem:[%s4825_s3 + $0x1a0] sm:$0xff] }
 0x182   : > { %1838 = vmatmul.mubr.f32.gmra.mrb[10].mxu0 %v505_v49  ;;  %v3511_v49 = vpack.c.bf16 %v1988_v45, %v1985_v42  ;;  %3510 = vmatprep.subr.bf16.mxu1 %v3509_v44  ;;  %v3541_v44 = vpack.c.bf16 %v2037_v41, %v2034_v40  ;;  %v2033_v45 = vld [vmem:[%s4825_s3 + $0x180] sm:$0xff] }
 0x183   : > { %3468 = vmatpush1.bf16.msra.mxu0 %v3467_v48  ;;  %1843 = vmatprep.mubr.f32.mxu0 %v522_v53  ;;  %v3501_v48 = vpack.c.bf16 %v1048_v37, %v1046_v36  ;;  %v1998_v53 = vld [vmem:[%s4825_s3 + $0x68] sm:$0xff]  ;;  %v2027_v37 = vld [vmem:[%s4825_s3 + $0x150] sm:$0xff] }
 0x184   : > { %3470 = vmatprep.subr.bf16.mxu0 %v3469_v50  ;;  %v3513_v50 = vpack.c.bf16 %v1995_v47, %v1992_v46  ;;  %3512 = vmatpush1.bf16.msra.mxu1 %v3511_v49  ;;  %v2036_v46 = vld [vmem:[%s4825_s3 + $0x198] sm:$0xff]  ;;  %v2043_v49 = vld [vmem:[%s4825_s3 + $0x1d0] sm:$0xff] }
 0x185   : > { %v508_v47 = vld [vmem:[%s4181_s13 + $0x2f8] sm:$0xff] }
 0x186   : > { %1844 = vmatmul.mubr.f32.gmra.mrb[12].mxu0 %v521_v57  ;;  %v3515_v57 = vpack.c.bf16 %v1994_v52, %v1991_v51  ;;  %3514 = vmatprep.subr.bf16.mxu1 %v3513_v50  ;;  %v3543_v50 = vpack.c.bf16 %v2036_v46, %v2033_v45  ;;  %v507_v51 = vld [vmem:[%s4181_s13 + $0x2f0] sm:$0xff] }
 0x187   : > { %3472 = vmatpush1.bf16.msra.mxu0 %v3471_v56  ;;  %1849 = vmatprep.mubr.f32.mxu0 %v538_v61  ;;  %v2001_v56 = vld [vmem:[%s4825_s3 + $0x80] sm:$0xff] }
 0x188   : > { %3474 = vmatprep.subr.bf16.mxu0 %v3473_v58  ;;  %v3503_v58 = vpack.c.bf16 %v1047_v39, %v1045_v38  ;;  %v3517_v60 = vpack.c.bf16 %v2001_v56, %v1998_v53  ;;  %v1997_v61 = vld [vmem:[%s4825_s3 + $0x60] sm:$0xff]  ;;  %3516 = vmatpush1.bf16.msra.mxu1 %v3515_v57  ;;  %v2030_v38 = vld [vmem:[%s4825_s3 + $0x168] sm:$0xff]  ;;  %v492_v39 = vld [vmem:[%s4181_s13 + $0x278] sm:$0xff] }
 0x189   : > { %v3519_v3 = vpack.c.bf16 %v2000_v62, %v1997_v61  ;;  %v3539_v42 = vpack.c.bf16 %v2030_v38, %v2027_v37  ;;  %v2039_v53 = vld [vmem:[%s4825_s3 + $0x1b0] sm:$0xff]  ;;  %v2046_v56 = vld [vmem:[%s4825_s3 + $0x1e8] sm:$0xff]  ;;  %v2049_v57 = vld [vmem:[%s4825_s3 + $0x200] sm:$0xff] }
 0x18a   : > { %1850 = vmatmul.mubr.f32.gmra.mrb[14].mxu0 %v537_v1  ;;  %v2004_v1 = vld [vmem:[%s4825_s3 + $0x98] sm:$0xff]  ;;  %3518 = vmatprep.subr.bf16.mxu1 %v3517_v60  ;;  %v3549_v60 = vpack.c.bf16 %v2049_v57, %v2046_v56  ;;  %v2045_v61 = vld [vmem:[%s4825_s3 + $0x1e0] sm:$0xff] }
 0x18b   : > { %3476 = vmatpush1.bf16.msra.mxu0 %v3475_v0  ;;  %1920 = vmatprep.mubr.f32.mxu0 %v428_v5  ;;  %v1051_v0 = vld [vmem:[#allocation5 + $0xff0] sm:$0xff]  ;;  %v2048_v62 = vld [vmem:[%s4825_s3 + $0x1f8] sm:$0xff] }
 0x18c   : > { %3478 = vmatprep.subr.bf16.mxu0 %v3477_v2  ;;  %v2007_v2 = vld [vmem:[%s4825_s3 + $0xb0] sm:$0xff]  ;;  %v3507_v4 = vpack.c.bf16 %v1051_v0, %v1049_v59  ;;  %3520 = vmatpush1.bf16.msra.mxu1 %v3519_v3  ;;  %v2052_v0 = vld [vmem:[%s4825_s3 + $0x218] sm:$0xff] }
 0x18d   : > { %v3521_v5 = vpack.c.bf16 %v2007_v2, %v2004_v1  ;;  %v523_v59 = vld [vmem:[%s4181_s13 + $0x370] sm:$0xff]  ;;  %v3551_v2 = vpack.c.bf16 %v2048_v62, %v2045_v61 }
 0x18e   : > { %v2055_v1 = vld [vmem:[%s4825_s3 + $0x230] sm:$0xff] }
 0x18f   : > { %3480 = vmatpush1.bf16.msra.mxu0 %v3479_v8  ;;  %v2010_v8 = vld [vmem:[%s4825_s3 + $0xc8] sm:$0xff]  ;;  %3522 = vmatprep.subr.bf16.mxu1 %v3521_v5  ;;  %v539_v3 = vld [vmem:[%s4181_s13 + $0x3f0] sm:$0xff] }
 0x190   : > { %3482 = vmatprep.subr.bf16.mxu0 %v3481_v9  ;;  %v2013_v9 = vld [vmem:[%s4825_s3 + $0xe0] sm:$0xff]  ;;  %3524 = vmatpush1.bf16.msra.mxu1 %v3523_v10  ;;  %v2051_v5 = vld [vmem:[%s4825_s3 + $0x210] sm:$0xff] }
 0x191   : > { %v3525_v12 = vpack.c.bf16 %v2013_v9, %v2010_v8  ;;  %v2061_v8 = vld [vmem:[%s4825_s3 + $0x260] sm:$0xff]  ;;  %v3555_v9 = vpack.c.bf16 %v2054_v6, %v2051_v5 }
 0x192   : > { %v3557_v10 = vpack.c.bf16 %v2061_v8, %v2058_v7  ;;  %v1993_v7 = vld [vmem:[%s4825_s3 + $0x40] sm:$0xff]  ;;  %v1996_v8 = vld [vmem:[%s4825_s3 + $0x58] sm:$0xff] }
 0x193   : > { %3484 = vmatpush1.bf16.msra.mxu0 %v3483_v14  ;;  %v2012_v14 = vld [vmem:[%s4825_s3 + $0xd8] sm:$0xff]  ;;  %3526 = vmatprep.subr.bf16.mxu1 %v3525_v12 }
 0x194   : > { %3486 = vmatprep.subr.bf16.mxu0 %v3485_v15  ;;  %v444_v15 = vld [vmem:[%s4181_s13 + $0xf8] sm:$0xff]  ;;  %v3527_v18 = vpack.c.bf16 %v2012_v14, %v2009_v13  ;;  %v2067_v14 = vld [vmem:[%s4825_s3 + $0x290] sm:$0xff] }
 0x195   : > { %v2060_v12 = vld [vmem:[%s4825_s3 + $0x258] sm:$0xff] }
 0x196   : > { %3528 = vmatpush1.bf16.msra.mxu1 %v3527_v18  ;;  %v2064_v13 = vld [vmem:[%s4825_s3 + $0x278] sm:$0xff]  ;;  %v2066_v18 = vld [vmem:[%s4825_s3 + $0x288] sm:$0xff] }
 0x197   : > { %3488 = vmatpush1.bf16.msra.mxu0 %v3487_v20  ;;  %v3529_v20 = vpack.c.bf16 %v2019_v17, %v2016_v16  ;;  %v3561_v16 = vpack.c.bf16 %v2067_v14, %v2064_v13  ;;  %v2063_v17 = vld [vmem:[%s4825_s3 + $0x270] sm:$0xff] }
 0x198   : > { %3490 = vmatprep.subr.bf16.mxu0 %v3489_v21  ;;  %v2015_v21 = vld [vmem:[%s4825_s3 + $0xf0] sm:$0xff] }
 0x199   : > { %3530 = vmatprep.subr.bf16.mxu1 %v3529_v20  ;;  %v2073_v20 = vld [vmem:[%s4825_s3 + $0x2c0] sm:$0xff] }
 0x19b   : > { %3492 = vmatpush1.bf16.msra.mxu0 %v3491_v26  ;;  %v3531_v26 = vpack.c.bf16 %v2018_v22, %v2015_v21  ;;  %v3563_v21 = vpack.c.bf16 %v2066_v18, %v2063_v17 }
 0x19c   : > { %3494 = vmatprep.subr.bf16.mxu0 %v3493_v27  ;;  %v459_v27 = vld [vmem:[%s4181_s13 + $0x170] sm:$0xff] }
 0x19d   : > { %3532 = vmatpush1.bf16.msra.mxu1 %v3531_v26  ;;  %v2076_v26 = vld [vmem:[%s4825_s3 + $0x2d8] sm:$0xff] }
 0x19e   : > { %3534 = vmatprep.subr.bf16.mxu1 %v3533_v28 }
 0x19f   : > { %3496 = vmatpush1.bf16.msra.mxu0 %v3495_v32  ;;  %v2028_v32 = vld [vmem:[%s4825_s3 + $0x158] sm:$0xff] }
 0x1a0   : > { %3498 = vmatprep.subr.bf16.mxu0 %v3497_v33  ;;  %v2031_v33 = vld [vmem:[%s4825_s3 + $0x170] sm:$0xff] }
 0x1a1   : > { %v3537_v36 = vpack.c.bf16 %v2031_v33, %v2028_v32  ;;  %3536 = vmatpush1.bf16.msra.mxu1 %v3535_v34  ;;  %v2035_v34 = vld [vmem:[%s4825_s3 + $0x190] sm:$0xff] }
 0x1a3   : > { %3500 = vmatpush1.bf16.msra.mxu0 %v3499_v43  ;;  %v491_v43 = vld [vmem:[%s4181_s13 + $0x270] sm:$0xff]  ;;  %3538 = vmatprep.subr.bf16.mxu1 %v3537_v36 }
 0x1a4   : > { %3502 = vmatprep.subr.bf16.mxu0 %v3501_v48  ;;  %v2040_v48 = vld [vmem:[%s4825_s3 + $0x1b8] sm:$0xff] }
 0x1a5   : > { %3540 = vmatpush1.bf16.msra.mxu1 %v3539_v42  ;;  %v3545_v52 = vpack.c.bf16 %v2043_v49, %v2040_v48 }
 0x1a6   : > { %3542 = vmatprep.subr.bf16.mxu1 %v3541_v44 }
 0x1a7   : > { %3504 = vmatpush1.bf16.msra.mxu0 %v3503_v58  ;;  %v3547_v58 = vpack.c.bf16 %v2042_v54, %v2039_v53  ;;  %v1053_v54 = vld [vmem:[#allocation7] sm:$0x3] }
 0x1a8   : > { %3506 = vmatprep.subr.bf16.mxu0 %v3505_v63  ;;  %v540_v63 = vld [vmem:[%s4181_s13 + $0x3f8] sm:$0xff]  ;;  %s2874_s13 = sshll.u32 %s4850_s27, 7 }
 0x1a9   : > { %3544 = vmatpush1.bf16.msra.mxu1 %v3543_v50  ;;  %s4567_s9 = scalar_lea.vmem %s4827_s5, %s2874_s13  ;;  %s4786_s11 = scalar_lea.vmem %s4829_s7, %s2874_s13 }
 0x1aa   : > { %3546 = vmatprep.subr.bf16.mxu1 %v3545_v52 }
 0x1ab   : > { %3508 = vmatpush1.bf16.msra.mxu0 %v3507_v4  ;;  %v3553_v4 = vpack.c.bf16 %v2055_v1, %v2052_v0  ;;  %v2044_v0 = vld [vmem:[%s4825_s3 + $0x1d8] sm:$0xff] }
 0x1ad   : > { %3548 = vmatpush1.bf16.msra.mxu1 %v3547_v58 }
 0x1ae   : > { %1921 = vmatmul.mubr.f32.vlgmr.msra.gmra.mrb[0].mxu0 %v427_v11  ;;  %3550 = vmatprep.subr.bf16.mxu1 %v3549_v60  ;;  %v2057_v11 = vld [vmem:[%s4825_s3 + $0x240] sm:$0xff]  ;;  %v1990_v60 = vld [vmem:[%s4825_s3 + $0x28] sm:$0xff] }
 0x1af   : > { %1926 = vmatprep.mubr.f32.mxu0 %v444_v15  ;;  %v3559_v15 = vpack.c.bf16 %v2060_v12, %v2057_v11  ;;  %v2047_v11 = vld [vmem:[%s4825_s3 + $0x1f0] sm:$0xff]  ;;  %v2050_v12 = vld [vmem:[%s4825_s3 + $0x208] sm:$0xff] }
 0x1b0   : > { %v3581_v18 = vpack.c.bf16 %v2050_v12, %v2047_v11 }
 0x1b1   : > { %3552 = vmatpush1.bf16.msra.mxu1 %v3551_v2 }
 0x1b2   : > { %1927 = vmatmul.mubr.f32.gmra.mrb[2].mxu0 %v443_v19  ;;  %3554 = vmatprep.subr.bf16.mxu1 %v3553_v4  ;;  %v2070_v19 = vld [vmem:[%s4825_s3 + $0x2a8] sm:$0xff] }
 0x1b3   : > { %1932 = vmatprep.mubr.f32.mxu0 %v460_v23  ;;  %v3565_v22 = vpack.c.bf16 %v2073_v20, %v2070_v19  ;;  %v2069_v23 = vld [vmem:[%s4825_s3 + $0x2a0] sm:$0xff]  ;;  %v1999_v19 = vld [vmem:[%s4825_s3 + $0x70] sm:$0xff]  ;;  %v2002_v20 = vld [vmem:[%s4825_s3 + $0x88] sm:$0xff] }
 0x1b4   : > { %v3567_v25 = vpack.c.bf16 %v2072_v24, %v2069_v23  ;;  %v2053_v23 = vld [vmem:[%s4825_s3 + $0x220] sm:$0xff]  ;;  %v2056_v24 = vld [vmem:[%s4825_s3 + $0x238] sm:$0xff] }
 0x1b5   : > { %3556 = vmatpush1.bf16.msra.mxu1 %v3555_v9 }
 0x1b6   : > { %1933 = vmatmul.mubr.f32.gmra.mrb[4].mxu0 %v459_v27  ;;  %3558 = vmatprep.subr.bf16.mxu1 %v3557_v10  ;;  %v2079_v27 = vld [vmem:[%s4825_s3 + $0x2f0] sm:$0xff] }
 0x1b7   : > { %1938 = vmatprep.mubr.f32.mxu0 %v476_v31  ;;  %v3569_v29 = vpack.c.bf16 %v2079_v27, %v2076_v26  ;;  %v2078_v31 = vld [vmem:[%s4825_s3 + $0x2e8] sm:$0xff] }
 0x1b8   : > { %v3571_v33 = vpack.c.bf16 %v2078_v31, %v2075_v30  ;;  %v3585_v30 = vpack.c.bf16 %v2056_v24, %v2053_v23  ;;  %v2005_v31 = vld [vmem:[%s4825_s3 + $0xa0] sm:$0xff] }
 0x1b9   : > { %3560 = vmatpush1.bf16.msra.mxu1 %v3559_v15 }
 0x1ba   : > { %1939 = vmatmul.mubr.f32.gmra.mrb[6].mxu0 %v475_v35  ;;  %3562 = vmatprep.subr.bf16.mxu1 %v3561_v16  ;;  %v2038_v35 = vld [vmem:[%s4825_s3 + $0x1a8] sm:$0xff]  ;;  %v3579_v16 = vpack.c.bf16 %v1996_v8, %v1993_v7 }
 0x1bb   : > { %1944 = vmatprep.mubr.f32.mxu0 %v492_v39  ;;  %v3573_v37 = vpack.c.bf16 %v2038_v35, %v2035_v34  ;;  %v2059_v35 = vld [vmem:[%s4825_s3 + $0x250] sm:$0xff]  ;;  %v2074_v8 = vld [vmem:[%s4825_s3 + $0x2c8] sm:$0xff] }
 0x1bd   : > { %3564 = vmatpush1.bf16.msra.mxu1 %v3563_v21 }
 0x1be   : > { %1945 = vmatmul.mubr.f32.gmra.mrb[8].mxu0 %v491_v43  ;;  %3566 = vmatprep.subr.bf16.mxu1 %v3565_v22 }
 0x1bf   : > { %1950 = vmatprep.mubr.f32.mxu0 %v508_v47 }
 0x1c1   : > { %3568 = vmatpush1.bf16.msra.mxu1 %v3567_v25 }
 0x1c2   : > { %1951 = vmatmul.mubr.f32.gmra.mrb[10].mxu0 %v507_v51  ;;  %3570 = vmatprep.subr.bf16.mxu1 %v3569_v29  ;;  %v1055_v51 = vlaneseq }
 0x1c3   : > { %1956 = vmatprep.mubr.f32.mxu0 %v524_v55 }
 0x1c4   : > { %v4537_v52 = vshrl.u32 %v1055_v51, 7  ;;  %v2011_v51 = vld [vmem:[%s4825_s3 + $0xd0] sm:$0xff] }
 0x1c5   : > { %3572 = vmatpush1.bf16.msra.mxu1 %v3571_v33 }
 0x1c6   : > { %1957 = vmatmul.mubr.f32.gmra.mrb[12].mxu0 %v523_v59  ;;  %3574 = vmatprep.subr.bf16.mxu1 %v3573_v37  ;;  %v1057_v53 = vsub.s32 0, %v4537_v52  ;;  %v1061_v55 = vsub.s32 1, %v4537_v52  ;;  %v1987_v59 = vld [vmem:[%s4825_s3 + $0x10] sm:$0xff] }
 0x1c7   : > { %1962 = vmatprep.mubr.f32.mxu0 %v540_v63  ;;  %v2041_v63 = vld [vmem:[%s4825_s3 + $0x1c0] sm:$0xff]  ;;  %v3575_v4 = vpack.c.bf16 %v1990_v60, %v1987_v59  ;;  %v2068_v60 = vld [vmem:[%s4825_s3 + $0x298] sm:$0xff] }
 0x1c8   : > { %v4547_v56 = vrot.slane %v1053_v54, %v1057_v53  ;;  %v4551_v57 = vrot.slane %v1053_v54, %v1061_v55  ;;  %v3577_v6 = vpack.c.bf16 %v2044_v0, %v2041_v63  ;;  %v2014_v54 = vld [vmem:[%s4825_s3 + $0xe8] sm:$0xff] }
 0x1c9   : > { %v3591_v63 = vpack.c.bf16 %v2014_v54, %v2011_v51 }
 0x1ca   : > { %1963 = vmatmul.mubr.f32.gmra.mrb[14].mxu0 %v539_v3 }
 0x200   : > { %v1357_v28 = vpop.f32.mrb[0].mxu1 }
 0x201   : > { %v1359_v32 = vpop.f32.mrb[1].mxu1  ;;  %v3621_v58 = vadd.f32 %v1357_v28, %v4547_v56  ;;  %v3583_v28 = vpack.c.bf16 %v2002_v20, %v1999_v19  ;;  %v2080_v20 = vld [vmem:[%s4825_s3 + $0x2f8] sm:$0xff] }
 0x202   : > { %v3623_v61 = vadd.f32 %v1359_v32, %v4551_v57  ;;  %v2008_v32 = vld [vmem:[%s4825_s3 + $0xb8] sm:$0xff] }
 0x204   : > { %v1363_v36 = vpop.f32.mrb[2].mxu1 }
 0x205   : > { %v1365_v38 = vpop.f32.mrb[3].mxu1  ;;  %v3625_v5 = vadd.f32 %v1363_v36, %v4547_v56  ;;  %v2062_v36 = vld [vmem:[%s4825_s3 + $0x268] sm:$0xff] }
 0x206   : > { %v3627_v9 = vadd.f32 %v1365_v38, %v4551_v57 }
 0x208   : > { %v1369_v39 = vpop.f32.mrb[4].mxu1 }
 0x209   : > { %v1371_v40 = vpop.f32.mrb[5].mxu1  ;;  %v3629_v17 = vadd.f32 %v1369_v39, %v4547_v56 }
 0x20a   : > { %v3631_v21 = vadd.f32 %v1371_v40, %v4551_v57  ;;  %v3587_v40 = vpack.c.bf16 %v2008_v32, %v2005_v31 }
 0x20c   : > { %v4517_v41 = vpop.f32.mrb[6].mxu1 }
 0x20d   : > { %v4519_v42 = vpop.f32.mrb[7].mxu1  ;;  %v3633_v29 = vadd.f32 %v4517_v41, %v4547_v56 }
 0x20e   : > { %v3635_v33 = vadd.f32 %v4519_v42, %v4551_v57  ;;  %v3589_v42 = vpack.c.bf16 %v2062_v36, %v2059_v35 }
 0x210   : > { %v4521_v43 = vpop.f32.mrb[8].mxu1 }
 0x211   : > { %v4523_v44 = vpop.f32.mrb[9].mxu1  ;;  %v3637_v41 = vadd.f32 %v4521_v43, %v4547_v56  ;;  %v2065_v43 = vld [vmem:[%s4825_s3 + $0x280] sm:$0xff] }
 0x214   : > { %v4525_v45 = vpop.f32.mrb[10].mxu1 }
 0x215   : > { %v4527_v46 = vpop.f32.mrb[11].mxu1  ;;  %v3641_v0 = vadd.f32 %v4525_v45, %v4547_v56  ;;  %v2071_v45 = vld [vmem:[%s4825_s3 + $0x2b0] sm:$0xff] }
 0x218   : > { %v4529_v47 = vpop.f32.mrb[12].mxu1 }
 0x219   : > { %v4531_v48 = vpop.f32.mrb[13].mxu1  ;;  %v3645_v12 = vadd.f32 %v4529_v47, %v4547_v56  ;;  %v2077_v47 = vld [vmem:[%s4825_s3 + $0x2e0] sm:$0xff] }
 0x21c   : > { %v4533_v49 = vpop.f32.mrb[14].mxu1 }
 0x21d   : > { %v4535_v50 = vpop.f32.mrb[15].mxu1 }
 0x281   : > { %v1922_v62 = vpop.f32.mrb[0].mxu0 }
 0x282   : > { %v4575_v1 = vadd.f32 %v3621_v58, %v1922_v62  ;;  %v1924_v2 = vpop.f32.mrb[1].mxu0  ;;  %v3639_v58 = vadd.f32 %v4523_v44, %v4551_v57 }
 0x283   : > { %v4577_v3 = vadd.f32 %v3623_v61, %v1924_v2  ;;  %v3593_v2 = vpack.c.bf16 %v2068_v60, %v2065_v43 }
 0x284   : > { %1969 = vst [vmem:[%s4567_s9] sm:$0xff] %v4575_v1 }
 0x285   : > { %1970 = vst [vmem:[%s4567_s9 + $0x8] sm:$0xff] %v4577_v3  ;;  %v1928_v10 = vpop.f32.mrb[2].mxu0  ;;  %2162 = vmatprep.mubr.f32.mxu1 %v4577_v3 }
 0x286   : > { %v4598_v13 = vadd.f32 %v3625_v5, %v1928_v10  ;;  %v1930_v14 = vpop.f32.mrb[3].mxu0  ;;  %2163 = vmatmul.mubr.f32.vlgmr.msra.gmra.mrb[16].mxu1 %v4575_v1  ;;  %v2020_v5 = vld [vmem:[%s4825_s3 + $0x118] sm:$0xff] }
 0x287   : > { %v4601_v15 = vadd.f32 %v3627_v9, %v1930_v14  ;;  %3576 = vmatpush3.bf16.msra.mxu1 %v3575_v4  ;;  %v2017_v4 = vld [vmem:[%s4825_s3 + $0x100] sm:$0xff]  ;;  %v3597_v14 = vpack.c.bf16 %v2074_v8, %v2071_v45  ;;  %v2093_v8 = vsub.s32 2, %v4537_v52 }
 0x288   : > { %1971 = vst [vmem:[%s4567_s9 + $0x10] sm:$0xff] %v4598_v13  ;;  %3578 = vmatprep.subr.bf16.mxu1 %v3577_v6  ;;  %v3643_v6 = vadd.f32 %v4527_v46, %v4551_v57  ;;  %v3595_v46 = vpack.c.bf16 %v2020_v5, %v2017_v4 }
 0x289   : > { %1972 = vst [vmem:[%s4567_s9 + $0x18] sm:$0xff] %v4601_v15  ;;  %v1934_v22 = vpop.f32.mrb[4].mxu0  ;;  %2168 = vmatprep.mubr.f32.mxu1 %v4601_v15 }
 0x28a   : > { %v4622_v25 = vadd.f32 %v3629_v17, %v1934_v22  ;;  %v1936_v26 = vpop.f32.mrb[5].mxu0  ;;  %2169 = vmatmul.mubr.f32.gmra.mrb[18].mxu1 %v4598_v13  ;;  %v2026_v17 = vld [vmem:[%s4825_s3 + $0x148] sm:$0xff] }
 0x28b   : > { %v4625_v27 = vadd.f32 %v3631_v21, %v1936_v26  ;;  %3580 = vmatpush3.bf16.msra.mxu1 %v3579_v16  ;;  %v2023_v16 = vld [vmem:[%s4825_s3 + $0x130] sm:$0xff]  ;;  %v3601_v26 = vpack.c.bf16 %v2080_v20, %v2077_v47 }
 0x28c   : > { %1973 = vst [vmem:[%s4567_s9 + $0x20] sm:$0xff] %v4622_v25  ;;  %3582 = vmatprep.subr.bf16.mxu1 %v3581_v18  ;;  %v3647_v18 = vadd.f32 %v4531_v48, %v4551_v57  ;;  %v3599_v24 = vpack.c.bf16 %v2026_v17, %v2023_v16  ;;  %v3649_v48 = vadd.f32 %v4533_v49, %v4547_v56 }
 0x28d   : > { %1974 = vst [vmem:[%s4567_s9 + $0x28] sm:$0xff] %v4625_v27  ;;  %v1940_v34 = vpop.f32.mrb[6].mxu0  ;;  %2174 = vmatprep.mubr.f32.mxu1 %v4625_v27 }
 0x28e   : > { %v4648_v37 = vadd.f32 %v3633_v29, %v1940_v34  ;;  %v1942_v38 = vpop.f32.mrb[7].mxu0  ;;  %2175 = vmatmul.mubr.f32.gmra.mrb[20].mxu1 %v4622_v25  ;;  %v2032_v29 = vld [vmem:[%s4825_s3 + $0x178] sm:$0xff] }
 0x28f   : > { %v4651_v39 = vadd.f32 %v3635_v33, %v1942_v38  ;;  %3584 = vmatpush3.bf16.msra.mxu1 %v3583_v28  ;;  %v2029_v28 = vld [vmem:[%s4825_s3 + $0x160] sm:$0xff] }
 0x290   : > { %1975 = vst [vmem:[%s4567_s9 + $0x30] sm:$0xff] %v4648_v37  ;;  %3586 = vmatprep.subr.bf16.mxu1 %v3585_v30  ;;  %v3651_v30 = vadd.f32 %v4535_v50, %v4551_v57  ;;  %v3603_v33 = vpack.c.bf16 %v2032_v29, %v2029_v28  ;;  %v2081_v50 = vld [vmem:[%s4826_s4] sm:$0x7] }
 0x291   : > { %1976 = vst [vmem:[%s4567_s9 + $0x38] sm:$0xff] %v4651_v39  ;;  %v1946_v59 = vpop.f32.mrb[8].mxu0  ;;  %2180 = vmatprep.mubr.f32.mxu1 %v4651_v39  ;;  %v2086_v57 = vrot.slane %v2081_v50, %v1057_v53 }
 0x292   : > { %v4674_v61 = vadd.f32 %v3637_v41, %v1946_v59  ;;  %v1948_v62 = vpop.f32.mrb[9].mxu0  ;;  %2181 = vmatmul.mubr.f32.gmra.mrb[22].mxu1 %v4648_v37 }
 0x293   : > { %v4677_v44 = vadd.f32 %v3639_v58, %v1948_v62  ;;  %3588 = vmatpush3.bf16.msra.mxu1 %v3587_v40 }
 0x294   : > { %1977 = vst [vmem:[%s4567_s9 + $0x40] sm:$0xff] %v4674_v61  ;;  %3590 = vmatprep.subr.bf16.mxu1 %v3589_v42 }
 0x295   : > { %1978 = vst [vmem:[%s4567_s9 + $0x48] sm:$0xff] %v4677_v44  ;;  %v1952_v7 = vpop.f32.mrb[10].mxu0  ;;  %2186 = vmatprep.mubr.f32.mxu1 %v4677_v44 }
 0x296   : > { %v3642_v9 = vadd.f32 %v3641_v0, %v1952_v7  ;;  %v1954_v10 = vpop.f32.mrb[11].mxu0  ;;  %2187 = vmatmul.mubr.f32.gmra.mrb[24].mxu1 %v4674_v61 }
 0x297   : > { %v3644_v11 = vadd.f32 %v3643_v6, %v1954_v10  ;;  %3592 = vmatpush3.bf16.msra.mxu1 %v3591_v63 }
 0x298   : > { %1979 = vst [vmem:[%s4567_s9 + $0x50] sm:$0xff] %v3642_v9  ;;  %3594 = vmatprep.subr.bf16.mxu1 %v3593_v2 }
 0x299   : > { %1980 = vst [vmem:[%s4567_s9 + $0x58] sm:$0xff] %v3644_v11  ;;  %v1958_v19 = vpop.f32.mrb[12].mxu0  ;;  %2192 = vmatprep.mubr.f32.mxu1 %v3644_v11 }
 0x29a   : > { %v3646_v21 = vadd.f32 %v3645_v12, %v1958_v19  ;;  %v1960_v22 = vpop.f32.mrb[13].mxu0  ;;  %2193 = vmatmul.mubr.f32.gmra.mrb[26].mxu1 %v3642_v9 }
 0x29b   : > { %v3648_v23 = vadd.f32 %v3647_v18, %v1960_v22  ;;  %3596 = vmatpush3.bf16.msra.mxu1 %v3595_v46 }
 0x29c   : > { %1981 = vst [vmem:[%s4567_s9 + $0x60] sm:$0xff] %v3646_v21  ;;  %3598 = vmatprep.subr.bf16.mxu1 %v3597_v14 }
 0x29d   : > { %1982 = vst [vmem:[%s4567_s9 + $0x68] sm:$0xff] %v3648_v23  ;;  %v1964_v31 = vpop.f32.mrb[14].mxu0  ;;  %2198 = vmatprep.mubr.f32.mxu1 %v3648_v23 }
 0x29e   : > { %v3650_v49 = vadd.f32 %v3649_v48, %v1964_v31  ;;  %v1966_v56 = vpop.f32.mrb[15].mxu0  ;;  %2199 = vmatmul.mubr.f32.gmra.mrb[28].mxu1 %v3646_v21 }
 0x29f   : > { %v3652_v32 = vadd.f32 %v3651_v30, %v1966_v56  ;;  %3600 = vmatpush3.bf16.msra.mxu1 %v3599_v24 }
 0x2a0   : > { %1983 = vst [vmem:[%s4567_s9 + $0x70] sm:$0xff] %v3650_v49  ;;  %3602 = vmatprep.subr.bf16.mxu1 %v3601_v26 }
 0x2a1   : > { %1984 = vst [vmem:[%s4567_s9 + $0x78] sm:$0xff] %v3652_v32  ;;  %2204 = vmatprep.mubr.f32.mxu1 %v3652_v32 }
 0x2a2   : > { %2205 = vmatmul.mubr.f32.gmra.mrb[30].mxu1 %v3650_v49 }
 0x2a3   : > { %3604 = vmatpush3.bf16.msra.mxu1 %v3603_v33  ;;  %2275 = vmatprep.mubr.f32.mxu1 %v4577_v3 }
 0x2a6   : > { %2276 = vmatmul.mubr.f32.vlgmr.msra.gmra.mrb[32].mxu1 %v4575_v1  ;;  %v2090_v1 = vrot.slane %v2081_v50, %v1061_v55 }
 0x2a7   : > { %2280 = vmatprep.mubr.f32.mxu1 %v4601_v15 }
 0x2aa   : > { %2281 = vmatmul.mubr.f32.gmra.mrb[34].mxu1 %v4598_v13 }
 0x2ab   : > { %2285 = vmatprep.mubr.f32.mxu1 %v4625_v27 }
 0x2ae   : > { %2286 = vmatmul.mubr.f32.gmra.mrb[36].mxu1 %v4622_v25 }
 0x2af   : > { %2290 = vmatprep.mubr.f32.mxu1 %v4651_v39 }
 0x2b2   : > { %2291 = vmatmul.mubr.f32.gmra.mrb[38].mxu1 %v4648_v37 }
 0x2b3   : > { %2295 = vmatprep.mubr.f32.mxu1 %v4677_v44 }
 0x2b6   : > { %2296 = vmatmul.mubr.f32.gmra.mrb[40].mxu1 %v4674_v61 }
 0x2b7   : > { %2300 = vmatprep.mubr.f32.mxu1 %v3644_v11  ;;  %v2094_v11 = vrot.slane %v2081_v50, %v2093_v8 }
 0x2ba   : > { %2301 = vmatmul.mubr.f32.gmra.mrb[42].mxu1 %v3642_v9 }
 0x2bb   : > { %2305 = vmatprep.mubr.f32.mxu1 %v3648_v23 }
 0x2be   : > { %2306 = vmatmul.mubr.f32.gmra.mrb[44].mxu1 %v3646_v21 }
 0x2bf   : > { %2310 = vmatprep.mubr.f32.mxu1 %v3652_v32 }
 0x2c2   : > { %2311 = vmatmul.mubr.f32.gmra.mrb[46].mxu1 %v3650_v49 }
 0x359   : > { %v2164_v3 = vpop.f32.mrb[16].mxu1 }
 0x35a   : > { %v2165_v13 = vadd.f32 %v2164_v3, %v2086_v57  ;;  %v2166_v15 = vpop.f32.mrb[17].mxu1 }
 0x35b   : > { %v2167_v25 = vadd.f32 %v2166_v15, %v2090_v1 }
 0x35c   : > { %2316 = vst [vmem:[%s4754_s23] sm:$0xff] %v2165_v13 }
 0x35d   : > { %v2170_v27 = vpop.f32.mrb[18].mxu1  ;;  %2340 = vxpose.xlu0.b32.start [1/8] (short) %v2167_v25, 128 }
 0x35e   : > { %v2171_v53 = vadd.f32 %v2170_v27, %v2086_v57  ;;  %v2172_v34 = vpop.f32.mrb[19].mxu1 }
 0x35f   : > { %v2173_v35 = vadd.f32 %v2172_v34, %v2090_v1 }
 0x360   : > { %2317 = vst [vmem:[%s4754_s23 + $0x8] sm:$0xff] %v2171_v53 }
 0x361   : > { %v2176_v55 = vpop.f32.mrb[20].mxu1  ;;  %2341 = vxpose.xlu0.b32.cont [2/8] (short) %v2173_v35, 128 }
 0x362   : > { %v2177_v36 = vadd.f32 %v2176_v55, %v2086_v57  ;;  %v2178_v37 = vpop.f32.mrb[21].mxu1 }
 0x363   : > { %v2179_v38 = vadd.f32 %v2178_v37, %v2090_v1 }
 0x364   : > { %2318 = vst [vmem:[%s4754_s23 + $0x10] sm:$0xff] %v2177_v36 }
 0x365   : > { %v2182_v39 = vpop.f32.mrb[22].mxu1  ;;  %2342 = vxpose.xlu0.b32.cont [3/8] (short) %v2179_v38, 128 }
 0x366   : > { %v2183_v40 = vadd.f32 %v2182_v39, %v2086_v57  ;;  %v2184_v41 = vpop.f32.mrb[23].mxu1 }
 0x367   : > { %v2185_v42 = vadd.f32 %v2184_v41, %v2090_v1 }
 0x368   : > { %2319 = vst [vmem:[%s4754_s23 + $0x18] sm:$0xff] %v2183_v40 }
 0x369   : > { %v2188_v51 = vpop.f32.mrb[24].mxu1  ;;  %2343 = vxpose.xlu0.b32.cont [4/8] (short) %v2185_v42, 128 }
 0x36a   : > { %v2189_v54 = vadd.f32 %v2188_v51, %v2086_v57  ;;  %v2190_v58 = vpop.f32.mrb[25].mxu1 }
 0x36b   : > { %v2191_v59 = vadd.f32 %v2190_v58, %v2090_v1 }
 0x36c   : > { %2320 = vst [vmem:[%s4754_s23 + $0x20] sm:$0xff] %v2189_v54 }
 0x36d   : > { %v2194_v43 = vpop.f32.mrb[26].mxu1  ;;  %2344 = vxpose.xlu0.b32.cont [5/8] (short) %v2191_v59, 128 }
 0x36e   : > { %v2195_v60 = vadd.f32 %v2194_v43, %v2086_v57  ;;  %v2196_v61 = vpop.f32.mrb[27].mxu1 }
 0x36f   : > { %v2197_v62 = vadd.f32 %v2196_v61, %v2090_v1 }
 0x370   : > { %2321 = vst [vmem:[%s4754_s23 + $0x28] sm:$0xff] %v2195_v60 }
 0x371   : > { %v2200_v44 = vpop.f32.mrb[28].mxu1  ;;  %2345 = vxpose.xlu0.b32.cont [6/8] (short) %v2197_v62, 128 }
 0x372   : > { %v2201_v63 = vadd.f32 %v2200_v44, %v2086_v57  ;;  %v2202_v0 = vpop.f32.mrb[29].mxu1 }
 0x373   : > { %v2203_v2 = vadd.f32 %v2202_v0, %v2090_v1 }
 0x374   : > { %2322 = vst [vmem:[%s4754_s23 + $0x30] sm:$0xff] %v2201_v63 }
 0x375   : > { %2346 = vxpose.xlu0.b32.cont [7/8] (short) %v2203_v2, 128  ;;  %v2206_v4 = vpop.f32.mrb[30].mxu1 }
 0x376   : > { %v2207_v5 = vadd.f32 %v2206_v4, %v2086_v57  ;;  %v2208_v6 = vpop.f32.mrb[31].mxu1 }
 0x377   : > { %v2209_v7 = vadd.f32 %v2208_v6, %v2090_v1 }
 0x378   : > { %2323 = vst [vmem:[%s4754_s23 + $0x38] sm:$0xff] %v2207_v5 }
 0x379   : > { %v2909_v45 = vpop.f32.mrb[32].mxu1  ;;  %2347 = vxpose.xlu0.b32.end [8/8] (short) %v2209_v7, 128 }
 0x37a   : > { %v2910_v9 = vpop.f32.mrb[33].mxu1 }
 0x37b   : > { %v2911_v10 = vadd.f32 %v2910_v9, %v2909_v45 }
 0x37d   : > { %v2912_v46 = vpop.f32.mrb[34].mxu1  ;;  %v2278_v16 = vadd.f32 %v2911_v10, %v2094_v11 }
 0x37e   : > { %v2913_v12 = vpop.f32.mrb[35].mxu1 }
 0x37f   : > { %v2914_v14 = vadd.f32 %v2913_v12, %v2912_v46 }
 0x381   : > { %v2283_v17 = vadd.f32 %v2914_v14, %v2094_v11  ;;  %v2915_v18 = vpop.f32.mrb[36].mxu1 }
 0x382   : > { %v2916_v19 = vpop.f32.mrb[37].mxu1 }
 0x383   : > { %v2917_v47 = vadd.f32 %v2916_v19, %v2915_v18  ;;  %v3605_v20 = vpack.c.bf16 %v2283_v17, %v2278_v16 }
 0x385   : > { %v2918_v21 = vpop.f32.mrb[38].mxu1  ;;  %3606 = vmatprep.subr.bf16.mxu1 %v3605_v20  ;;  %v2288_v24 = vadd.f32 %v2917_v47, %v2094_v11 }
 0x386   : > { %v2919_v22 = vpop.f32.mrb[39].mxu1  ;;  %3608 = vmatpush3.bf16.msra.mxu1 %v3605_v20 }
 0x387   : > { %v2920_v23 = vadd.f32 %v2919_v22, %v2918_v21 }
 0x389   : > { %v2293_v48 = vadd.f32 %v2920_v23, %v2094_v11  ;;  %v2921_v52 = vpop.f32.mrb[40].mxu1 }
 0x38a   : > { %v2922_v26 = vpop.f32.mrb[41].mxu1 }
 0x38b   : > { %v2923_v28 = vadd.f32 %v2922_v26, %v2921_v52  ;;  %v3609_v29 = vpack.c.bf16 %v2293_v48, %v2288_v24 }
 0x38d   : > { %v2924_v30 = vpop.f32.mrb[42].mxu1  ;;  %3610 = vmatprep.subr.bf16.mxu1 %v3609_v29  ;;  %v2298_v56 = vadd.f32 %v2923_v28, %v2094_v11 }
 0x38e   : > { %v2925_v31 = vpop.f32.mrb[43].mxu1  ;;  %3612 = vmatpush3.bf16.msra.mxu1 %v3609_v29 }
 0x38f   : > { %v2926_v49 = vadd.f32 %v2925_v31, %v2924_v30 }
 0x391   : > { %v2303_v32 = vadd.f32 %v2926_v49, %v2094_v11  ;;  %v2927_v33 = vpop.f32.mrb[44].mxu1 }
 0x392   : > { %v2928_v50 = vpop.f32.mrb[45].mxu1 }
 0x393   : > { %v2929_v57 = vadd.f32 %v2928_v50, %v2927_v33  ;;  %v3613_v1 = vpack.c.bf16 %v2303_v32, %v2298_v56 }
 0x395   : > { %v2930_v3 = vpop.f32.mrb[46].mxu1  ;;  %3614 = vmatprep.subr.bf16.mxu1 %v3613_v1  ;;  %v2308_v25 = vadd.f32 %v2929_v57, %v2094_v11 }
 0x396   : > { %v2931_v13 = vpop.f32.mrb[47].mxu1  ;;  %3616 = vmatpush3.bf16.msra.mxu1 %v3613_v1 }
 0x397   : > { %v2932_v15 = vadd.f32 %v2931_v13, %v2930_v3 }
 0x399   : > { %v2313_v27 = vadd.f32 %v2932_v15, %v2094_v11 }
 0x39b   : > { %v3617_v53 = vpack.c.bf16 %v2313_v27, %v2308_v25 }
 0x39d   : > { %3618 = vmatprep.subr.bf16.mxu1 %v3617_v53 }
 0x39e   : > { %3620 = vmatpush3.bf16.msra.mxu1 %v3617_v53 }
 0x3dd   : > { %v2356_v34 = vpop.trf.xlu0 }
 0x3de   : > { %2973 = vmatprep.mubr.msk.f32.mxu1 %vm2372_vm0, %v2356_v34 }
 0x3e1   : > { %v2357_v35 = vpop.trf.xlu0 }
 0x3e2   : > { %2974 = vmatmul.mubr.msk.f32.vlgmr.msra.gmra.mrb[48].mxu1 %vm2372_vm0, %v2357_v35 }
 0x3e5   : > { %v2358_v55 = vpop.trf.xlu0 }
 0x3e6   : > { %2976 = vmatprep.mubr.msk.f32.mxu1 %vm2372_vm0, %v2358_v55 }
 0x3e9   : > { %v2359_v36 = vpop.trf.xlu0 }
 0x3ea   : > { %2977 = vmatmul.mubr.msk.f32.gmra.mrb[50].mxu1 %vm2372_vm0, %v2359_v36 }
 0x3ed   : > { %v2360_v37 = vpop.trf.xlu0 }
 0x3ee   : > { %2979 = vmatprep.mubr.msk.f32.mxu1 %vm2372_vm0, %v2360_v37 }
 0x3f1   : > { %v2361_v38 = vpop.trf.xlu0 }
 0x3f2   : > { %2980 = vmatmul.mubr.msk.f32.gmra.mrb[52].mxu1 %vm2372_vm0, %v2361_v38 }
 0x3f5   : > { %v2362_v39 = vpop.trf.xlu0 }
 0x3f6   : > { %2982 = vmatprep.mubr.msk.f32.mxu1 %vm2372_vm0, %v2362_v39 }
 0x3f9   : > { %v2363_v40 = vpop.trf.xlu0 }
 0x3fa   : > { %2983 = vmatmul.mubr.msk.f32.gmra.mrb[54].mxu1 %vm2372_vm0, %v2363_v40 }
 0x3fd   : > { %v2364_v41 = vpop.trf.xlu0 }
 0x3fe   : > { %2985 = vmatprep.mubr.msk.f32.mxu1 %vm2372_vm0, %v2364_v41 }
 0x401   : > { %v2365_v42 = vpop.trf.xlu0 }
 0x402   : > { %2986 = vmatmul.mubr.msk.f32.gmra.mrb[56].mxu1 %vm2372_vm0, %v2365_v42 }
 0x405   : > { %v2366_v51 = vpop.trf.xlu0 }
 0x406   : > { %2988 = vmatprep.mubr.msk.f32.mxu1 %vm2372_vm0, %v2366_v51 }
 0x409   : > { %v2367_v54 = vpop.trf.xlu0 }
 0x40a   : > { %2989 = vmatmul.mubr.msk.f32.gmra.mrb[58].mxu1 %vm2372_vm0, %v2367_v54 }
 0x40d   : > { %v2368_v58 = vpop.trf.xlu0 }
 0x40e   : > { %2991 = vmatprep.mubr.msk.f32.mxu1 %vm2372_vm0, %v2368_v58 }
 0x411   : > { %v2369_v59 = vpop.trf.xlu0 }
 0x412   : > { %2992 = vmatmul.mubr.msk.f32.gmra.mrb[60].mxu1 %vm2372_vm0, %v2369_v59 }
 0x415   : > { %v2370_v43 = vpop.trf.xlu0 }
 0x416   : > { %2994 = vmatprep.mubr.msk.f32.mxu1 %vm2372_vm0, %v2370_v43 }
 0x419   : > { %v2371_v60 = vpop.trf.xlu0 }
 0x41a   : > { %2995 = vmatmul.mubr.msk.f32.gmra.mrb[62].mxu1 %vm2372_vm0, %v2371_v60 }
 0x4b5   : > { %v2975_v61 = vpop.f32.mrb[48].mxu1 }
 0x4b6   : > { %2618 = vst [vmem:[%s4786_s11 + $0x8] sm:$0xff] %v2975_v61  ;;  %v2487_v62 = vpop.f32.mrb[49].mxu1 }
 0x4b7   : > { %2617 = vst [vmem:[%s4786_s11] sm:$0xff] %v2487_v62 }
 0x4bd   : > { %v2978_v44 = vpop.f32.mrb[50].mxu1 }
 0x4be   : > { %2620 = vst [vmem:[%s4786_s11 + $0x18] sm:$0xff] %v2978_v44  ;;  %v2497_v63 = vpop.f32.mrb[51].mxu1 }
 0x4bf   : > { %2619 = vst [vmem:[%s4786_s11 + $0x10] sm:$0xff] %v2497_v63 }
 0x4c5   : > { %v2981_v0 = vpop.f32.mrb[52].mxu1 }
 0x4c6   : > { %2622 = vst [vmem:[%s4786_s11 + $0x28] sm:$0xff] %v2981_v0  ;;  %v2507_v2 = vpop.f32.mrb[53].mxu1 }
 0x4c7   : > { %2621 = vst [vmem:[%s4786_s11 + $0x20] sm:$0xff] %v2507_v2 }
 0x4cd   : > { %v2984_v4 = vpop.f32.mrb[54].mxu1 }
 0x4ce   : > { %2624 = vst [vmem:[%s4786_s11 + $0x38] sm:$0xff] %v2984_v4  ;;  %v2517_v5 = vpop.f32.mrb[55].mxu1 }
 0x4cf   : > { %2623 = vst [vmem:[%s4786_s11 + $0x30] sm:$0xff] %v2517_v5 }
 0x4d5   : > { %v2987_v6 = vpop.f32.mrb[56].mxu1 }
 0x4d6   : > { %2626 = vst [vmem:[%s4786_s11 + $0x48] sm:$0xff] %v2987_v6  ;;  %v2527_v7 = vpop.f32.mrb[57].mxu1 }
 0x4d7   : > { %2625 = vst [vmem:[%s4786_s11 + $0x40] sm:$0xff] %v2527_v7 }
 0x4dd   : > { %v2990_v45 = vpop.f32.mrb[58].mxu1 }
 0x4de   : > { %2628 = vst [vmem:[%s4786_s11 + $0x58] sm:$0xff] %v2990_v45  ;;  %v2537_v8 = vpop.f32.mrb[59].mxu1 }
 0x4df   : > { %2627 = vst [vmem:[%s4786_s11 + $0x50] sm:$0xff] %v2537_v8 }
 0x4e5   : > { %v2993_v9 = vpop.f32.mrb[60].mxu1 }
 0x4e6   : > { %2630 = vst [vmem:[%s4786_s11 + $0x68] sm:$0xff] %v2993_v9  ;;  %v2547_v10 = vpop.f32.mrb[61].mxu1 }
 0x4e7   : > { %2629 = vst [vmem:[%s4786_s11 + $0x60] sm:$0xff] %v2547_v10 }
 0x4ed   : > { %v2996_v11 = vpop.f32.mrb[62].mxu1 }
 0x4ee   : > { %2632 = vst [vmem:[%s4786_s11 + $0x78] sm:$0xff] %v2996_v11  ;;  %v2557_v46 = vpop.f32.mrb[63].mxu1 }
 0x4ef   : > { %2631 = vst [vmem:[%s4786_s11 + $0x70] sm:$0xff] %v2557_v46 }
 0x4f0 PF: > { %s22_s29 = sadd.s32 1, %s3970_s29   ;;  %s4842_s24 = smov %s3954_s25 }
 0x4f1   : > { %p19_p9 = scmp.ge.s32.totalorder %s22_s29, 4   ;;  %s4843_s25 = smov %s3958_s26 }
 0x4f2   : > { %s4844_s26 = smov %s4135_s18  ;;  %s4845_s27 = smov %s3966_s28 }
 0x4f3   : > { %s4846_s28 = smov %s4848_s30  ;;  %21 = sbr.rel (!%p19_p9) target bundleno = 5 (0x5), region = 120 }
 0x4fa   :  { %2706 = vsyncpa [#allocation4], 1 }
 0x4fb   :  { %2708 = vsyncpa [#allocation4 + $0x1], 1 }
 0x4fc   :  { %2709 = vsyncpa [#allocation6], 1 }

</bundles_post_ra>
